<compile_context>
chip_gen: v7x
topology: tpu7x:2x2x1
jax: 0.10.0
libtpu: 0.0.40
codegen_flags: <defaults>
</compile_context>

<pallas_src>
import jax
import jax.numpy as jnp
from jax.experimental import pallas as pl
from jax.experimental.pallas import tpu as pltpu


def _double_conv_kernel(x_ref, w1_ref, b1_ref, w2_ref, b2_ref, o_ref, mid_ref):
    """One batch element per grid step.

    x_ref  : (1, Hp*Wp + 2, Cin)  flattened zero-padded input (channels on lanes)
    w1_ref : (9, Cin, Cmid)       conv1 weights (BN1 scale folded in), tap = dy*3+dx
    b1_ref : (1, Cmid)            folded BN1 bias
    w2_ref : (9, Cmid, Cout)      conv2 weights (BN2 scale folded in)
    b2_ref : (1, Cout)            folded BN2 bias
    o_ref  : (1, H, W*Cout)       lane-dense output tile
    mid_ref: (Hp*Wp + 2, Cmid)    VMEM scratch: flattened zero-padded intermediate
    """
    H = o_ref.shape[1]
    c_mid = w1_ref.shape[2]
    c_out = w2_ref.shape[2]
    W = o_ref.shape[2] // c_out
    Wp = W + 2
    M = H * Wp                      # number of anchor rows per conv

    def conv3x3_bias_relu(load_tap, w_ref, b_ref, n_out):
        # Seed the f32 accumulator with the folded BN bias (hoisted broadcast),
        # then 9 row-offset slices of the flattened padded slab, one MXU matmul each.
        acc = jnp.broadcast_to(b_ref[...].astype(jnp.float32), (M, n_out))
        for dy in range(3):
            for dx in range(3):
                off = dy * Wp + dx
                acc = acc + jnp.dot(load_tap(off), w_ref[dy * 3 + dx],
                                    preferred_element_type=jnp.float32)
        return jnp.maximum(acc, 0.0)          # (M, n_out) float32

    # ---- conv1 + BN1 bias + ReLU ---------------------------------------------
    y = conv3x3_bias_relu(lambda off: x_ref[0, off:off + M, :], w1_ref, b1_ref, c_mid)
    # Anchor rows whose column index falls in the horizontal padding are garbage;
    # mask them to 0 — they land exactly on the padding columns of `mid`.
    col = jax.lax.broadcasted_iota(jnp.int32, (M, 1), 0) % Wp
    y = jnp.where(col < W, y, 0.0)

    # ---- write padded intermediate: border rows zero + one interior store ------
    border = jnp.zeros((Wp + 1, c_mid), mid_ref.dtype)
    mid_ref[0:Wp + 1, :] = border                         # top pad row + (1, 0)
    mid_ref[Wp + 1 + M:2 * (Wp + 1) + M, :] = border      # bottom pad row tail + extras
    mid_ref[Wp + 1:Wp + 1 + M, :] = y.astype(mid_ref.dtype)

    # ---- conv2 + BN2 bias + ReLU ----------------------------------------------
    z = conv3x3_bias_relu(lambda off: mid_ref[off:off + M, :], w2_ref, b2_ref, c_out)
    # Drop the 2 padding columns of each image row; store lane-dense (H, W*Cout).
    z = z.reshape(H, Wp, c_out)[:, :W, :].reshape(H, W * c_out)
    o_ref[...] = z[None].astype(o_ref.dtype)


def double_conv_pallas(x_nchw, w1_oihw, bn1, w2_oihw, bn2, eps=1e-5,
                       compute_dtype=jnp.float32):
    """bn1/bn2 = (gamma, beta, running_mean, running_var), each shape (C,).

    Eval-mode BatchNorm is folded into the conv weights (scale) and a bias.
    compute_dtype=jnp.bfloat16 feeds the MXU in bf16 (f32 accumulate).
    """
    g1, be1, rm1, rv1 = bn1
    g2, be2, rm2, rv2 = bn2
    N, Cin, H, W = x_nchw.shape
    Cmid = w1_oihw.shape[0]
    Cout = w2_oihw.shape[0]
    Hp, Wp = H + 2, W + 2
    Lf = Hp * Wp + 2    # +2 tail rows so every tap slice of length H*Wp is in-bounds

    # glue (plain JAX): NCHW -> NHWC, zero-pad, flatten rows, fold BN into w / b.
    x = jnp.transpose(x_nchw, (0, 2, 3, 1))                      # NHWC
    xp = jnp.pad(x, ((0, 0), (1, 1), (1, 1), (0, 0)))            # spatial pad = 1
    xf = jnp.pad(xp.reshape(N, Hp * Wp, Cin), ((0, 0), (0, 2), (0, 0)))
    xf = xf.astype(compute_dtype)

    s1 = g1 / jnp.sqrt(rv1 + eps)
    s2 = g2 / jnp.sqrt(rv2 + eps)
    w1 = jnp.transpose(w1_oihw, (2, 3, 1, 0)) * s1[None, None, None, :]  # (3,3,Ci,Cm)
    w2 = jnp.transpose(w2_oihw, (2, 3, 1, 0)) * s2[None, None, None, :]  # (3,3,Cm,Co)
    w1 = w1.reshape(9, Cin, Cmid).astype(compute_dtype)
    w2 = w2.reshape(9, Cmid, Cout).astype(compute_dtype)
    b1 = (be1 - rm1 * s1).reshape(1, Cmid).astype(jnp.float32)
    b2 = (be2 - rm2 * s2).reshape(1, Cout).astype(jnp.float32)

    out_flat = pl.pallas_call(
        _double_conv_kernel,
        out_shape=jax.ShapeDtypeStruct((N, H, W * Cout), x_nchw.dtype),
        grid_spec=pltpu.PrefetchScalarGridSpec(
            num_scalar_prefetch=0,
            grid=(N,),
            in_specs=[
                pl.BlockSpec((1, Lf, Cin), lambda n: (n, 0, 0)),
                pl.BlockSpec((9, Cin, Cmid), lambda n: (0, 0, 0)),
                pl.BlockSpec((1, Cmid), lambda n: (0, 0)),
                pl.BlockSpec((9, Cmid, Cout), lambda n: (0, 0, 0)),
                pl.BlockSpec((1, Cout), lambda n: (0, 0)),
            ],
            out_specs=pl.BlockSpec((1, H, W * Cout), lambda n: (n, 0, 0)),
            scratch_shapes=[pltpu.VMEM((Lf, Cmid), compute_dtype)],
        ),
        compiler_params=pltpu.CompilerParams(dimension_semantics=("parallel",)),
    )(xf, w1, b1, w2, b2)

    out = out_flat.reshape(N, H, W, Cout)
    return jnp.transpose(out, (0, 3, 1, 2))                      # back to NCHW


def double_conv_ref(x_nchw, w1_oihw, bn1, w2_oihw, bn2, eps=1e-5):
    """Pure-JAX reference matching PyTorch eval-mode semantics."""
    def conv(x, w):
        return jax.lax.conv_general_dilated(
            x, w, window_strides=(1, 1), padding=((1, 1), (1, 1)),
            dimension_numbers=("NCHW", "OIHW", "NCHW"))

    def bn(x, params):
        g, b, rm, rv = params
        return ((x - rm[None, :, None, None]) / jnp.sqrt(rv[None, :, None, None] + eps)
                * g[None, :, None, None] + b[None, :, None, None])

    y = jnp.maximum(bn(conv(x_nchw, w1_oihw), bn1), 0.0)
    z = jnp.maximum(bn(conv(y, w2_oihw), bn2), 0.0)
    return z


if __name__ == "__main__":
    key = jax.random.PRNGKey(0)
    ks = jax.random.split(key, 12)

    N, Cin, H, W = 2, 4, 16, 16
    Cmid = Cout = 8  # mid_channels defaults to out_channels

    x = jax.random.normal(ks[0], (N, Cin, H, W), jnp.float32)

    # Conv2d weights (OIHW, no bias), deterministic synthetic init
    w1 = jax.random.normal(ks[1], (Cmid, Cin, 3, 3), jnp.float32) * 0.2
    w2 = jax.random.normal(ks[2], (Cout, Cmid, 3, 3), jnp.float32) * 0.2

    # BatchNorm2d parameters / running stats, deterministic non-trivial values
    bn1 = (1.0 + 0.1 * jax.random.normal(ks[3], (Cmid,), jnp.float32),   # gamma
           0.1 * jax.random.normal(ks[4], (Cmid,), jnp.float32),         # beta
           0.1 * jax.random.normal(ks[5], (Cmid,), jnp.float32),         # running_mean
           1.0 + 0.1 * jax.random.uniform(ks[6], (Cmid,), jnp.float32))  # running_var
    bn2 = (1.0 + 0.1 * jax.random.normal(ks[7], (Cout,), jnp.float32),
           0.1 * jax.random.normal(ks[8], (Cout,), jnp.float32),
           0.1 * jax.random.normal(ks[9], (Cout,), jnp.float32),
           1.0 + 0.1 * jax.random.uniform(ks[10], (Cout,), jnp.float32))

    ref = double_conv_ref(x, w1, bn1, w2, bn2)

    # f32 path: must match PyTorch eval-mode numerics tightly.
    out = jax.block_until_ready(double_conv_pallas(x, w1, bn1, w2, bn2))
    assert out.shape == (N, Cout, H, W), out.shape
    assert jnp.allclose(out, ref, atol=1e-4, rtol=1e-4), \
        float(jnp.max(jnp.abs(out - ref)))

    # bf16 MXU path: same kernel, bf16 operands, f32 accumulate.
    out_bf16 = jax.block_until_ready(
        double_conv_pallas(x, w1, bn1, w2, bn2, compute_dtype=jnp.bfloat16))
    assert out_bf16.shape == (N, Cout, H, W), out_bf16.shape
    assert jnp.allclose(out_bf16, ref, atol=0.5, rtol=0.1), \
        float(jnp.max(jnp.abs(out_bf16 - ref)))

    print("KERNEL_OK")
</pallas_src>

<mosaic_0001>
module attributes {stable_mosaic.version = 11 : i64} {
  func.func @_double_conv_kernel(%arg0: i32, %arg1: memref<1x326x4xf32, #tpu.memory_space<vmem>>, %arg2: memref<9x4x8xf32, #tpu.memory_space<vmem>>, %arg3: memref<1x8xf32, #tpu.memory_space<vmem>>, %arg4: memref<9x8x8xf32, #tpu.memory_space<vmem>>, %arg5: memref<1x8xf32, #tpu.memory_space<vmem>>, %arg6: memref<1x16x128xf32, #tpu.memory_space<vmem>>, %arg7: memref<326x8xf32, #tpu.memory_space<vmem>>) attributes {dimension_semantics = [#tpu.dimension_semantics<parallel>], iteration_bounds = array<i64: 2>, scalar_prefetch = 0 : i64, scratch_operands = 1 : i64, tpu.core_type = #tpu.core_type<tc>, window_params = [{transform_indices = @transform_0, window_bounds = array<i64: 1, 326, 4>}, {pipeline_mode = #tpu.pipeline_mode<synchronous>, transform_indices = @transform_1, window_bounds = array<i64: 9, 4, 8>}, {pipeline_mode = #tpu.pipeline_mode<synchronous>, transform_indices = @transform_2, window_bounds = array<i64: 1, 8>}, {pipeline_mode = #tpu.pipeline_mode<synchronous>, transform_indices = @transform_3, window_bounds = array<i64: 9, 8, 8>}, {pipeline_mode = #tpu.pipeline_mode<synchronous>, transform_indices = @transform_4, window_bounds = array<i64: 1, 8>}, {transform_indices = @transform_5, window_bounds = array<i64: 1, 16, 128>}]} {
    %c0 = arith.constant 0 : index
    %c0_0 = arith.constant 0 : index
    %0 = vector.load %arg3[%c0, %c0_0] : memref<1x8xf32, #tpu.memory_space<vmem>>, vector<1x8xf32>
    %1 = vector.shape_cast %0 : vector<1x8xf32> to vector<1x8xf32>
    %2 = vector.broadcast %1 : vector<1x8xf32> to vector<288x8xf32>
    %c0_1 = arith.constant 0 : index
    %c0_2 = arith.constant 0 : index
    %c0_3 = arith.constant 0 : index
    %3 = vector.load %arg1[%c0_1, %c0_2, %c0_3] : memref<1x326x4xf32, #tpu.memory_space<vmem>>, vector<1x288x4xf32>
    %4 = vector.shape_cast %3 : vector<1x288x4xf32> to vector<288x4xf32>
    %c0_4 = arith.constant 0 : index
    %c0_5 = arith.constant 0 : index
    %c0_6 = arith.constant 0 : index
    %5 = vector.load %arg2[%c0_4, %c0_5, %c0_6] : memref<9x4x8xf32, #tpu.memory_space<vmem>>, vector<1x4x8xf32>
    %6 = vector.shape_cast %5 : vector<1x4x8xf32> to vector<4x8xf32>
    %cst = arith.constant dense<0.000000e+00> : vector<288x8xf32>
    %7 = tpu.matmul %4, %6, %cst {dimension_numbers = #tpu.dot_dimension_numbers<[1], [0], [0], [1], [0, 0, 1, 1], [], []>} : vector<288x4xf32>, vector<4x8xf32>, vector<288x8xf32> -> vector<288x8xf32>
    %8 = arith.addf %2, %7 : vector<288x8xf32>
    %c0_7 = arith.constant 0 : index
    %c1 = arith.constant 1 : index
    %c0_8 = arith.constant 0 : index
    %9 = vector.load %arg1[%c0_7, %c1, %c0_8] : memref<1x326x4xf32, #tpu.memory_space<vmem>>, vector<1x288x4xf32>
    %10 = vector.shape_cast %9 : vector<1x288x4xf32> to vector<288x4xf32>
    %c1_9 = arith.constant 1 : index
    %c0_10 = arith.constant 0 : index
    %c0_11 = arith.constant 0 : index
    %11 = vector.load %arg2[%c1_9, %c0_10, %c0_11] : memref<9x4x8xf32, #tpu.memory_space<vmem>>, vector<1x4x8xf32>
    %12 = vector.shape_cast %11 : vector<1x4x8xf32> to vector<4x8xf32>
    %cst_12 = arith.constant dense<0.000000e+00> : vector<288x8xf32>
    %13 = tpu.matmul %10, %12, %cst_12 {dimension_numbers = #tpu.dot_dimension_numbers<[1], [0], [0], [1], [0, 0, 1, 1], [], []>} : vector<288x4xf32>, vector<4x8xf32>, vector<288x8xf32> -> vector<288x8xf32>
    %14 = arith.addf %8, %13 : vector<288x8xf32>
    %c0_13 = arith.constant 0 : index
    %c2 = arith.constant 2 : index
    %c0_14 = arith.constant 0 : index
    %15 = vector.load %arg1[%c0_13, %c2, %c0_14] : memref<1x326x4xf32, #tpu.memory_space<vmem>>, vector<1x288x4xf32>
    %16 = vector.shape_cast %15 : vector<1x288x4xf32> to vector<288x4xf32>
    %c2_15 = arith.constant 2 : index
    %c0_16 = arith.constant 0 : index
    %c0_17 = arith.constant 0 : index
    %17 = vector.load %arg2[%c2_15, %c0_16, %c0_17] : memref<9x4x8xf32, #tpu.memory_space<vmem>>, vector<1x4x8xf32>
    %18 = vector.shape_cast %17 : vector<1x4x8xf32> to vector<4x8xf32>
    %cst_18 = arith.constant dense<0.000000e+00> : vector<288x8xf32>
    %19 = tpu.matmul %16, %18, %cst_18 {dimension_numbers = #tpu.dot_dimension_numbers<[1], [0], [0], [1], [0, 0, 1, 1], [], []>} : vector<288x4xf32>, vector<4x8xf32>, vector<288x8xf32> -> vector<288x8xf32>
    %20 = arith.addf %14, %19 : vector<288x8xf32>
    %c0_19 = arith.constant 0 : index
    %c18 = arith.constant 18 : index
    %c0_20 = arith.constant 0 : index
    %21 = vector.load %arg1[%c0_19, %c18, %c0_20] : memref<1x326x4xf32, #tpu.memory_space<vmem>>, vector<1x288x4xf32>
    %22 = vector.shape_cast %21 : vector<1x288x4xf32> to vector<288x4xf32>
    %c3 = arith.constant 3 : index
    %c0_21 = arith.constant 0 : index
    %c0_22 = arith.constant 0 : index
    %23 = vector.load %arg2[%c3, %c0_21, %c0_22] : memref<9x4x8xf32, #tpu.memory_space<vmem>>, vector<1x4x8xf32>
    %24 = vector.shape_cast %23 : vector<1x4x8xf32> to vector<4x8xf32>
    %cst_23 = arith.constant dense<0.000000e+00> : vector<288x8xf32>
    %25 = tpu.matmul %22, %24, %cst_23 {dimension_numbers = #tpu.dot_dimension_numbers<[1], [0], [0], [1], [0, 0, 1, 1], [], []>} : vector<288x4xf32>, vector<4x8xf32>, vector<288x8xf32> -> vector<288x8xf32>
    %26 = arith.addf %20, %25 : vector<288x8xf32>
    %c0_24 = arith.constant 0 : index
    %c19 = arith.constant 19 : index
    %c0_25 = arith.constant 0 : index
    %27 = vector.load %arg1[%c0_24, %c19, %c0_25] : memref<1x326x4xf32, #tpu.memory_space<vmem>>, vector<1x288x4xf32>
    %28 = vector.shape_cast %27 : vector<1x288x4xf32> to vector<288x4xf32>
    %c4 = arith.constant 4 : index
    %c0_26 = arith.constant 0 : index
    %c0_27 = arith.constant 0 : index
    %29 = vector.load %arg2[%c4, %c0_26, %c0_27] : memref<9x4x8xf32, #tpu.memory_space<vmem>>, vector<1x4x8xf32>
    %30 = vector.shape_cast %29 : vector<1x4x8xf32> to vector<4x8xf32>
    %cst_28 = arith.constant dense<0.000000e+00> : vector<288x8xf32>
    %31 = tpu.matmul %28, %30, %cst_28 {dimension_numbers = #tpu.dot_dimension_numbers<[1], [0], [0], [1], [0, 0, 1, 1], [], []>} : vector<288x4xf32>, vector<4x8xf32>, vector<288x8xf32> -> vector<288x8xf32>
    %32 = arith.addf %26, %31 : vector<288x8xf32>
    %c0_29 = arith.constant 0 : index
    %c20 = arith.constant 20 : index
    %c0_30 = arith.constant 0 : index
    %33 = vector.load %arg1[%c0_29, %c20, %c0_30] : memref<1x326x4xf32, #tpu.memory_space<vmem>>, vector<1x288x4xf32>
    %34 = vector.shape_cast %33 : vector<1x288x4xf32> to vector<288x4xf32>
    %c5 = arith.constant 5 : index
    %c0_31 = arith.constant 0 : index
    %c0_32 = arith.constant 0 : index
    %35 = vector.load %arg2[%c5, %c0_31, %c0_32] : memref<9x4x8xf32, #tpu.memory_space<vmem>>, vector<1x4x8xf32>
    %36 = vector.shape_cast %35 : vector<1x4x8xf32> to vector<4x8xf32>
    %cst_33 = arith.constant dense<0.000000e+00> : vector<288x8xf32>
    %37 = tpu.matmul %34, %36, %cst_33 {dimension_numbers = #tpu.dot_dimension_numbers<[1], [0], [0], [1], [0, 0, 1, 1], [], []>} : vector<288x4xf32>, vector<4x8xf32>, vector<288x8xf32> -> vector<288x8xf32>
    %38 = arith.addf %32, %37 : vector<288x8xf32>
    %c0_34 = arith.constant 0 : index
    %c36 = arith.constant 36 : index
    %c0_35 = arith.constant 0 : index
    %39 = vector.load %arg1[%c0_34, %c36, %c0_35] : memref<1x326x4xf32, #tpu.memory_space<vmem>>, vector<1x288x4xf32>
    %40 = vector.shape_cast %39 : vector<1x288x4xf32> to vector<288x4xf32>
    %c6 = arith.constant 6 : index
    %c0_36 = arith.constant 0 : index
    %c0_37 = arith.constant 0 : index
    %41 = vector.load %arg2[%c6, %c0_36, %c0_37] : memref<9x4x8xf32, #tpu.memory_space<vmem>>, vector<1x4x8xf32>
    %42 = vector.shape_cast %41 : vector<1x4x8xf32> to vector<4x8xf32>
    %cst_38 = arith.constant dense<0.000000e+00> : vector<288x8xf32>
    %43 = tpu.matmul %40, %42, %cst_38 {dimension_numbers = #tpu.dot_dimension_numbers<[1], [0], [0], [1], [0, 0, 1, 1], [], []>} : vector<288x4xf32>, vector<4x8xf32>, vector<288x8xf32> -> vector<288x8xf32>
    %44 = arith.addf %38, %43 : vector<288x8xf32>
    %c0_39 = arith.constant 0 : index
    %c37 = arith.constant 37 : index
    %c0_40 = arith.constant 0 : index
    %45 = vector.load %arg1[%c0_39, %c37, %c0_40] : memref<1x326x4xf32, #tpu.memory_space<vmem>>, vector<1x288x4xf32>
    %46 = vector.shape_cast %45 : vector<1x288x4xf32> to vector<288x4xf32>
    %c7 = arith.constant 7 : index
    %c0_41 = arith.constant 0 : index
    %c0_42 = arith.constant 0 : index
    %47 = vector.load %arg2[%c7, %c0_41, %c0_42] : memref<9x4x8xf32, #tpu.memory_space<vmem>>, vector<1x4x8xf32>
    %48 = vector.shape_cast %47 : vector<1x4x8xf32> to vector<4x8xf32>
    %cst_43 = arith.constant dense<0.000000e+00> : vector<288x8xf32>
    %49 = tpu.matmul %46, %48, %cst_43 {dimension_numbers = #tpu.dot_dimension_numbers<[1], [0], [0], [1], [0, 0, 1, 1], [], []>} : vector<288x4xf32>, vector<4x8xf32>, vector<288x8xf32> -> vector<288x8xf32>
    %50 = arith.addf %44, %49 : vector<288x8xf32>
    %c0_44 = arith.constant 0 : index
    %c38 = arith.constant 38 : index
    %c0_45 = arith.constant 0 : index
    %51 = vector.load %arg1[%c0_44, %c38, %c0_45] : memref<1x326x4xf32, #tpu.memory_space<vmem>>, vector<1x288x4xf32>
    %52 = vector.shape_cast %51 : vector<1x288x4xf32> to vector<288x4xf32>
    %c8 = arith.constant 8 : index
    %c0_46 = arith.constant 0 : index
    %c0_47 = arith.constant 0 : index
    %53 = vector.load %arg2[%c8, %c0_46, %c0_47] : memref<9x4x8xf32, #tpu.memory_space<vmem>>, vector<1x4x8xf32>
    %54 = vector.shape_cast %53 : vector<1x4x8xf32> to vector<4x8xf32>
    %cst_48 = arith.constant dense<0.000000e+00> : vector<288x8xf32>
    %55 = tpu.matmul %52, %54, %cst_48 {dimension_numbers = #tpu.dot_dimension_numbers<[1], [0], [0], [1], [0, 0, 1, 1], [], []>} : vector<288x4xf32>, vector<4x8xf32>, vector<288x8xf32> -> vector<288x8xf32>
    %56 = arith.addf %50, %55 : vector<288x8xf32>
    %cst_49 = arith.constant 0.000000e+00 : f32
    %57 = vector.broadcast %cst_49 : f32 to vector<288x8xf32>
    %58 = arith.maximumf %56, %57 : vector<288x8xf32>
    %59 = tpu.iota {dimensions = array<i32: 0>} : vector<288x1xi32>
    %c18_i32 = arith.constant 18 : i32
    %c0_i32 = arith.constant 0 : i32
    %60 = arith.cmpi eq, %c18_i32, %c0_i32 : i32
    %c1_i32 = arith.constant 1 : i32
    %61 = arith.select %60, %c1_i32, %c18_i32 : i32
    %62 = vector.broadcast %61 : i32 to vector<288x1xi32>
    %63 = arith.remsi %59, %62 : vector<288x1xi32>
    %c0_i32_50 = arith.constant 0 : i32
    %64 = vector.broadcast %c0_i32_50 : i32 to vector<288x1xi32>
    %65 = arith.cmpi ne, %63, %64 : vector<288x1xi32>
    %c0_i32_51 = arith.constant 0 : i32
    %66 = vector.broadcast %c0_i32_51 : i32 to vector<288x1xi32>
    %67 = arith.cmpi slt, %63, %66 : vector<288x1xi32>
    %c0_i32_52 = arith.constant 0 : i32
    %68 = arith.cmpi slt, %61, %c0_i32_52 : i32
    %69 = vector.broadcast %68 : i1 to vector<288x1xi1>
    %70 = vector.broadcast %69 : vector<288x1xi1> to vector<288x1xi1>
    %71 = arith.xori %67, %70 : vector<288x1xi1>
    %72 = arith.andi %71, %65 : vector<288x1xi1>
    %73 = vector.broadcast %61 : i32 to vector<288x1xi32>
    %74 = arith.addi %63, %73 : vector<288x1xi32>
    %75 = arith.select %72, %74, %63 : vector<288x1xi1>, vector<288x1xi32>
    %c16_i32 = arith.constant 16 : i32
    %76 = vector.broadcast %c16_i32 : i32 to vector<288x1xi32>
    %77 = arith.cmpi slt, %75, %76 : vector<288x1xi32>
    %cst_53 = arith.constant 0.000000e+00 : f32
    %78 = vector.shape_cast %77 : vector<288x1xi1> to vector<288x1xi1>
    %79 = vector.broadcast %78 : vector<288x1xi1> to vector<288x8xi1>
    %80 = vector.broadcast %cst_53 : f32 to vector<288x8xf32>
    %81 = arith.select %79, %58, %80 : vector<288x8xi1>, vector<288x8xf32>
    %cst_54 = arith.constant 0.000000e+00 : f32
    %82 = vector.broadcast %cst_54 : f32 to vector<19x8xf32>
    %c0_55 = arith.constant 0 : index
    %c0_56 = arith.constant 0 : index
    %83 = vector.load %arg7[%c0_55, %c0_56] : memref<326x8xf32, #tpu.memory_space<vmem>>, vector<19x8xf32>
    tpu.vector_store %arg7[%c0_55, %c0_56], %82 {strides = array<i32>} : memref<326x8xf32, #tpu.memory_space<vmem>>, vector<19x8xf32>,
    %c307 = arith.constant 307 : index
    %c0_57 = arith.constant 0 : index
    %84 = vector.load %arg7[%c307, %c0_57] : memref<326x8xf32, #tpu.memory_space<vmem>>, vector<19x8xf32>
    tpu.vector_store %arg7[%c307, %c0_57], %82 {strides = array<i32>} : memref<326x8xf32, #tpu.memory_space<vmem>>, vector<19x8xf32>,
    %c19_58 = arith.constant 19 : index
    %c0_59 = arith.constant 0 : index
    %85 = vector.load %arg7[%c19_58, %c0_59] : memref<326x8xf32, #tpu.memory_space<vmem>>, vector<288x8xf32>
    tpu.vector_store %arg7[%c19_58, %c0_59], %81 {strides = array<i32>} : memref<326x8xf32, #tpu.memory_space<vmem>>, vector<288x8xf32>,
    %c0_60 = arith.constant 0 : index
    %c0_61 = arith.constant 0 : index
    %86 = vector.load %arg5[%c0_60, %c0_61] : memref<1x8xf32, #tpu.memory_space<vmem>>, vector<1x8xf32>
    %87 = vector.shape_cast %86 : vector<1x8xf32> to vector<1x8xf32>
    %88 = vector.broadcast %87 : vector<1x8xf32> to vector<288x8xf32>
    %c0_62 = arith.constant 0 : index
    %c0_63 = arith.constant 0 : index
    %89 = vector.load %arg7[%c0_62, %c0_63] : memref<326x8xf32, #tpu.memory_space<vmem>>, vector<288x8xf32>
    %c0_64 = arith.constant 0 : index
    %c0_65 = arith.constant 0 : index
    %c0_66 = arith.constant 0 : index
    %90 = vector.load %arg4[%c0_64, %c0_65, %c0_66] : memref<9x8x8xf32, #tpu.memory_space<vmem>>, vector<1x8x8xf32>
    %91 = vector.shape_cast %90 : vector<1x8x8xf32> to vector<8x8xf32>
    %cst_67 = arith.constant dense<0.000000e+00> : vector<288x8xf32>
    %92 = tpu.matmul %89, %91, %cst_67 {dimension_numbers = #tpu.dot_dimension_numbers<[1], [0], [0], [1], [0, 0, 1, 1], [], []>} : vector<288x8xf32>, vector<8x8xf32>, vector<288x8xf32> -> vector<288x8xf32>
    %93 = arith.addf %88, %92 : vector<288x8xf32>
    %c1_68 = arith.constant 1 : index
    %c0_69 = arith.constant 0 : index
    %94 = vector.load %arg7[%c1_68, %c0_69] : memref<326x8xf32, #tpu.memory_space<vmem>>, vector<288x8xf32>
    %c1_70 = arith.constant 1 : index
    %c0_71 = arith.constant 0 : index
    %c0_72 = arith.constant 0 : index
    %95 = vector.load %arg4[%c1_70, %c0_71, %c0_72] : memref<9x8x8xf32, #tpu.memory_space<vmem>>, vector<1x8x8xf32>
    %96 = vector.shape_cast %95 : vector<1x8x8xf32> to vector<8x8xf32>
    %cst_73 = arith.constant dense<0.000000e+00> : vector<288x8xf32>
    %97 = tpu.matmul %94, %96, %cst_73 {dimension_numbers = #tpu.dot_dimension_numbers<[1], [0], [0], [1], [0, 0, 1, 1], [], []>} : vector<288x8xf32>, vector<8x8xf32>, vector<288x8xf32> -> vector<288x8xf32>
    %98 = arith.addf %93, %97 : vector<288x8xf32>
    %c2_74 = arith.constant 2 : index
    %c0_75 = arith.constant 0 : index
    %99 = vector.load %arg7[%c2_74, %c0_75] : memref<326x8xf32, #tpu.memory_space<vmem>>, vector<288x8xf32>
    %c2_76 = arith.constant 2 : index
    %c0_77 = arith.constant 0 : index
    %c0_78 = arith.constant 0 : index
    %100 = vector.load %arg4[%c2_76, %c0_77, %c0_78] : memref<9x8x8xf32, #tpu.memory_space<vmem>>, vector<1x8x8xf32>
    %101 = vector.shape_cast %100 : vector<1x8x8xf32> to vector<8x8xf32>
    %cst_79 = arith.constant dense<0.000000e+00> : vector<288x8xf32>
    %102 = tpu.matmul %99, %101, %cst_79 {dimension_numbers = #tpu.dot_dimension_numbers<[1], [0], [0], [1], [0, 0, 1, 1], [], []>} : vector<288x8xf32>, vector<8x8xf32>, vector<288x8xf32> -> vector<288x8xf32>
    %103 = arith.addf %98, %102 : vector<288x8xf32>
    %c18_80 = arith.constant 18 : index
    %c0_81 = arith.constant 0 : index
    %104 = vector.load %arg7[%c18_80, %c0_81] : memref<326x8xf32, #tpu.memory_space<vmem>>, vector<288x8xf32>
    %c3_82 = arith.constant 3 : index
    %c0_83 = arith.constant 0 : index
    %c0_84 = arith.constant 0 : index
    %105 = vector.load %arg4[%c3_82, %c0_83, %c0_84] : memref<9x8x8xf32, #tpu.memory_space<vmem>>, vector<1x8x8xf32>
    %106 = vector.shape_cast %105 : vector<1x8x8xf32> to vector<8x8xf32>
    %cst_85 = arith.constant dense<0.000000e+00> : vector<288x8xf32>
    %107 = tpu.matmul %104, %106, %cst_85 {dimension_numbers = #tpu.dot_dimension_numbers<[1], [0], [0], [1], [0, 0, 1, 1], [], []>} : vector<288x8xf32>, vector<8x8xf32>, vector<288x8xf32> -> vector<288x8xf32>
    %108 = arith.addf %103, %107 : vector<288x8xf32>
    %c19_86 = arith.constant 19 : index
    %c0_87 = arith.constant 0 : index
    %109 = vector.load %arg7[%c19_86, %c0_87] : memref<326x8xf32, #tpu.memory_space<vmem>>, vector<288x8xf32>
    %c4_88 = arith.constant 4 : index
    %c0_89 = arith.constant 0 : index
    %c0_90 = arith.constant 0 : index
    %110 = vector.load %arg4[%c4_88, %c0_89, %c0_90] : memref<9x8x8xf32, #tpu.memory_space<vmem>>, vector<1x8x8xf32>
    %111 = vector.shape_cast %110 : vector<1x8x8xf32> to vector<8x8xf32>
    %cst_91 = arith.constant dense<0.000000e+00> : vector<288x8xf32>
    %112 = tpu.matmul %109, %111, %cst_91 {dimension_numbers = #tpu.dot_dimension_numbers<[1], [0], [0], [1], [0, 0, 1, 1], [], []>} : vector<288x8xf32>, vector<8x8xf32>, vector<288x8xf32> -> vector<288x8xf32>
    %113 = arith.addf %108, %112 : vector<288x8xf32>
    %c20_92 = arith.constant 20 : index
    %c0_93 = arith.constant 0 : index
    %114 = vector.load %arg7[%c20_92, %c0_93] : memref<326x8xf32, #tpu.memory_space<vmem>>, vector<288x8xf32>
    %c5_94 = arith.constant 5 : index
    %c0_95 = arith.constant 0 : index
    %c0_96 = arith.constant 0 : index
    %115 = vector.load %arg4[%c5_94, %c0_95, %c0_96] : memref<9x8x8xf32, #tpu.memory_space<vmem>>, vector<1x8x8xf32>
    %116 = vector.shape_cast %115 : vector<1x8x8xf32> to vector<8x8xf32>
    %cst_97 = arith.constant dense<0.000000e+00> : vector<288x8xf32>
    %117 = tpu.matmul %114, %116, %cst_97 {dimension_numbers = #tpu.dot_dimension_numbers<[1], [0], [0], [1], [0, 0, 1, 1], [], []>} : vector<288x8xf32>, vector<8x8xf32>, vector<288x8xf32> -> vector<288x8xf32>
    %118 = arith.addf %113, %117 : vector<288x8xf32>
    %c36_98 = arith.constant 36 : index
    %c0_99 = arith.constant 0 : index
    %119 = vector.load %arg7[%c36_98, %c0_99] : memref<326x8xf32, #tpu.memory_space<vmem>>, vector<288x8xf32>
    %c6_100 = arith.constant 6 : index
    %c0_101 = arith.constant 0 : index
    %c0_102 = arith.constant 0 : index
    %120 = vector.load %arg4[%c6_100, %c0_101, %c0_102] : memref<9x8x8xf32, #tpu.memory_space<vmem>>, vector<1x8x8xf32>
    %121 = vector.shape_cast %120 : vector<1x8x8xf32> to vector<8x8xf32>
    %cst_103 = arith.constant dense<0.000000e+00> : vector<288x8xf32>
    %122 = tpu.matmul %119, %121, %cst_103 {dimension_numbers = #tpu.dot_dimension_numbers<[1], [0], [0], [1], [0, 0, 1, 1], [], []>} : vector<288x8xf32>, vector<8x8xf32>, vector<288x8xf32> -> vector<288x8xf32>
    %123 = arith.addf %118, %122 : vector<288x8xf32>
    %c37_104 = arith.constant 37 : index
    %c0_105 = arith.constant 0 : index
    %124 = vector.load %arg7[%c37_104, %c0_105] : memref<326x8xf32, #tpu.memory_space<vmem>>, vector<288x8xf32>
    %c7_106 = arith.constant 7 : index
    %c0_107 = arith.constant 0 : index
    %c0_108 = arith.constant 0 : index
    %125 = vector.load %arg4[%c7_106, %c0_107, %c0_108] : memref<9x8x8xf32, #tpu.memory_space<vmem>>, vector<1x8x8xf32>
    %126 = vector.shape_cast %125 : vector<1x8x8xf32> to vector<8x8xf32>
    %cst_109 = arith.constant dense<0.000000e+00> : vector<288x8xf32>
    %127 = tpu.matmul %124, %126, %cst_109 {dimension_numbers = #tpu.dot_dimension_numbers<[1], [0], [0], [1], [0, 0, 1, 1], [], []>} : vector<288x8xf32>, vector<8x8xf32>, vector<288x8xf32> -> vector<288x8xf32>
    %128 = arith.addf %123, %127 : vector<288x8xf32>
    %c38_110 = arith.constant 38 : index
    %c0_111 = arith.constant 0 : index
    %129 = vector.load %arg7[%c38_110, %c0_111] : memref<326x8xf32, #tpu.memory_space<vmem>>, vector<288x8xf32>
    %c8_112 = arith.constant 8 : index
    %c0_113 = arith.constant 0 : index
    %c0_114 = arith.constant 0 : index
    %130 = vector.load %arg4[%c8_112, %c0_113, %c0_114] : memref<9x8x8xf32, #tpu.memory_space<vmem>>, vector<1x8x8xf32>
    %131 = vector.shape_cast %130 : vector<1x8x8xf32> to vector<8x8xf32>
    %cst_115 = arith.constant dense<0.000000e+00> : vector<288x8xf32>
    %132 = tpu.matmul %129, %131, %cst_115 {dimension_numbers = #tpu.dot_dimension_numbers<[1], [0], [0], [1], [0, 0, 1, 1], [], []>} : vector<288x8xf32>, vector<8x8xf32>, vector<288x8xf32> -> vector<288x8xf32>
    %133 = arith.addf %128, %132 : vector<288x8xf32>
    %cst_116 = arith.constant 0.000000e+00 : f32
    %134 = vector.broadcast %cst_116 : f32 to vector<288x8xf32>
    %135 = arith.maximumf %133, %134 : vector<288x8xf32>
    %136 = vector.shape_cast %135 : vector<288x8xf32> to vector<16x18x8xf32>
    %137 = vector.extract_strided_slice %136 {offsets = [0, 0, 0], sizes = [16, 16, 8], strides = [1, 1, 1]} : vector<16x18x8xf32> to vector<16x16x8xf32>
    %138 = vector.shape_cast %137 : vector<16x16x8xf32> to vector<16x128xf32>
    %139 = vector.shape_cast %138 : vector<16x128xf32> to vector<1x16x128xf32>
    %c0_117 = arith.constant 0 : index
    %c0_118 = arith.constant 0 : index
    %c0_119 = arith.constant 0 : index
    %140 = vector.load %arg6[%c0_117, %c0_118, %c0_119] : memref<1x16x128xf32, #tpu.memory_space<vmem>>, vector<1x16x128xf32>
    tpu.vector_store %arg6[%c0_117, %c0_118, %c0_119], %139 {strides = array<i32>} : memref<1x16x128xf32, #tpu.memory_space<vmem>>, vector<1x16x128xf32>,
    return
  }
  func.func @transform_0(%arg0: i32) -> (i32, i32, i32) {
    %c0_i32 = arith.constant 0 : i32
    %c0_i32_0 = arith.constant 0 : i32
    %c0_i32_1 = arith.constant 0 : i32
    return %arg0, %c0_i32, %c0_i32_0 : i32, i32, i32
  }
  func.func @transform_1(%arg0: i32) -> (i32, i32, i32) {
    %c0_i32 = arith.constant 0 : i32
    %c0_i32_0 = arith.constant 0 : i32
    %c0_i32_1 = arith.constant 0 : i32
    %c0_i32_2 = arith.constant 0 : i32
    return %c0_i32, %c0_i32_0, %c0_i32_1 : i32, i32, i32
  }
  func.func @transform_2(%arg0: i32) -> (i32, i32) {
    %c0_i32 = arith.constant 0 : i32
    %c0_i32_0 = arith.constant 0 : i32
    %c0_i32_1 = arith.constant 0 : i32
    return %c0_i32, %c0_i32_0 : i32, i32
  }
  func.func @transform_3(%arg0: i32) -> (i32, i32, i32) {
    %c0_i32 = arith.constant 0 : i32
    %c0_i32_0 = arith.constant 0 : i32
    %c0_i32_1 = arith.constant 0 : i32
    %c0_i32_2 = arith.constant 0 : i32
    return %c0_i32, %c0_i32_0, %c0_i32_1 : i32, i32, i32
  }
  func.func @transform_4(%arg0: i32) -> (i32, i32) {
    %c0_i32 = arith.constant 0 : i32
    %c0_i32_0 = arith.constant 0 : i32
    %c0_i32_1 = arith.constant 0 : i32
    return %c0_i32, %c0_i32_0 : i32, i32
  }
  func.func @transform_5(%arg0: i32) -> (i32, i32, i32) {
    %c0_i32 = arith.constant 0 : i32
    %c0_i32_0 = arith.constant 0 : i32
    %c0_i32_1 = arith.constant 0 : i32
    return %arg0, %c0_i32, %c0_i32_0 : i32, i32, i32
  }
}

</mosaic_0001>

<bundles_post_ra>
// kernel: tpu_custom_call.1
= control target key start
LH: loop header
LB: loop body
LE: loop exit
PB: predicated region body
PF: predicated region fallthrough
CT: control target
= control target key end

     0   :  { %10 = vsyncpa [#allocation4], 0  ;;  %s17554_s0 = inlined_call_operand.vmem [shape: f32[2,326,4], index: 0, kind: input, shape index: {}]   ;;  %s17555_s1 = inlined_call_operand.vmem [shape: f32[9,4,8], index: 1, kind: input, shape index: {}]   ;;  %s17556_s2 = inlined_call_operand.vmem [shape: f32[1,8], index: 2, kind: input, shape index: {}]   ;;  %s17557_s3 = inlined_call_operand.vmem [shape: f32[9,8,8], index: 3, kind: input, shape index: {}]   ;;  %s17558_s4 = inlined_call_operand.vmem [shape: f32[1,8], index: 4, kind: input, shape index: {}]   ;;  %s17559_s5 = inlined_call_operand.hbm [shape: f32[2,16,128], index: 5, kind: output, shape index: {}]  }
   0x1   :  { %12 = vsyncpa [#allocation4 + $0x1], 0  ;;  %s14340_s18 = smov 0   ;;  %s14342_s19 = smov 0  }
   0x2   :  { %s14344_s20 = smov 0   ;;  %s14346_s21 = smov 0  }
   0x3 LB: > { %s14361_s22 = sadd.s32 4294967295, %s14288_s21   ;;  %s11053_s23 = sadd.s32 4294967294, %s14288_s21   ;;  %s14288_s21 = sphi %s14346_s21, %s18152_s21   ;;  %s14284_s20 = sphi %s14344_s20, %s18151_s20   ;;  %s14280_s19 = sphi %s14342_s19, %s18150_s19   ;;  %s14276_s18 = sphi %s14340_s18, %s18149_s18  }
   0x4   : > { %s14365_s24 = sadd.s32 1, %s14288_s21   ;;  %s135_s25 = sadd.s32 1, %s14284_s20 }
   0x5   : > { %s132_s26 = ssub.s32 %s14288_s21, %s14365_s24  ;;  %p145_p0 = scmp.ne.s32.totalorder %s14284_s20, %s14280_s19 }
   0x6   : > { %p133_p1 = scmp.eq.s32.totalorder %s132_s26, 0  ;;  %p146_p2 = scmp.eq.s32.totalorder %s14361_s22, 1 }
   0x7   : > { %p151_p3 = scmp.ne.s32.totalorder %s14280_s19, %s14276_s18  ;;  %p152_p4 = scmp.eq.s32.totalorder %s11053_s23, 1 }
   0x8   : > { %s14376_s27 = scalar_select %p133_p1, %s14284_s20, %s135_s25  }
   0x9   : > { %p14378_p5 = por %p146_p2, %p145_p0  ;;  %p14382_p6 = por %p152_p4, %p151_p3 }
   0xa   : > { %p11056_p7 = scmp.ge.s32.totalorder %s14288_s21, 1  ;;  %p190_p8 = scmp.lt.s32.totalorder %s14288_s21, 3 }
   0xc   : > { %p191_p9 = pnand %p11056_p7, %p190_p8 }
   0xe   : > { %194 = sbr.rel (%p191_p9) target bundleno = 1932 (0x78c), region = 40 }
  0x15   : > { %v266_v0 = vld [vmem:[%s17555_s1] sm:$0xf]  ;;  %vm376_vm0 = vcmask 1043456   ;;  %p218_p10 = scmp.lt.s32.totalorder %s14361_s22, 1  ;;  %v11097_v1 = vld [vmem:[%s17555_s1 + $0x4] sm:$0xf] }
  0x16   : > { %12438 = vmatprep.subr.msk.mxu0 %vm376_vm0, %v266_v0  ;;  %vm267_vm1 = vcmask 31744   ;;  %v14411_v5 = vld [vmem:[%s17555_s1 + $0x8] sm:$0xf]  ;;  %v14491_v42 = vld [vmem:[%s17555_s1 + $0xc] sm:$0xf]  ;;  %vm17560_vm2 = vcmask 64512  }
  0x17   : > { %12439 = vmatpush3.msk.msra.mxu0 %vm376_vm0, %v266_v0  ;;  %s219_s9 = scalar_select %p218_p10, %s14361_s22, 1  ;;  %vm4897_vm3 = vcmask 59392  }
  0x18   : > { %12494 = vmatprep.subr.msk.mxu0 %vm376_vm0, %v11097_v1  ;;  %s14293_s26 = smov 8   ;;  %s14294_s30 = smov 16  }
  0x19   : > { %s14094_s10 = smul.u32 328, %s219_s9  ;;  %s14295_s6 = smov 24  }
  0x1a   : > { %s14296_s7 = smov 80   ;;  %s14297_s8 = smov 88  }
  0x1b   : > { %s14402_s13 = scalar_lea.vmem %s17554_s0, %s14094_s10  ;;  %s14298_s9 = smov 32  }
  0x1c   : > { %v230_v2 = vld [vmem:[%s14402_s13] sm:$0xff]  ;;  %v231_v3 = vld [vmem:[%s14402_s13 + $0x8] sm:$0xff]  ;;  %v232_v4 = vld [vmem:[%s14402_s13 + $0x10] sm:$0xff]  ;;  %s14299_s10 = smov 40   ;;  %s14300_s11 = smov 48  }
  0x1d   : > { %12440 = vmatprep.mubr.msk.f32.mxu0 %vm267_vm1, %v230_v2  ;;  %v233_v6 = vld [vmem:[%s14402_s13 + $0x18] sm:$0xff]  ;;  %v234_v7 = vld [vmem:[%s14402_s13 + $0x20] sm:$0xff]  ;;  %v235_v8 = vld [vmem:[%s14402_s13 + $0x28] sm:$0xff]  ;;  %s14301_s12 = smov 56   ;;  %s14302_s14 = smov 64  }
  0x1e   : > { %12441 = vmatmul.mubr.msk.f32.vlgmr.msra.gmra.mrb[0].mxu0 %vm267_vm1, %v231_v3  ;;  %v236_v9 = vld [vmem:[%s14402_s13 + $0x30] sm:$0xff]  ;;  %v237_v10 = vld [vmem:[%s14402_s13 + $0x38] sm:$0xff]  ;;  %v238_v11 = vld [vmem:[%s14402_s13 + $0x40] sm:$0xff]  ;;  %s14304_s15 = smov 96   ;;  %s14305_s16 = smov 104  }
  0x1f   : > { %12495 = vmatpush3.msk.msra.mxu0 %vm376_vm0, %v11097_v1  ;;  %12443 = vmatprep.mubr.msk.f32.mxu0 %vm267_vm1, %v232_v4  ;;  %v239_v12 = vld [vmem:[%s14402_s13 + $0x48] sm:$0xff]  ;;  %v240_v13 = vld [vmem:[%s14402_s13 + $0x50] sm:$0xff]  ;;  %v241_v14 = vld [vmem:[%s14402_s13 + $0x58] sm:$0xff]  ;;  %s14306_s17 = smov 112   ;;  %s14307_s23 = smov 120  }
  0x20   : > { %12550 = vmatprep.subr.msk.mxu0 %vm376_vm0, %v14411_v5  ;;  %v242_v15 = vld [vmem:[%s14402_s13 + $0x60] sm:$0xff]  ;;  %v243_v16 = vld [vmem:[%s14402_s13 + $0x68] sm:$0xff]  ;;  %v244_v17 = vld [vmem:[%s14402_s13 + $0x70] sm:$0xff]  ;;  %s215_s25 = sand.u32 1, %s14280_s19  }
  0x21   : > { %v245_v18 = vld [vmem:[%s14402_s13 + $0x78] sm:$0xff]  ;;  %v246_v19 = vld [vmem:[%s14402_s13 + $0x80] sm:$0xff]  ;;  %v247_v20 = vld [vmem:[%s14402_s13 + $0x88] sm:$0xff] }
  0x22   : > { %12444 = vmatmul.mubr.msk.f32.gmra.mrb[2].mxu0 %vm267_vm1, %v233_v6  ;;  %v248_v21 = vld [vmem:[%s14402_s13 + $0x90] sm:$0xff]  ;;  %v249_v22 = vld [vmem:[%s14402_s13 + $0x98] sm:$0xff]  ;;  %v250_v23 = vld [vmem:[%s14402_s13 + $0xa0] sm:$0xff] }
  0x23   : > { %12446 = vmatprep.mubr.msk.f32.mxu0 %vm267_vm1, %v234_v7  ;;  %v251_v24 = vld [vmem:[%s14402_s13 + $0xa8] sm:$0xff]  ;;  %v252_v25 = vld [vmem:[%s14402_s13 + $0xb0] sm:$0xff]  ;;  %v253_v26 = vld [vmem:[%s14402_s13 + $0xb8] sm:$0xff] }
  0x24   : > { %v254_v27 = vld [vmem:[%s14402_s13 + $0xc0] sm:$0xff]  ;;  %v255_v28 = vld [vmem:[%s14402_s13 + $0xc8] sm:$0xff]  ;;  %v256_v29 = vld [vmem:[%s14402_s13 + $0xd0] sm:$0xff] }
  0x25   : > { %v257_v30 = vld [vmem:[%s14402_s13 + $0xd8] sm:$0xff]  ;;  %v258_v31 = vld [vmem:[%s14402_s13 + $0xe0] sm:$0xff]  ;;  %v259_v32 = vld [vmem:[%s14402_s13 + $0xe8] sm:$0xff] }
  0x26   : > { %12447 = vmatmul.mubr.msk.f32.gmra.mrb[4].mxu0 %vm267_vm1, %v235_v8  ;;  %v260_v33 = vld [vmem:[%s14402_s13 + $0xf0] sm:$0xff]  ;;  %v261_v34 = vld [vmem:[%s14402_s13 + $0xf8] sm:$0xff]  ;;  %v262_v35 = vld [vmem:[%s14402_s13 + $0x100] sm:$0xff] }
  0x27   : > { %12449 = vmatprep.mubr.msk.f32.mxu0 %vm267_vm1, %v236_v9  ;;  %v263_v36 = vld [vmem:[%s14402_s13 + $0x108] sm:$0xff]  ;;  %v264_v37 = vld [vmem:[%s14402_s13 + $0x110] sm:$0xff]  ;;  %v265_v38 = vld [vmem:[%s14402_s13 + $0x118] sm:$0xff] }
  0x28   : > { %v661_v39 = vld [vmem:[%s14402_s13 + $0x1] sm:$0xff]  ;;  %v662_v40 = vld [vmem:[%s14402_s13 + $0x9] sm:$0xff]  ;;  %v663_v41 = vld [vmem:[%s14402_s13 + $0x11] sm:$0xff] }
  0x29   : > { %v664_v43 = vld [vmem:[%s14402_s13 + $0x19] sm:$0xff]  ;;  %v665_v44 = vld [vmem:[%s14402_s13 + $0x21] sm:$0xff]  ;;  %v666_v45 = vld [vmem:[%s14402_s13 + $0x29] sm:$0xff] }
  0x2a   : > { %12450 = vmatmul.mubr.msk.f32.gmra.mrb[6].mxu0 %vm267_vm1, %v237_v10  ;;  %v667_v46 = vld [vmem:[%s14402_s13 + $0x31] sm:$0xff]  ;;  %v668_v47 = vld [vmem:[%s14402_s13 + $0x39] sm:$0xff]  ;;  %v669_v48 = vld [vmem:[%s14402_s13 + $0x41] sm:$0xff] }
  0x2b   : > { %12452 = vmatprep.mubr.msk.f32.mxu0 %vm267_vm1, %v238_v11  ;;  %v670_v49 = vld [vmem:[%s14402_s13 + $0x49] sm:$0xff]  ;;  %v671_v50 = vld [vmem:[%s14402_s13 + $0x51] sm:$0xff]  ;;  %v672_v51 = vld [vmem:[%s14402_s13 + $0x59] sm:$0xff] }
  0x2c   : > { %v673_v52 = vld [vmem:[%s14402_s13 + $0x61] sm:$0xff]  ;;  %v674_v53 = vld [vmem:[%s14402_s13 + $0x69] sm:$0xff]  ;;  %v675_v54 = vld [vmem:[%s14402_s13 + $0x71] sm:$0xff] }
  0x2d   : > { %v676_v55 = vld [vmem:[%s14402_s13 + $0x79] sm:$0xff]  ;;  %v677_v56 = vld [vmem:[%s14402_s13 + $0x81] sm:$0xff]  ;;  %v678_v57 = vld [vmem:[%s14402_s13 + $0x89] sm:$0xff] }
  0x2e   : > { %12453 = vmatmul.mubr.msk.f32.gmra.mrb[8].mxu0 %vm267_vm1, %v239_v12  ;;  %v679_v58 = vld [vmem:[%s14402_s13 + $0x91] sm:$0xff]  ;;  %v680_v59 = vld [vmem:[%s14402_s13 + $0x99] sm:$0xff]  ;;  %v681_v60 = vld [vmem:[%s14402_s13 + $0xa1] sm:$0xff] }
  0x2f   : > { %12455 = vmatprep.mubr.msk.f32.mxu0 %vm267_vm1, %v240_v13  ;;  %v682_v61 = vld [vmem:[%s14402_s13 + $0xa9] sm:$0xff]  ;;  %v683_v62 = vld [vmem:[%s14402_s13 + $0xb1] sm:$0xff]  ;;  %v684_v63 = vld [vmem:[%s14402_s13 + $0xb9] sm:$0xff] }
  0x30   : > { %v685_v0 = vld [vmem:[%s14402_s13 + $0xc1] sm:$0xff]  ;;  %v686_v1 = vld [vmem:[%s14402_s13 + $0xc9] sm:$0xff]  ;;  %v687_v2 = vld [vmem:[%s14402_s13 + $0xd1] sm:$0xff] }
  0x31   : > { %v688_v3 = vld [vmem:[%s14402_s13 + $0xd9] sm:$0xff]  ;;  %v689_v4 = vld [vmem:[%s14402_s13 + $0xe1] sm:$0xff]  ;;  %v691_v6 = vld [vmem:[%s14402_s13 + $0xf1] sm:$0xff] }
  0x32   : > { %12456 = vmatmul.mubr.msk.f32.gmra.mrb[10].mxu0 %vm267_vm1, %v241_v14  ;;  %v692_v7 = vld [vmem:[%s14402_s13 + $0xf9] sm:$0xff]  ;;  %v693_v8 = vld [vmem:[%s14402_s13 + $0x101] sm:$0xff]  ;;  %v694_v9 = vld [vmem:[%s14402_s13 + $0x109] sm:$0xff] }
  0x33   : > { %12458 = vmatprep.mubr.msk.f32.mxu0 %vm267_vm1, %v242_v15  ;;  %v695_v10 = vld [vmem:[%s14402_s13 + $0x111] sm:$0xff]  ;;  %v696_v11 = vld [vmem:[%s14402_s13 + $0x119] sm:$0xff]  ;;  %v1091_v12 = vld [vmem:[%s14402_s13 + $0x2] sm:$0xff] }
  0x34   : > { %v1092_v13 = vld [vmem:[%s14402_s13 + $0xa] sm:$0xff]  ;;  %v14569_v14 = vld [vmem:[%s14402_s13 + $0x12] sm:$0xff] }
  0x35   : > { %v14574_v15 = vld [vmem:[%s17555_s1 + $0x10] sm:$0xf] }
  0x36   : > { %12459 = vmatmul.mubr.msk.f32.gmra.mrb[12].mxu0 %vm267_vm1, %v243_v16  ;;  %v14582_v16 = vld [vmem:[%s14402_s13 + $0x1a] sm:$0xff] }
  0x37   : > { %12461 = vmatprep.mubr.msk.f32.mxu0 %vm267_vm1, %v244_v17  ;;  %v14585_v17 = vld [vmem:[%s14402_s13 + $0x22] sm:$0xff] }
  0x3a   : > { %12462 = vmatmul.mubr.msk.f32.gmra.mrb[14].mxu0 %vm267_vm1, %v245_v18  ;;  %v14594_v18 = vld [vmem:[%s14402_s13 + $0x2a] sm:$0xff] }
  0x3b   : > { %12464 = vmatprep.mubr.msk.f32.mxu0 %vm267_vm1, %v246_v19  ;;  %v14597_v19 = vld [vmem:[%s14402_s13 + $0x32] sm:$0xff] }
  0x3e   : > { %12465 = vmatmul.mubr.msk.f32.gmra.mrb[16].mxu0 %vm267_vm1, %v247_v20  ;;  %v14604_v20 = vld [vmem:[%s14402_s13 + $0x3a] sm:$0xff] }
  0x3f   : > { %12467 = vmatprep.mubr.msk.f32.mxu0 %vm267_vm1, %v248_v21  ;;  %v14607_v21 = vld [vmem:[%s14402_s13 + $0x42] sm:$0xff] }
  0x42   : > { %12468 = vmatmul.mubr.msk.f32.gmra.mrb[18].mxu0 %vm267_vm1, %v249_v22  ;;  %v14614_v22 = vld [vmem:[%s14402_s13 + $0x4a] sm:$0xff] }
  0x43   : > { %12470 = vmatprep.mubr.msk.f32.mxu0 %vm267_vm1, %v250_v23  ;;  %v14617_v23 = vld [vmem:[%s14402_s13 + $0x52] sm:$0xff] }
  0x46   : > { %12471 = vmatmul.mubr.msk.f32.gmra.mrb[20].mxu0 %vm267_vm1, %v251_v24  ;;  %v1102_v24 = vld [vmem:[%s14402_s13 + $0x5a] sm:$0xff] }
  0x47   : > { %12473 = vmatprep.mubr.msk.f32.mxu0 %vm267_vm1, %v252_v25  ;;  %v1103_v25 = vld [vmem:[%s14402_s13 + $0x62] sm:$0xff] }
  0x4a   : > { %12474 = vmatmul.mubr.msk.f32.gmra.mrb[22].mxu0 %vm267_vm1, %v253_v26  ;;  %v1104_v26 = vld [vmem:[%s14402_s13 + $0x6a] sm:$0xff] }
  0x4b   : > { %12476 = vmatprep.mubr.msk.f32.mxu0 %vm267_vm1, %v254_v27  ;;  %v1105_v27 = vld [vmem:[%s14402_s13 + $0x72] sm:$0xff] }
  0x4e   : > { %12477 = vmatmul.mubr.msk.f32.gmra.mrb[24].mxu0 %vm267_vm1, %v255_v28  ;;  %v1106_v28 = vld [vmem:[%s14402_s13 + $0x7a] sm:$0xff] }
  0x4f   : > { %12479 = vmatprep.mubr.msk.f32.mxu0 %vm267_vm1, %v256_v29  ;;  %v1107_v29 = vld [vmem:[%s14402_s13 + $0x82] sm:$0xff] }
  0x52   : > { %12480 = vmatmul.mubr.msk.f32.gmra.mrb[26].mxu0 %vm267_vm1, %v257_v30  ;;  %v1108_v30 = vld [vmem:[%s14402_s13 + $0x8a] sm:$0xff] }
  0x53   : > { %12482 = vmatprep.mubr.msk.f32.mxu0 %vm267_vm1, %v258_v31  ;;  %v1109_v31 = vld [vmem:[%s14402_s13 + $0x92] sm:$0xff] }
  0x56   : > { %12483 = vmatmul.mubr.msk.f32.gmra.mrb[28].mxu0 %vm267_vm1, %v259_v32  ;;  %v1110_v32 = vld [vmem:[%s14402_s13 + $0x9a] sm:$0xff] }
  0x57   : > { %12485 = vmatprep.mubr.msk.f32.mxu0 %vm267_vm1, %v260_v33  ;;  %v1111_v33 = vld [vmem:[%s14402_s13 + $0xa2] sm:$0xff] }
  0x5a   : > { %12486 = vmatmul.mubr.msk.f32.gmra.mrb[30].mxu0 %vm267_vm1, %v261_v34  ;;  %v1112_v34 = vld [vmem:[%s14402_s13 + $0xaa] sm:$0xff] }
  0x5b   : > { %12488 = vmatprep.mubr.msk.f32.mxu0 %vm267_vm1, %v262_v35  ;;  %v1113_v35 = vld [vmem:[%s14402_s13 + $0xb2] sm:$0xff] }
  0x5e   : > { %12489 = vmatmul.mubr.msk.f32.gmra.mrb[32].mxu0 %vm267_vm1, %v263_v36  ;;  %v1114_v36 = vld [vmem:[%s14402_s13 + $0xba] sm:$0xff] }
  0x5f   : > { %12491 = vmatprep.mubr.msk.f32.mxu0 %vm267_vm1, %v264_v37  ;;  %v1115_v37 = vld [vmem:[%s14402_s13 + $0xc2] sm:$0xff] }
  0x62   : > { %12492 = vmatmul.mubr.msk.f32.gmra.mrb[34].mxu0 %vm267_vm1, %v265_v38  ;;  %v1116_v38 = vld [vmem:[%s14402_s13 + $0xca] sm:$0xff] }
  0x63   : > { %12496 = vmatprep.mubr.msk.f32.mxu0 %vm267_vm1, %v661_v39  ;;  %v1117_v39 = vld [vmem:[%s14402_s13 + $0xd2] sm:$0xff] }
  0x66   : > { %12497 = vmatmul.mubr.msk.f32.vlgmr.msra.gmra.mrb[0].mxu0 %vm267_vm1, %v662_v40  ;;  %v1118_v40 = vld [vmem:[%s14402_s13 + $0xda] sm:$0xff] }
  0x67   : > { %12551 = vmatpush3.msk.msra.mxu0 %vm376_vm0, %v14411_v5  ;;  %12499 = vmatprep.mubr.msk.f32.mxu0 %vm267_vm1, %v663_v41  ;;  %v690_v5 = vld [vmem:[%s14402_s13 + $0xe9] sm:$0xff] }
  0x68   : > { %12606 = vmatprep.subr.msk.mxu0 %vm376_vm0, %v14491_v42  ;;  %v1119_v41 = vld [vmem:[%s14402_s13 + $0xe2] sm:$0xff] }
  0x6a   : > { %12500 = vmatmul.mubr.msk.f32.gmra.mrb[2].mxu0 %vm267_vm1, %v664_v43  ;;  %v1121_v43 = vld [vmem:[%s14402_s13 + $0xf2] sm:$0xff] }
  0x6b   : > { %12502 = vmatprep.mubr.msk.f32.mxu0 %vm267_vm1, %v665_v44  ;;  %v1122_v44 = vld [vmem:[%s14402_s13 + $0xfa] sm:$0xff] }
  0x6e   : > { %12503 = vmatmul.mubr.msk.f32.gmra.mrb[4].mxu0 %vm267_vm1, %v666_v45  ;;  %v1123_v45 = vld [vmem:[%s14402_s13 + $0x102] sm:$0xff] }
  0x6f   : > { %12505 = vmatprep.mubr.msk.f32.mxu0 %vm267_vm1, %v667_v46  ;;  %v1124_v46 = vld [vmem:[%s14402_s13 + $0x10a] sm:$0xff] }
  0x72   : > { %12506 = vmatmul.mubr.msk.f32.gmra.mrb[6].mxu0 %vm267_vm1, %v668_v47  ;;  %v1125_v47 = vld [vmem:[%s14402_s13 + $0x112] sm:$0xff] }
  0x73   : > { %12508 = vmatprep.mubr.msk.f32.mxu0 %vm267_vm1, %v669_v48  ;;  %v1126_v48 = vld [vmem:[%s14402_s13 + $0x11a] sm:$0xff] }
  0x76   : > { %12509 = vmatmul.mubr.msk.f32.gmra.mrb[8].mxu0 %vm267_vm1, %v670_v49  ;;  %v11249_v49 = vld [vmem:[%s17555_s1 + $0x14] sm:$0xf] }
  0x77   : > { %12511 = vmatprep.mubr.msk.f32.mxu0 %vm267_vm1, %v671_v50  ;;  %v1555_v50 = vld [vmem:[%s14402_s13 + $0x122] sm:$0xff] }
  0x7a   : > { %12512 = vmatmul.mubr.msk.f32.gmra.mrb[10].mxu0 %vm267_vm1, %v672_v51  ;;  %v1556_v51 = vld [vmem:[%s14402_s13 + $0x12a] sm:$0xff] }
  0x7b   : > { %12514 = vmatprep.mubr.msk.f32.mxu0 %vm267_vm1, %v673_v52  ;;  %v1951_v52 = vld [vmem:[%s14402_s13 + $0x13] sm:$0xff] }
  0x7e   : > { %12515 = vmatmul.mubr.msk.f32.gmra.mrb[12].mxu0 %vm267_vm1, %v674_v53  ;;  %v1952_v53 = vld [vmem:[%s14402_s13 + $0x1b] sm:$0xff] }
  0x7f   : > { %12517 = vmatprep.mubr.msk.f32.mxu0 %vm267_vm1, %v675_v54  ;;  %v1953_v54 = vld [vmem:[%s14402_s13 + $0x23] sm:$0xff] }
  0x82   : > { %12518 = vmatmul.mubr.msk.f32.gmra.mrb[14].mxu0 %vm267_vm1, %v676_v55  ;;  %v14733_v55 = vld [vmem:[%s17555_s1 + $0x18] sm:$0xf] }
  0x83   : > { %12520 = vmatprep.mubr.msk.f32.mxu0 %vm267_vm1, %v677_v56  ;;  %v1954_v56 = vld [vmem:[%s14402_s13 + $0x2b] sm:$0xff] }
  0x86   : > { %12521 = vmatmul.mubr.msk.f32.gmra.mrb[16].mxu0 %vm267_vm1, %v678_v57  ;;  %v1955_v57 = vld [vmem:[%s14402_s13 + $0x33] sm:$0xff] }
  0x87   : > { %12523 = vmatprep.mubr.msk.f32.mxu0 %vm267_vm1, %v679_v58  ;;  %v1956_v58 = vld [vmem:[%s14402_s13 + $0x3b] sm:$0xff] }
  0x8a   : > { %12524 = vmatmul.mubr.msk.f32.gmra.mrb[18].mxu0 %vm267_vm1, %v680_v59  ;;  %v1957_v59 = vld [vmem:[%s14402_s13 + $0x43] sm:$0xff] }
  0x8b   : > { %12526 = vmatprep.mubr.msk.f32.mxu0 %vm267_vm1, %v681_v60  ;;  %v1958_v60 = vld [vmem:[%s14402_s13 + $0x4b] sm:$0xff] }
  0x8e   : > { %12527 = vmatmul.mubr.msk.f32.gmra.mrb[20].mxu0 %vm267_vm1, %v682_v61  ;;  %v1959_v61 = vld [vmem:[%s14402_s13 + $0x53] sm:$0xff] }
  0x8f   : > { %12529 = vmatprep.mubr.msk.f32.mxu0 %vm267_vm1, %v683_v62  ;;  %v1960_v62 = vld [vmem:[%s14402_s13 + $0x5b] sm:$0xff] }
  0x92   : > { %12530 = vmatmul.mubr.msk.f32.gmra.mrb[22].mxu0 %vm267_vm1, %v684_v63  ;;  %v1961_v63 = vld [vmem:[%s14402_s13 + $0x63] sm:$0xff] }
  0x93   : > { %12532 = vmatprep.mubr.msk.f32.mxu0 %vm267_vm1, %v685_v0  ;;  %v1962_v0 = vld [vmem:[%s14402_s13 + $0x6b] sm:$0xff] }
  0x96   : > { %12533 = vmatmul.mubr.msk.f32.gmra.mrb[24].mxu0 %vm267_vm1, %v686_v1  ;;  %v1963_v1 = vld [vmem:[%s14402_s13 + $0x73] sm:$0xff] }
  0x97   : > { %12535 = vmatprep.mubr.msk.f32.mxu0 %vm267_vm1, %v687_v2  ;;  %v1964_v2 = vld [vmem:[%s14402_s13 + $0x7b] sm:$0xff] }
  0x9a   : > { %12536 = vmatmul.mubr.msk.f32.gmra.mrb[26].mxu0 %vm267_vm1, %v688_v3  ;;  %v1965_v3 = vld [vmem:[%s14402_s13 + $0x83] sm:$0xff] }
  0x9b   : > { %12538 = vmatprep.mubr.msk.f32.mxu0 %vm267_vm1, %v689_v4  ;;  %v1966_v4 = vld [vmem:[%s14402_s13 + $0x8b] sm:$0xff] }
  0x9e   : > { %12539 = vmatmul.mubr.msk.f32.gmra.mrb[28].mxu0 %vm267_vm1, %v690_v5  ;;  %v1967_v5 = vld [vmem:[%s14402_s13 + $0x93] sm:$0xff] }
  0x9f   : > { %12541 = vmatprep.mubr.msk.f32.mxu0 %vm267_vm1, %v691_v6  ;;  %v1968_v6 = vld [vmem:[%s14402_s13 + $0x9b] sm:$0xff] }
  0xa2   : > { %12542 = vmatmul.mubr.msk.f32.gmra.mrb[30].mxu0 %vm267_vm1, %v692_v7  ;;  %v1969_v7 = vld [vmem:[%s14402_s13 + $0xa3] sm:$0xff] }
  0xa3   : > { %12544 = vmatprep.mubr.msk.f32.mxu0 %vm267_vm1, %v693_v8  ;;  %v1970_v8 = vld [vmem:[%s14402_s13 + $0xab] sm:$0xff] }
  0xa6   : > { %12545 = vmatmul.mubr.msk.f32.gmra.mrb[32].mxu0 %vm267_vm1, %v694_v9  ;;  %v1971_v9 = vld [vmem:[%s14402_s13 + $0xb3] sm:$0xff] }
  0xa7   : > { %12547 = vmatprep.mubr.msk.f32.mxu0 %vm267_vm1, %v695_v10  ;;  %v1972_v10 = vld [vmem:[%s14402_s13 + $0xbb] sm:$0xff] }
  0xaa   : > { %12548 = vmatmul.mubr.msk.f32.gmra.mrb[34].mxu0 %vm267_vm1, %v696_v11  ;;  %v1973_v11 = vld [vmem:[%s14402_s13 + $0xc3] sm:$0xff] }
  0xab   : > { %12552 = vmatprep.mubr.msk.f32.mxu0 %vm267_vm1, %v1091_v12  ;;  %v1974_v12 = vld [vmem:[%s14402_s13 + $0xcb] sm:$0xff] }
  0xae   : > { %12553 = vmatmul.mubr.msk.f32.vlgmr.msra.gmra.mrb[0].mxu0 %vm267_vm1, %v1092_v13  ;;  %v1975_v13 = vld [vmem:[%s14402_s13 + $0xd3] sm:$0xff] }
  0xaf   : > { %12607 = vmatpush3.msk.msra.mxu0 %vm376_vm0, %v14491_v42  ;;  %12555 = vmatprep.mubr.msk.f32.mxu0 %vm267_vm1, %v14569_v14  ;;  %v1120_v42 = vld [vmem:[%s14402_s13 + $0xea] sm:$0xff] }
  0xb0   : > { %12662 = vmatprep.subr.msk.mxu0 %vm376_vm0, %v14574_v15 }
  0xb2   : > { %12556 = vmatmul.mubr.msk.f32.gmra.mrb[2].mxu0 %vm267_vm1, %v14582_v16 }
  0xb3   : > { %12558 = vmatprep.mubr.msk.f32.mxu0 %vm267_vm1, %v14585_v17 }
  0xb6   : > { %12559 = vmatmul.mubr.msk.f32.gmra.mrb[4].mxu0 %vm267_vm1, %v14594_v18 }
  0xb7   : > { %12561 = vmatprep.mubr.msk.f32.mxu0 %vm267_vm1, %v14597_v19 }
  0xba   : > { %12562 = vmatmul.mubr.msk.f32.gmra.mrb[6].mxu0 %vm267_vm1, %v14604_v20 }
  0xbb   : > { %12564 = vmatprep.mubr.msk.f32.mxu0 %vm267_vm1, %v14607_v21 }
  0xbe   : > { %12565 = vmatmul.mubr.msk.f32.gmra.mrb[8].mxu0 %vm267_vm1, %v14614_v22 }
  0xbf   : > { %12567 = vmatprep.mubr.msk.f32.mxu0 %vm267_vm1, %v14617_v23 }
  0xc2   : > { %12568 = vmatmul.mubr.msk.f32.gmra.mrb[10].mxu0 %vm267_vm1, %v1102_v24 }
  0xc3   : > { %12570 = vmatprep.mubr.msk.f32.mxu0 %vm267_vm1, %v1103_v25 }
  0xc6   : > { %12571 = vmatmul.mubr.msk.f32.gmra.mrb[12].mxu0 %vm267_vm1, %v1104_v26 }
  0xc7   : > { %12573 = vmatprep.mubr.msk.f32.mxu0 %vm267_vm1, %v1105_v27 }
  0xca   : > { %12574 = vmatmul.mubr.msk.f32.gmra.mrb[14].mxu0 %vm267_vm1, %v1106_v28 }
  0xcb   : > { %12576 = vmatprep.mubr.msk.f32.mxu0 %vm267_vm1, %v1107_v29 }
  0xce   : > { %12577 = vmatmul.mubr.msk.f32.gmra.mrb[16].mxu0 %vm267_vm1, %v1108_v30 }
  0xcf   : > { %12579 = vmatprep.mubr.msk.f32.mxu0 %vm267_vm1, %v1109_v31 }
  0xd2   : > { %12580 = vmatmul.mubr.msk.f32.gmra.mrb[18].mxu0 %vm267_vm1, %v1110_v32 }
  0xd3   : > { %12582 = vmatprep.mubr.msk.f32.mxu0 %vm267_vm1, %v1111_v33 }
  0xd6   : > { %12583 = vmatmul.mubr.msk.f32.gmra.mrb[20].mxu0 %vm267_vm1, %v1112_v34 }
  0xd7   : > { %12585 = vmatprep.mubr.msk.f32.mxu0 %vm267_vm1, %v1113_v35 }
  0xda   : > { %12586 = vmatmul.mubr.msk.f32.gmra.mrb[22].mxu0 %vm267_vm1, %v1114_v36 }
  0xdb   : > { %12588 = vmatprep.mubr.msk.f32.mxu0 %vm267_vm1, %v1115_v37 }
  0xde   : > { %12589 = vmatmul.mubr.msk.f32.gmra.mrb[24].mxu0 %vm267_vm1, %v1116_v38 }
  0xdf   : > { %12591 = vmatprep.mubr.msk.f32.mxu0 %vm267_vm1, %v1117_v39 }
  0xe2   : > { %12592 = vmatmul.mubr.msk.f32.gmra.mrb[26].mxu0 %vm267_vm1, %v1118_v40 }
  0xe3   : > { %12594 = vmatprep.mubr.msk.f32.mxu0 %vm267_vm1, %v1119_v41 }
  0xe6   : > { %12595 = vmatmul.mubr.msk.f32.gmra.mrb[28].mxu0 %vm267_vm1, %v1120_v42 }
  0xe7   : > { %12597 = vmatprep.mubr.msk.f32.mxu0 %vm267_vm1, %v1121_v43 }
  0xea   : > { %12598 = vmatmul.mubr.msk.f32.gmra.mrb[30].mxu0 %vm267_vm1, %v1122_v44 }
  0xeb   : > { %12600 = vmatprep.mubr.msk.f32.mxu0 %vm267_vm1, %v1123_v45 }
  0xee   : > { %12601 = vmatmul.mubr.msk.f32.gmra.mrb[32].mxu0 %vm267_vm1, %v1124_v46 }
  0xef   : > { %12603 = vmatprep.mubr.msk.f32.mxu0 %vm267_vm1, %v1125_v47 }
  0xf2   : > { %12604 = vmatmul.mubr.msk.f32.gmra.mrb[34].mxu0 %vm267_vm1, %v1126_v48 }
  0xf3   : > { %12608 = vmatprep.mubr.msk.f32.mxu0 %vm267_vm1, %v14569_v14  ;;  %v1976_v14 = vld [vmem:[%s14402_s13 + $0xdb] sm:$0xff] }
  0xf6   : > { %12609 = vmatmul.mubr.msk.f32.vlgmr.msra.gmra.mrb[0].mxu0 %vm267_vm1, %v14582_v16  ;;  %v1978_v16 = vld [vmem:[%s14402_s13 + $0xeb] sm:$0xff] }
  0xf7   : > { %12663 = vmatpush3.msk.msra.mxu0 %vm376_vm0, %v14574_v15  ;;  %12611 = vmatprep.mubr.msk.f32.mxu0 %vm267_vm1, %v14585_v17  ;;  %v1977_v15 = vld [vmem:[%s14402_s13 + $0xe3] sm:$0xff]  ;;  %v1979_v17 = vld [vmem:[%s14402_s13 + $0xf3] sm:$0xff] }
  0xf8   : > { %12718 = vmatprep.subr.msk.mxu0 %vm376_vm0, %v11249_v49 }
  0xfa   : > { %12612 = vmatmul.mubr.msk.f32.gmra.mrb[2].mxu0 %vm267_vm1, %v14594_v18  ;;  %v1980_v18 = vld [vmem:[%s14402_s13 + $0xfb] sm:$0xff] }
  0xfb   : > { %12614 = vmatprep.mubr.msk.f32.mxu0 %vm267_vm1, %v14597_v19  ;;  %v1981_v19 = vld [vmem:[%s14402_s13 + $0x103] sm:$0xff] }
  0xfe   : > { %12615 = vmatmul.mubr.msk.f32.gmra.mrb[4].mxu0 %vm267_vm1, %v14604_v20  ;;  %v1982_v20 = vld [vmem:[%s14402_s13 + $0x10b] sm:$0xff] }
  0xff   : > { %12617 = vmatprep.mubr.msk.f32.mxu0 %vm267_vm1, %v14607_v21  ;;  %v1983_v21 = vld [vmem:[%s14402_s13 + $0x113] sm:$0xff] }
 0x102   : > { %12618 = vmatmul.mubr.msk.f32.gmra.mrb[6].mxu0 %vm267_vm1, %v14614_v22  ;;  %v1984_v22 = vld [vmem:[%s14402_s13 + $0x11b] sm:$0xff] }
 0x103   : > { %12620 = vmatprep.mubr.msk.f32.mxu0 %vm267_vm1, %v14617_v23  ;;  %v1985_v23 = vld [vmem:[%s14402_s13 + $0x123] sm:$0xff] }
 0x106   : > { %12621 = vmatmul.mubr.msk.f32.gmra.mrb[8].mxu0 %vm267_vm1, %v1102_v24  ;;  %v1986_v24 = vld [vmem:[%s14402_s13 + $0x12b] sm:$0xff] }
 0x107   : > { %12623 = vmatprep.mubr.msk.f32.mxu0 %vm267_vm1, %v1103_v25  ;;  %v2381_v25 = vld [vmem:[%s14402_s13 + $0x14] sm:$0xff] }
 0x10a   : > { %12624 = vmatmul.mubr.msk.f32.gmra.mrb[10].mxu0 %vm267_vm1, %v1104_v26  ;;  %v2382_v26 = vld [vmem:[%s14402_s13 + $0x1c] sm:$0xff] }
 0x10b   : > { %12626 = vmatprep.mubr.msk.f32.mxu0 %vm267_vm1, %v1105_v27  ;;  %v14810_v27 = vld [vmem:[%s14402_s13 + $0x24] sm:$0xff] }
 0x10e   : > { %12627 = vmatmul.mubr.msk.f32.gmra.mrb[12].mxu0 %vm267_vm1, %v1106_v28  ;;  %v14815_v28 = vld [vmem:[%s17555_s1 + $0x1c] sm:$0xf] }
 0x10f   : > { %12629 = vmatprep.mubr.msk.f32.mxu0 %vm267_vm1, %v1107_v29  ;;  %v14823_v29 = vld [vmem:[%s14402_s13 + $0x2c] sm:$0xff] }
 0x112   : > { %12630 = vmatmul.mubr.msk.f32.gmra.mrb[14].mxu0 %vm267_vm1, %v1108_v30  ;;  %v14826_v30 = vld [vmem:[%s14402_s13 + $0x34] sm:$0xff] }
 0x113   : > { %12632 = vmatprep.mubr.msk.f32.mxu0 %vm267_vm1, %v1109_v31  ;;  %v14835_v31 = vld [vmem:[%s14402_s13 + $0x3c] sm:$0xff] }
 0x116   : > { %12633 = vmatmul.mubr.msk.f32.gmra.mrb[16].mxu0 %vm267_vm1, %v1110_v32  ;;  %v14838_v32 = vld [vmem:[%s14402_s13 + $0x44] sm:$0xff] }
 0x117   : > { %12635 = vmatprep.mubr.msk.f32.mxu0 %vm267_vm1, %v1111_v33  ;;  %v14845_v33 = vld [vmem:[%s14402_s13 + $0x4c] sm:$0xff] }
 0x11a   : > { %12636 = vmatmul.mubr.msk.f32.gmra.mrb[18].mxu0 %vm267_vm1, %v1112_v34  ;;  %v14848_v34 = vld [vmem:[%s14402_s13 + $0x54] sm:$0xff] }
 0x11b   : > { %12638 = vmatprep.mubr.msk.f32.mxu0 %vm267_vm1, %v1113_v35  ;;  %v14855_v35 = vld [vmem:[%s14402_s13 + $0x5c] sm:$0xff] }
 0x11e   : > { %12639 = vmatmul.mubr.msk.f32.gmra.mrb[20].mxu0 %vm267_vm1, %v1114_v36  ;;  %v14858_v36 = vld [vmem:[%s14402_s13 + $0x64] sm:$0xff] }
 0x11f   : > { %12641 = vmatprep.mubr.msk.f32.mxu0 %vm267_vm1, %v1115_v37  ;;  %v2392_v37 = vld [vmem:[%s14402_s13 + $0x6c] sm:$0xff] }
 0x122   : > { %12642 = vmatmul.mubr.msk.f32.gmra.mrb[22].mxu0 %vm267_vm1, %v1116_v38  ;;  %v2393_v38 = vld [vmem:[%s14402_s13 + $0x74] sm:$0xff] }
 0x123   : > { %12644 = vmatprep.mubr.msk.f32.mxu0 %vm267_vm1, %v1117_v39  ;;  %v2394_v39 = vld [vmem:[%s14402_s13 + $0x7c] sm:$0xff] }
 0x126   : > { %12645 = vmatmul.mubr.msk.f32.gmra.mrb[24].mxu0 %vm267_vm1, %v1118_v40  ;;  %v2395_v40 = vld [vmem:[%s14402_s13 + $0x84] sm:$0xff] }
 0x127   : > { %12647 = vmatprep.mubr.msk.f32.mxu0 %vm267_vm1, %v1119_v41  ;;  %v2396_v41 = vld [vmem:[%s14402_s13 + $0x8c] sm:$0xff] }
 0x12a   : > { %12648 = vmatmul.mubr.msk.f32.gmra.mrb[26].mxu0 %vm267_vm1, %v1120_v42  ;;  %v2397_v42 = vld [vmem:[%s14402_s13 + $0x94] sm:$0xff] }
 0x12b   : > { %12650 = vmatprep.mubr.msk.f32.mxu0 %vm267_vm1, %v1121_v43  ;;  %v2398_v43 = vld [vmem:[%s14402_s13 + $0x9c] sm:$0xff] }
 0x12e   : > { %12651 = vmatmul.mubr.msk.f32.gmra.mrb[28].mxu0 %vm267_vm1, %v1122_v44  ;;  %v2399_v44 = vld [vmem:[%s14402_s13 + $0xa4] sm:$0xff] }
 0x12f   : > { %12653 = vmatprep.mubr.msk.f32.mxu0 %vm267_vm1, %v1123_v45  ;;  %v2400_v45 = vld [vmem:[%s14402_s13 + $0xac] sm:$0xff] }
 0x132   : > { %12654 = vmatmul.mubr.msk.f32.gmra.mrb[30].mxu0 %vm267_vm1, %v1124_v46  ;;  %v2401_v46 = vld [vmem:[%s14402_s13 + $0xb4] sm:$0xff] }
 0x133   : > { %12656 = vmatprep.mubr.msk.f32.mxu0 %vm267_vm1, %v1125_v47  ;;  %v2402_v47 = vld [vmem:[%s14402_s13 + $0xbc] sm:$0xff] }
 0x136   : > { %12657 = vmatmul.mubr.msk.f32.gmra.mrb[32].mxu0 %vm267_vm1, %v1126_v48  ;;  %v2403_v48 = vld [vmem:[%s14402_s13 + $0xc4] sm:$0xff] }
 0x137   : > { %12659 = vmatprep.mubr.msk.f32.mxu0 %vm267_vm1, %v1555_v50  ;;  %v2405_v50 = vld [vmem:[%s14402_s13 + $0xd4] sm:$0xff] }
 0x13a   : > { %12660 = vmatmul.mubr.msk.f32.gmra.mrb[34].mxu0 %vm267_vm1, %v1556_v51  ;;  %v2406_v51 = vld [vmem:[%s14402_s13 + $0xdc] sm:$0xff] }
 0x13b   : > { %12664 = vmatprep.mubr.msk.f32.mxu0 %vm267_vm1, %v1951_v52  ;;  %v2407_v52 = vld [vmem:[%s14402_s13 + $0xe4] sm:$0xff] }
 0x13e   : > { %12665 = vmatmul.mubr.msk.f32.vlgmr.msra.gmra.mrb[0].mxu0 %vm267_vm1, %v1952_v53  ;;  %v2408_v53 = vld [vmem:[%s14402_s13 + $0xec] sm:$0xff] }
 0x13f   : > { %12719 = vmatpush3.msk.msra.mxu0 %vm376_vm0, %v11249_v49  ;;  %12667 = vmatprep.mubr.msk.f32.mxu0 %vm267_vm1, %v1953_v54  ;;  %v2404_v49 = vld [vmem:[%s14402_s13 + $0xcc] sm:$0xff]  ;;  %v2409_v54 = vld [vmem:[%s14402_s13 + $0xf4] sm:$0xff] }
 0x140   : > { %12774 = vmatprep.subr.msk.mxu0 %vm376_vm0, %v14733_v55 }
 0x142   : > { %12668 = vmatmul.mubr.msk.f32.gmra.mrb[2].mxu0 %vm267_vm1, %v1954_v56  ;;  %v2411_v56 = vld [vmem:[%s14402_s13 + $0x104] sm:$0xff] }
 0x143   : > { %12670 = vmatprep.mubr.msk.f32.mxu0 %vm267_vm1, %v1955_v57  ;;  %v2412_v57 = vld [vmem:[%s14402_s13 + $0x10c] sm:$0xff] }
 0x146   : > { %12671 = vmatmul.mubr.msk.f32.gmra.mrb[4].mxu0 %vm267_vm1, %v1956_v58  ;;  %v2413_v58 = vld [vmem:[%s14402_s13 + $0x114] sm:$0xff] }
 0x147   : > { %12673 = vmatprep.mubr.msk.f32.mxu0 %vm267_vm1, %v1957_v59  ;;  %v2414_v59 = vld [vmem:[%s14402_s13 + $0x11c] sm:$0xff] }
 0x14a   : > { %12674 = vmatmul.mubr.msk.f32.gmra.mrb[6].mxu0 %vm267_vm1, %v1958_v60  ;;  %v2415_v60 = vld [vmem:[%s14402_s13 + $0x124] sm:$0xff] }
 0x14b   : > { %12676 = vmatprep.mubr.msk.f32.mxu0 %vm267_vm1, %v1959_v61  ;;  %v2416_v61 = vld [vmem:[%s14402_s13 + $0x12c] sm:$0xff] }
 0x14e   : > { %12677 = vmatmul.mubr.msk.f32.gmra.mrb[8].mxu0 %vm267_vm1, %v1960_v62  ;;  %v11363_v62 = vld [vmem:[%s17555_s1 + $0x20] sm:$0xf] }
 0x14f   : > { %12679 = vmatprep.mubr.msk.f32.mxu0 %vm267_vm1, %v1961_v63  ;;  %v2845_v63 = vld [vmem:[%s14402_s13 + $0x134] sm:$0xff] }
 0x152   : > { %12680 = vmatmul.mubr.msk.f32.gmra.mrb[10].mxu0 %vm267_vm1, %v1962_v0  ;;  %v2846_v0 = vld [vmem:[%s14402_s13 + $0x13c] sm:$0xff] }
 0x153   : > { %12682 = vmatprep.mubr.msk.f32.mxu0 %vm267_vm1, %v1963_v1  ;;  %v3241_v1 = vld [vmem:[%s14402_s13 + $0x25] sm:$0xff] }
 0x156   : > { %12683 = vmatmul.mubr.msk.f32.gmra.mrb[12].mxu0 %vm267_vm1, %v1964_v2  ;;  %v3242_v2 = vld [vmem:[%s14402_s13 + $0x2d] sm:$0xff] }
 0x157   : > { %12685 = vmatprep.mubr.msk.f32.mxu0 %vm267_vm1, %v1965_v3  ;;  %v3243_v3 = vld [vmem:[%s14402_s13 + $0x35] sm:$0xff] }
 0x15a   : > { %12686 = vmatmul.mubr.msk.f32.gmra.mrb[14].mxu0 %vm267_vm1, %v1966_v4  ;;  %v3244_v4 = vld [vmem:[%s14402_s13 + $0x3d] sm:$0xff] }
 0x15b   : > { %12688 = vmatprep.mubr.msk.f32.mxu0 %vm267_vm1, %v1967_v5  ;;  %v3245_v5 = vld [vmem:[%s14402_s13 + $0x45] sm:$0xff] }
 0x15e   : > { %12689 = vmatmul.mubr.msk.f32.gmra.mrb[16].mxu0 %vm267_vm1, %v1968_v6  ;;  %v3246_v6 = vld [vmem:[%s14402_s13 + $0x4d] sm:$0xff] }
 0x15f   : > { %12691 = vmatprep.mubr.msk.f32.mxu0 %vm267_vm1, %v1969_v7  ;;  %v3247_v7 = vld [vmem:[%s14402_s13 + $0x55] sm:$0xff] }
 0x162   : > { %12692 = vmatmul.mubr.msk.f32.gmra.mrb[18].mxu0 %vm267_vm1, %v1970_v8  ;;  %v3248_v8 = vld [vmem:[%s14402_s13 + $0x5d] sm:$0xff] }
 0x163   : > { %12694 = vmatprep.mubr.msk.f32.mxu0 %vm267_vm1, %v1971_v9  ;;  %v3249_v9 = vld [vmem:[%s14402_s13 + $0x65] sm:$0xff] }
 0x166   : > { %12695 = vmatmul.mubr.msk.f32.gmra.mrb[20].mxu0 %vm267_vm1, %v1972_v10  ;;  %v3250_v10 = vld [vmem:[%s14402_s13 + $0x6d] sm:$0xff] }
 0x167   : > { %12697 = vmatprep.mubr.msk.f32.mxu0 %vm267_vm1, %v1973_v11  ;;  %v3251_v11 = vld [vmem:[%s14402_s13 + $0x75] sm:$0xff] }
 0x16a   : > { %12698 = vmatmul.mubr.msk.f32.gmra.mrb[22].mxu0 %vm267_vm1, %v1974_v12  ;;  %v3252_v12 = vld [vmem:[%s14402_s13 + $0x7d] sm:$0xff] }
 0x16b   : > { %12700 = vmatprep.mubr.msk.f32.mxu0 %vm267_vm1, %v1975_v13  ;;  %v3253_v13 = vld [vmem:[%s14402_s13 + $0x85] sm:$0xff] }
 0x16e   : > { %12701 = vmatmul.mubr.msk.f32.gmra.mrb[24].mxu0 %vm267_vm1, %v1976_v14  ;;  %v3254_v14 = vld [vmem:[%s14402_s13 + $0x8d] sm:$0xff] }
 0x16f   : > { %12703 = vmatprep.mubr.msk.f32.mxu0 %vm267_vm1, %v1977_v15  ;;  %v3255_v15 = vld [vmem:[%s14402_s13 + $0x95] sm:$0xff] }
 0x172   : > { %12704 = vmatmul.mubr.msk.f32.gmra.mrb[26].mxu0 %vm267_vm1, %v1978_v16  ;;  %v3256_v16 = vld [vmem:[%s14402_s13 + $0x9d] sm:$0xff] }
 0x173   : > { %12706 = vmatprep.mubr.msk.f32.mxu0 %vm267_vm1, %v1979_v17  ;;  %v3257_v17 = vld [vmem:[%s14402_s13 + $0xa5] sm:$0xff] }
 0x176   : > { %12707 = vmatmul.mubr.msk.f32.gmra.mrb[28].mxu0 %vm267_vm1, %v1980_v18  ;;  %v3258_v18 = vld [vmem:[%s14402_s13 + $0xad] sm:$0xff] }
 0x177   : > { %12709 = vmatprep.mubr.msk.f32.mxu0 %vm267_vm1, %v1981_v19  ;;  %v3259_v19 = vld [vmem:[%s14402_s13 + $0xb5] sm:$0xff] }
 0x17a   : > { %12710 = vmatmul.mubr.msk.f32.gmra.mrb[30].mxu0 %vm267_vm1, %v1982_v20  ;;  %v3260_v20 = vld [vmem:[%s14402_s13 + $0xbd] sm:$0xff] }
 0x17b   : > { %12712 = vmatprep.mubr.msk.f32.mxu0 %vm267_vm1, %v1983_v21  ;;  %v3261_v21 = vld [vmem:[%s14402_s13 + $0xc5] sm:$0xff] }
 0x17e   : > { %12713 = vmatmul.mubr.msk.f32.gmra.mrb[32].mxu0 %vm267_vm1, %v1984_v22  ;;  %v3262_v22 = vld [vmem:[%s14402_s13 + $0xcd] sm:$0xff] }
 0x17f   : > { %12715 = vmatprep.mubr.msk.f32.mxu0 %vm267_vm1, %v1985_v23  ;;  %v3263_v23 = vld [vmem:[%s14402_s13 + $0xd5] sm:$0xff] }
 0x182   : > { %12716 = vmatmul.mubr.msk.f32.gmra.mrb[34].mxu0 %vm267_vm1, %v1986_v24  ;;  %v3264_v24 = vld [vmem:[%s14402_s13 + $0xdd] sm:$0xff] }
 0x183   : > { %12720 = vmatprep.mubr.msk.f32.mxu0 %vm267_vm1, %v2381_v25  ;;  %v3265_v25 = vld [vmem:[%s14402_s13 + $0xe5] sm:$0xff] }
 0x186   : > { %12721 = vmatmul.mubr.msk.f32.vlgmr.msra.gmra.mrb[0].mxu0 %vm267_vm1, %v2382_v26  ;;  %v3266_v26 = vld [vmem:[%s14402_s13 + $0xed] sm:$0xff] }
 0x187   : > { %12775 = vmatpush3.msk.msra.mxu0 %vm376_vm0, %v14733_v55  ;;  %12723 = vmatprep.mubr.msk.f32.mxu0 %vm267_vm1, %v14810_v27  ;;  %v2410_v55 = vld [vmem:[%s14402_s13 + $0xfc] sm:$0xff] }
 0x188   : > { %12830 = vmatprep.subr.msk.mxu0 %vm376_vm0, %v14815_v28 }
 0x18a   : > { %12724 = vmatmul.mubr.msk.f32.gmra.mrb[2].mxu0 %vm267_vm1, %v14823_v29 }
 0x18b   : > { %12726 = vmatprep.mubr.msk.f32.mxu0 %vm267_vm1, %v14826_v30 }
 0x18e   : > { %12727 = vmatmul.mubr.msk.f32.gmra.mrb[4].mxu0 %vm267_vm1, %v14835_v31 }
 0x18f   : > { %12729 = vmatprep.mubr.msk.f32.mxu0 %vm267_vm1, %v14838_v32 }
 0x192   : > { %12730 = vmatmul.mubr.msk.f32.gmra.mrb[6].mxu0 %vm267_vm1, %v14845_v33 }
 0x193   : > { %12732 = vmatprep.mubr.msk.f32.mxu0 %vm267_vm1, %v14848_v34 }
 0x196   : > { %12733 = vmatmul.mubr.msk.f32.gmra.mrb[8].mxu0 %vm267_vm1, %v14855_v35 }
 0x197   : > { %12735 = vmatprep.mubr.msk.f32.mxu0 %vm267_vm1, %v14858_v36 }
 0x19a   : > { %12736 = vmatmul.mubr.msk.f32.gmra.mrb[10].mxu0 %vm267_vm1, %v2392_v37 }
 0x19b   : > { %12738 = vmatprep.mubr.msk.f32.mxu0 %vm267_vm1, %v2393_v38 }
 0x19e   : > { %12739 = vmatmul.mubr.msk.f32.gmra.mrb[12].mxu0 %vm267_vm1, %v2394_v39 }
 0x19f   : > { %12741 = vmatprep.mubr.msk.f32.mxu0 %vm267_vm1, %v2395_v40 }
 0x1a2   : > { %12742 = vmatmul.mubr.msk.f32.gmra.mrb[14].mxu0 %vm267_vm1, %v2396_v41 }
 0x1a3   : > { %12744 = vmatprep.mubr.msk.f32.mxu0 %vm267_vm1, %v2397_v42 }
 0x1a6   : > { %12745 = vmatmul.mubr.msk.f32.gmra.mrb[16].mxu0 %vm267_vm1, %v2398_v43 }
 0x1a7   : > { %12747 = vmatprep.mubr.msk.f32.mxu0 %vm267_vm1, %v2399_v44 }
 0x1aa   : > { %12748 = vmatmul.mubr.msk.f32.gmra.mrb[18].mxu0 %vm267_vm1, %v2400_v45 }
 0x1ab   : > { %12750 = vmatprep.mubr.msk.f32.mxu0 %vm267_vm1, %v2401_v46 }
 0x1ae   : > { %12751 = vmatmul.mubr.msk.f32.gmra.mrb[20].mxu0 %vm267_vm1, %v2402_v47 }
 0x1af   : > { %12753 = vmatprep.mubr.msk.f32.mxu0 %vm267_vm1, %v2403_v48 }
 0x1b2   : > { %12754 = vmatmul.mubr.msk.f32.gmra.mrb[22].mxu0 %vm267_vm1, %v2404_v49 }
 0x1b3   : > { %12756 = vmatprep.mubr.msk.f32.mxu0 %vm267_vm1, %v2405_v50 }
 0x1b6   : > { %12757 = vmatmul.mubr.msk.f32.gmra.mrb[24].mxu0 %vm267_vm1, %v2406_v51 }
 0x1b7   : > { %12759 = vmatprep.mubr.msk.f32.mxu0 %vm267_vm1, %v2407_v52 }
 0x1ba   : > { %12760 = vmatmul.mubr.msk.f32.gmra.mrb[26].mxu0 %vm267_vm1, %v2408_v53 }
 0x1bb   : > { %12762 = vmatprep.mubr.msk.f32.mxu0 %vm267_vm1, %v2409_v54 }
 0x1be   : > { %12763 = vmatmul.mubr.msk.f32.gmra.mrb[28].mxu0 %vm267_vm1, %v2410_v55 }
 0x1bf   : > { %12765 = vmatprep.mubr.msk.f32.mxu0 %vm267_vm1, %v2411_v56 }
 0x1c2   : > { %12766 = vmatmul.mubr.msk.f32.gmra.mrb[30].mxu0 %vm267_vm1, %v2412_v57 }
 0x1c3   : > { %12768 = vmatprep.mubr.msk.f32.mxu0 %vm267_vm1, %v2413_v58 }
 0x1c6   : > { %12769 = vmatmul.mubr.msk.f32.gmra.mrb[32].mxu0 %vm267_vm1, %v2414_v59 }
 0x1c7   : > { %12771 = vmatprep.mubr.msk.f32.mxu0 %vm267_vm1, %v2415_v60 }
 0x1ca   : > { %12772 = vmatmul.mubr.msk.f32.gmra.mrb[34].mxu0 %vm267_vm1, %v2416_v61 }
 0x1cb   : > { %12776 = vmatprep.mubr.msk.f32.mxu0 %vm267_vm1, %v14810_v27  ;;  %v3267_v27 = vld [vmem:[%s14402_s13 + $0xf5] sm:$0xff] }
 0x1ce   : > { %12777 = vmatmul.mubr.msk.f32.vlgmr.msra.gmra.mrb[0].mxu0 %vm267_vm1, %v14823_v29  ;;  %v3269_v29 = vld [vmem:[%s14402_s13 + $0x105] sm:$0xff] }
 0x1cf   : > { %12831 = vmatpush3.msk.msra.mxu0 %vm376_vm0, %v14815_v28  ;;  %12779 = vmatprep.mubr.msk.f32.mxu0 %vm267_vm1, %v14826_v30  ;;  %v3268_v28 = vld [vmem:[%s14402_s13 + $0xfd] sm:$0xff]  ;;  %v3270_v30 = vld [vmem:[%s14402_s13 + $0x10d] sm:$0xff] }
 0x1d0   : > { %12886 = vmatprep.subr.msk.mxu0 %vm376_vm0, %v11363_v62 }
 0x1d2   : > { %12780 = vmatmul.mubr.msk.f32.gmra.mrb[2].mxu0 %vm267_vm1, %v14835_v31  ;;  %v3271_v31 = vld [vmem:[%s14402_s13 + $0x115] sm:$0xff] }
 0x1d3   : > { %12782 = vmatprep.mubr.msk.f32.mxu0 %vm267_vm1, %v14838_v32  ;;  %v3272_v32 = vld [vmem:[%s14402_s13 + $0x11d] sm:$0xff] }
 0x1d6   : > { %12783 = vmatmul.mubr.msk.f32.gmra.mrb[4].mxu0 %vm267_vm1, %v14845_v33  ;;  %v3273_v33 = vld [vmem:[%s14402_s13 + $0x125] sm:$0xff] }
 0x1d7   : > { %12785 = vmatprep.mubr.msk.f32.mxu0 %vm267_vm1, %v14848_v34  ;;  %v3274_v34 = vld [vmem:[%s14402_s13 + $0x12d] sm:$0xff] }
 0x1da   : > { %12786 = vmatmul.mubr.msk.f32.gmra.mrb[6].mxu0 %vm267_vm1, %v14855_v35  ;;  %v3275_v35 = vld [vmem:[%s14402_s13 + $0x135] sm:$0xff] }
 0x1db   : > { %12788 = vmatprep.mubr.msk.f32.mxu0 %vm267_vm1, %v14858_v36  ;;  %v3276_v36 = vld [vmem:[%s14402_s13 + $0x13d] sm:$0xff] }
 0x1de   : > { %12789 = vmatmul.mubr.msk.f32.gmra.mrb[8].mxu0 %vm267_vm1, %v2392_v37  ;;  %v3671_v37 = vld [vmem:[%s14402_s13 + $0x26] sm:$0xff] }
 0x1df   : > { %12791 = vmatprep.mubr.msk.f32.mxu0 %vm267_vm1, %v2393_v38  ;;  %v3672_v38 = vld [vmem:[%s14402_s13 + $0x2e] sm:$0xff] }
 0x1e2   : > { %12792 = vmatmul.mubr.msk.f32.gmra.mrb[10].mxu0 %vm267_vm1, %v2394_v39  ;;  %v3673_v39 = vld [vmem:[%s14402_s13 + $0x36] sm:$0xff] }
 0x1e3   : > { %12794 = vmatprep.mubr.msk.f32.mxu0 %vm267_vm1, %v2395_v40  ;;  %v3674_v40 = vld [vmem:[%s14402_s13 + $0x3e] sm:$0xff] }
 0x1e6   : > { %12795 = vmatmul.mubr.msk.f32.gmra.mrb[12].mxu0 %vm267_vm1, %v2396_v41  ;;  %v3675_v41 = vld [vmem:[%s14402_s13 + $0x46] sm:$0xff] }
 0x1e7   : > { %12797 = vmatprep.mubr.msk.f32.mxu0 %vm267_vm1, %v2397_v42  ;;  %v3676_v42 = vld [vmem:[%s14402_s13 + $0x4e] sm:$0xff] }
 0x1ea   : > { %12798 = vmatmul.mubr.msk.f32.gmra.mrb[14].mxu0 %vm267_vm1, %v2398_v43  ;;  %v3677_v43 = vld [vmem:[%s14402_s13 + $0x56] sm:$0xff] }
 0x1eb   : > { %12800 = vmatprep.mubr.msk.f32.mxu0 %vm267_vm1, %v2399_v44  ;;  %v3678_v44 = vld [vmem:[%s14402_s13 + $0x5e] sm:$0xff] }
 0x1ee   : > { %12801 = vmatmul.mubr.msk.f32.gmra.mrb[16].mxu0 %vm267_vm1, %v2400_v45  ;;  %v3679_v45 = vld [vmem:[%s14402_s13 + $0x66] sm:$0xff] }
 0x1ef   : > { %12803 = vmatprep.mubr.msk.f32.mxu0 %vm267_vm1, %v2401_v46  ;;  %v3680_v46 = vld [vmem:[%s14402_s13 + $0x6e] sm:$0xff] }
 0x1f2   : > { %12804 = vmatmul.mubr.msk.f32.gmra.mrb[18].mxu0 %vm267_vm1, %v2402_v47  ;;  %v3681_v47 = vld [vmem:[%s14402_s13 + $0x76] sm:$0xff] }
 0x1f3   : > { %12806 = vmatprep.mubr.msk.f32.mxu0 %vm267_vm1, %v2403_v48  ;;  %v3682_v48 = vld [vmem:[%s14402_s13 + $0x7e] sm:$0xff] }
 0x1f6   : > { %12807 = vmatmul.mubr.msk.f32.gmra.mrb[20].mxu0 %vm267_vm1, %v2404_v49  ;;  %v3683_v49 = vld [vmem:[%s14402_s13 + $0x86] sm:$0xff] }
 0x1f7   : > { %12809 = vmatprep.mubr.msk.f32.mxu0 %vm267_vm1, %v2405_v50  ;;  %v3684_v50 = vld [vmem:[%s14402_s13 + $0x8e] sm:$0xff] }
 0x1fa   : > { %12810 = vmatmul.mubr.msk.f32.gmra.mrb[22].mxu0 %vm267_vm1, %v2406_v51  ;;  %v3685_v51 = vld [vmem:[%s14402_s13 + $0x96] sm:$0xff] }
 0x1fb   : > { %12812 = vmatprep.mubr.msk.f32.mxu0 %vm267_vm1, %v2407_v52  ;;  %v3686_v52 = vld [vmem:[%s14402_s13 + $0x9e] sm:$0xff] }
 0x1fe   : > { %12813 = vmatmul.mubr.msk.f32.gmra.mrb[24].mxu0 %vm267_vm1, %v2408_v53  ;;  %v3687_v53 = vld [vmem:[%s14402_s13 + $0xa6] sm:$0xff] }
 0x1ff   : > { %12815 = vmatprep.mubr.msk.f32.mxu0 %vm267_vm1, %v2409_v54  ;;  %v3688_v54 = vld [vmem:[%s14402_s13 + $0xae] sm:$0xff] }
 0x202   : > { %12816 = vmatmul.mubr.msk.f32.gmra.mrb[26].mxu0 %vm267_vm1, %v2410_v55  ;;  %v3689_v55 = vld [vmem:[%s14402_s13 + $0xb6] sm:$0xff] }
 0x203   : > { %12818 = vmatprep.mubr.msk.f32.mxu0 %vm267_vm1, %v2411_v56  ;;  %v3690_v56 = vld [vmem:[%s14402_s13 + $0xbe] sm:$0xff] }
 0x206   : > { %12819 = vmatmul.mubr.msk.f32.gmra.mrb[28].mxu0 %vm267_vm1, %v2412_v57  ;;  %v3691_v57 = vld [vmem:[%s14402_s13 + $0xc6] sm:$0xff] }
 0x207   : > { %12821 = vmatprep.mubr.msk.f32.mxu0 %vm267_vm1, %v2413_v58  ;;  %v3692_v58 = vld [vmem:[%s14402_s13 + $0xce] sm:$0xff] }
 0x20a   : > { %12822 = vmatmul.mubr.msk.f32.gmra.mrb[30].mxu0 %vm267_vm1, %v2414_v59  ;;  %v3693_v59 = vld [vmem:[%s14402_s13 + $0xd6] sm:$0xff] }
 0x20b   : > { %12824 = vmatprep.mubr.msk.f32.mxu0 %vm267_vm1, %v2415_v60  ;;  %v3694_v60 = vld [vmem:[%s14402_s13 + $0xde] sm:$0xff] }
 0x20e   : > { %12825 = vmatmul.mubr.msk.f32.gmra.mrb[32].mxu0 %vm267_vm1, %v2416_v61  ;;  %v3695_v61 = vld [vmem:[%s14402_s13 + $0xe6] sm:$0xff] }
 0x20f   : > { %12827 = vmatprep.mubr.msk.f32.mxu0 %vm267_vm1, %v2845_v63  ;;  %v3697_v63 = vld [vmem:[%s14402_s13 + $0xf6] sm:$0xff] }
 0x212   : > { %12828 = vmatmul.mubr.msk.f32.gmra.mrb[34].mxu0 %vm267_vm1, %v2846_v0  ;;  %v3698_v0 = vld [vmem:[%s14402_s13 + $0xfe] sm:$0xff] }
 0x213   : > { %12832 = vmatprep.mubr.msk.f32.mxu0 %vm267_vm1, %v3241_v1  ;;  %v3699_v1 = vld [vmem:[%s14402_s13 + $0x106] sm:$0xff] }
 0x216   : > { %12833 = vmatmul.mubr.msk.f32.vlgmr.msra.gmra.mrb[0].mxu0 %vm267_vm1, %v3242_v2  ;;  %v3700_v2 = vld [vmem:[%s14402_s13 + $0x10e] sm:$0xff] }
 0x217   : > { %12887 = vmatpush3.msk.msra.mxu0 %vm376_vm0, %v11363_v62  ;;  %12835 = vmatprep.mubr.msk.f32.mxu0 %vm267_vm1, %v3243_v3  ;;  %v3696_v62 = vld [vmem:[%s14402_s13 + $0xee] sm:$0xff]  ;;  %v3701_v3 = vld [vmem:[%s14402_s13 + $0x116] sm:$0xff] }
 0x21a   : > { %12836 = vmatmul.mubr.msk.f32.gmra.mrb[2].mxu0 %vm267_vm1, %v3244_v4  ;;  %v3702_v4 = vld [vmem:[%s14402_s13 + $0x11e] sm:$0xff] }
 0x21b   : > { %12838 = vmatprep.mubr.msk.f32.mxu0 %vm267_vm1, %v3245_v5  ;;  %v3703_v5 = vld [vmem:[%s14402_s13 + $0x126] sm:$0xff] }
 0x21e   : > { %12839 = vmatmul.mubr.msk.f32.gmra.mrb[4].mxu0 %vm267_vm1, %v3246_v6  ;;  %v3704_v6 = vld [vmem:[%s14402_s13 + $0x12e] sm:$0xff] }
 0x21f   : > { %12841 = vmatprep.mubr.msk.f32.mxu0 %vm267_vm1, %v3247_v7  ;;  %v3705_v7 = vld [vmem:[%s14402_s13 + $0x136] sm:$0xff] }
 0x222   : > { %12842 = vmatmul.mubr.msk.f32.gmra.mrb[6].mxu0 %vm267_vm1, %v3248_v8  ;;  %v3706_v8 = vld [vmem:[%s14402_s13 + $0x13e] sm:$0xff]  ;;  %s14303_s13 = smov 72  }
 0x223   : > { %12844 = vmatprep.mubr.msk.f32.mxu0 %vm267_vm1, %v3249_v9  ;;  %v14290_v9 = vmov 0.0  }
 0x224   : > { %4895 = vst.msk [vmem:[#allocation2] sm:$0xff] %vm17560_vm2, %v14290_v9  ;;  %4896 = vst.msk [vmem:[#allocation2 + $0x8] sm:$0xff] %vm17560_vm2, %v14290_v9 }
 0x225   : > { %4899 = vst.msk [vmem:[#allocation2 + $0x133] sm:$0xff] %vm17560_vm2, %v14290_v9  ;;  %4900 = vst.msk [vmem:[#allocation2 + $0x13b] sm:$0xff] %vm17560_vm2, %v14290_v9 }
 0x226   : > { %12845 = vmatmul.mubr.msk.f32.gmra.mrb[8].mxu0 %vm267_vm1, %v3250_v10  ;;  %4898 = vst.msk [vmem:[#allocation2 + $0x10] sm:$0x7] %vm4897_vm3, %v14290_v9  ;;  %4901 = vst.msk [vmem:[#allocation2 + $0x143] sm:$0x7] %vm4897_vm3, %v14290_v9  ;;  %v4981_v10 = vld [vmem:[%s17557_s3] sm:$0xff] }
 0x227   : > { %12847 = vmatprep.mubr.msk.f32.mxu0 %vm267_vm1, %v3251_v11  ;;  %12942 = vmatprep.subr.mxu1 %v4981_v10 }
 0x228   : > { %12943 = vmatpush3.msra.mxu1 %v4981_v10 }
 0x22a   : > { %12848 = vmatmul.mubr.msk.f32.gmra.mrb[10].mxu0 %vm267_vm1, %v3252_v12 }
 0x22b   : > { %12850 = vmatprep.mubr.msk.f32.mxu0 %vm267_vm1, %v3253_v13  ;;  %v4945_v11 = vld [vmem:[#allocation2] sm:$0xff]  ;;  %v4946_v12 = vld [vmem:[#allocation2 + $0x8] sm:$0xff] }
 0x22c   : > { %12944 = vmatprep.mubr.msk.f32.mxu1 %vm17560_vm2, %v4945_v11  ;;  %v11438_v13 = vld [vmem:[%s17557_s3 + $0x8] sm:$0xff] }
 0x22d   : > { %12945 = vmatmul.mubr.msk.f32.vlgmr.msra.gmra.mrb[0].mxu1 %vm17560_vm2, %v4946_v12  ;;  %12998 = vmatprep.subr.mxu1 %v11438_v13 }
 0x22e   : > { %12851 = vmatmul.mubr.msk.f32.gmra.mrb[12].mxu0 %vm267_vm1, %v3254_v14  ;;  %12999 = vmatpush3.msra.mxu1 %v11438_v13  ;;  %v4137_v14 = vlaneseq }
 0x22f   : > { %12853 = vmatprep.mubr.msk.f32.mxu0 %vm267_vm1, %v3255_v15 }
 0x230   : > { %v15124_v15 = vshrl.u32 %v4137_v14, 7 }
 0x232   : > { %12854 = vmatmul.mubr.msk.f32.gmra.mrb[14].mxu0 %vm267_vm1, %v3256_v16  ;;  %v4139_v16 = vadd.s32 8, %v15124_v15  ;;  %v15236_v10 = vadd.s32 96, %v15124_v15 }
 0x233   : > { %12856 = vmatprep.mubr.msk.f32.mxu0 %vm267_vm1, %v3257_v17 }
 0x236   : > { %12857 = vmatmul.mubr.msk.f32.gmra.mrb[16].mxu0 %vm267_vm1, %v3258_v18  ;;  %v15127_v17 = vmul.u32.u64.low 3817748708, %v4139_v16  ;;  %v15128_v18 = vmul.u32.u64.high 3817748708, %v4139_v16, %v15127_v17 }
 0x237   : > { %12859 = vmatprep.mubr.msk.f32.mxu0 %vm267_vm1, %v3259_v19  ;;  %v4141_v19 = vadd.s32 24, %v15124_v15  ;;  %v15251_v17 = vadd.s32 120, %v15124_v15 }
 0x23a   : > { %12860 = vmatmul.mubr.msk.f32.gmra.mrb[18].mxu0 %vm267_vm1, %v3260_v20 }
 0x23b   : > { %12862 = vmatprep.mubr.msk.f32.mxu0 %vm267_vm1, %v3261_v21  ;;  %v15132_v20 = vmul.u32.u64.low 3817748708, %v15124_v15  ;;  %v15133_v21 = vmul.u32.u64.high 3817748708, %v15124_v15, %v15132_v20 }
 0x23e   : > { %12863 = vmatmul.mubr.msk.f32.gmra.mrb[20].mxu0 %vm267_vm1, %v3262_v22  ;;  %v4140_v22 = vadd.s32 16, %v15124_v15 }
 0x23f   : > { %12865 = vmatprep.mubr.msk.f32.mxu0 %vm267_vm1, %v3263_v23  ;;  %v4191_v23 = vshrl.u32 %v15128_v18, 4 }
 0x242   : > { %12866 = vmatmul.mubr.msk.f32.gmra.mrb[22].mxu0 %vm267_vm1, %v3264_v24 }
 0x243   : > { %12868 = vmatprep.mubr.msk.f32.mxu0 %vm267_vm1, %v3265_v25  ;;  %v15137_v24 = vmul.u32.u64.low 3817748708, %v4141_v19  ;;  %v15138_v25 = vmul.u32.u64.high 3817748708, %v4141_v19, %v15137_v24 }
 0x246   : > { %12869 = vmatmul.mubr.msk.f32.gmra.mrb[24].mxu0 %vm267_vm1, %v3266_v26  ;;  %v4143_v26 = vadd.s32 40, %v15124_v15 }
 0x247   : > { %12871 = vmatprep.mubr.msk.f32.mxu0 %vm267_vm1, %v3267_v27 }
 0x24a   : > { %12872 = vmatmul.mubr.msk.f32.gmra.mrb[26].mxu0 %vm267_vm1, %v3268_v28  ;;  %v15141_v27 = vmul.u32.u64.low 3817748708, %v4140_v22  ;;  %v15142_v28 = vmul.u32.u64.high 3817748708, %v4140_v22, %v15141_v27 }
 0x24b   : > { %12874 = vmatprep.mubr.msk.f32.mxu0 %vm267_vm1, %v3269_v29  ;;  %v4142_v29 = vadd.s32 32, %v15124_v15 }
 0x24e   : > { %12875 = vmatmul.mubr.msk.f32.gmra.mrb[28].mxu0 %vm267_vm1, %v3270_v30  ;;  %v4192_v30 = vmul.u32 18, %v4191_v23  ;;  %v15271_v23 = vmul.u32.u64.low 3817748708, %v15236_v10  ;;  %v15272_v24 = vmul.u32.u64.high 3817748708, %v15236_v10, %v15271_v23 }
 0x24f   : > { %12877 = vmatprep.mubr.msk.f32.mxu0 %vm267_vm1, %v3271_v31  ;;  %v4180_v31 = vshrl.u32 %v15133_v21, 4  ;;  %v15258_v21 = vadd.s32 112, %v15124_v15 }
 0x252   : > { %12878 = vmatmul.mubr.msk.f32.gmra.mrb[30].mxu0 %vm267_vm1, %v3272_v32 }
 0x253   : > { %12880 = vmatprep.mubr.msk.f32.mxu0 %vm267_vm1, %v3273_v33  ;;  %v15146_v32 = vmul.u32.u64.low 3817748708, %v4143_v26  ;;  %v15147_v33 = vmul.u32.u64.high 3817748708, %v4143_v26, %v15146_v32 }
 0x256   : > { %12881 = vmatmul.mubr.msk.f32.gmra.mrb[32].mxu0 %vm267_vm1, %v3274_v34 }
 0x257   : > { %12883 = vmatprep.mubr.msk.f32.mxu0 %vm267_vm1, %v3275_v35  ;;  %v15149_v34 = vmul.u32.u64.low 3817748708, %v4142_v29  ;;  %v15150_v35 = vmul.u32.u64.high 3817748708, %v4142_v29, %v15149_v34 }
 0x25a   : > { %12884 = vmatmul.mubr.msk.f32.gmra.mrb[34].mxu0 %vm267_vm1, %v3276_v36  ;;  %v15152_v36 = vsub.s32 %v4139_v16, %v4192_v30 }
 0x25b   : > { %12888 = vmatprep.mubr.msk.f32.mxu0 %vm267_vm1, %v3671_v37  ;;  %v4213_v37 = vshrl.u32 %v15138_v25, 4 }
 0x25c   : > { %vm4571_vm4 = vcmp.ne.s32.totalorder %v15152_v36, 0  ;;  %vm4607_vm5 = vcmp.lt.s32.totalorder %v15152_v36, 0 }
 0x25d   : > { %vm15178_vm6 = vmand %vm4607_vm5, %vm4571_vm4 }
 0x25e   : > { %12889 = vmatmul.mubr.msk.f32.vlgmr.msra.gmra.mrb[0].mxu0 %vm267_vm1, %v3672_v38  ;;  %v4181_v38 = vmul.u32 18, %v4180_v31  ;;  %v15300_v31 = vmul.u32.u64.low 3817748708, %v15251_v17  ;;  %v15301_v32 = vmul.u32.u64.high 3817748708, %v15251_v17, %v15300_v31 }
 0x25f   : > { %12891 = vmatprep.mubr.msk.f32.mxu0 %vm267_vm1, %v3673_v39  ;;  %v15156_v39 = vadd.s32 56, %v15124_v15 }
 0x262   : > { %12892 = vmatmul.mubr.msk.f32.gmra.mrb[2].mxu0 %vm267_vm1, %v3674_v40  ;;  %v11475_v40 = vld [vmem:[%s17557_s3 + $0x10] sm:$0xff] }
 0x263   : > { %12894 = vmatprep.mubr.msk.f32.mxu0 %vm267_vm1, %v3675_v41  ;;  %v4202_v41 = vshrl.u32 %v15142_v28, 4  ;;  %13054 = vmatprep.subr.mxu1 %v11475_v40  ;;  %v15288_v28 = vadd.s32 136, %v15124_v15 }
 0x266   : > { %12895 = vmatmul.mubr.msk.f32.gmra.mrb[4].mxu0 %vm267_vm1, %v3676_v42  ;;  %v4214_v42 = vmul.u32 18, %v4213_v37 }
 0x267   : > { %12897 = vmatprep.mubr.msk.f32.mxu0 %vm267_vm1, %v3677_v43  ;;  %v15165_v43 = vadd.s32 48, %v15124_v15 }
 0x26a   : > { %12898 = vmatmul.mubr.msk.f32.gmra.mrb[6].mxu0 %vm267_vm1, %v3678_v44  ;;  %v15168_v44 = vsub.s32 %v15124_v15, %v4181_v38  ;;  %v15312_v37 = vmul.u32.u64.low 3817748708, %v15258_v21  ;;  %v15313_v38 = vmul.u32.u64.high 3817748708, %v15258_v21, %v15312_v37 }
 0x26b   : > { %12900 = vmatprep.mubr.msk.f32.mxu0 %vm267_vm1, %v3679_v45  ;;  %v15401_v37 = vadd.s32 144, %v15124_v15 }
 0x26c   : > { %vm4570_vm7 = vcmp.ne.s32.totalorder %v15168_v44, 0  ;;  %vm4606_vm8 = vcmp.lt.s32.totalorder %v15168_v44, 0 }
 0x26d   : > { %vm15264_vm13 = vmand %vm4606_vm8, %vm4570_vm7 }
 0x26e   : > { %12901 = vmatmul.mubr.msk.f32.gmra.mrb[8].mxu0 %vm267_vm1, %v3680_v46  ;;  %v15171_v45 = vmul.u32.u64.low 3817748708, %v15156_v39  ;;  %v15172_v46 = vmul.u32.u64.high 3817748708, %v15156_v39, %v15171_v45 }
 0x26f   : > { %12903 = vmatprep.mubr.msk.f32.mxu0 %vm267_vm1, %v3681_v47  ;;  %v15175_v47 = vadd.s32 18, %v15152_v36  ;;  %v17600_v45 = vmov 0 }
 0x272   : > { %12904 = vmatmul.mubr.msk.f32.gmra.mrb[10].mxu0 %vm267_vm1, %v3682_v48  ;;  %v4235_v48 = vshrl.u32 %v15147_v33, 4  ;;  %v17598_v33 = vmov 0 }
 0x273   : > { %12906 = vmatprep.mubr.msk.f32.mxu0 %vm267_vm1, %v3683_v49 }
 0x276   : > { %12907 = vmatmul.mubr.msk.f32.gmra.mrb[12].mxu0 %vm267_vm1, %v3684_v50  ;;  %v4203_v50 = vmul.u32 18, %v4202_v41 }
 0x277   : > { %12909 = vmatprep.mubr.msk.f32.mxu0 %vm267_vm1, %v3685_v51  ;;  %v4224_v51 = vshrl.u32 %v15150_v35, 4 }
 0x27a   : > { %12910 = vmatmul.mubr.msk.f32.gmra.mrb[14].mxu0 %vm267_vm1, %v3686_v52  ;;  %v15184_v52 = vadd.s32 72, %v15124_v15 }
 0x27b   : > { %12912 = vmatprep.mubr.msk.f32.mxu0 %vm267_vm1, %v3687_v53  ;;  %v15186_v53 = vsub.s32 %v4141_v19, %v4214_v42 }
 0x27d   : > { %vm4573_vm9 = vcmp.ne.s32.totalorder %v15186_v53, 0  ;;  %vm4609_vm10 = vcmp.lt.s32.totalorder %v15186_v53, 0 }
 0x27e   : > { %12913 = vmatmul.mubr.msk.f32.gmra.mrb[16].mxu0 %vm267_vm1, %v3688_v54  ;;  %vm15278_vm0 = vmand %vm4609_vm10, %vm4573_vm9 }
 0x27f   : > { %12915 = vmatprep.mubr.msk.f32.mxu0 %vm267_vm1, %v3689_v55  ;;  %v15189_v54 = vmul.u32.u64.low 3817748708, %v15165_v43  ;;  %v15190_v55 = vmul.u32.u64.high 3817748708, %v15165_v43, %v15189_v54 }
 0x280   : > { %v17628_v54 = vmov 0 }
 0x281   : > { %v4246_v13 = vshrl.u32 %v15190_v55, 4 }
 0x282   : > { %12916 = vmatmul.mubr.msk.f32.gmra.mrb[18].mxu0 %vm267_vm1, %v3690_v56  ;;  %v15195_v56 = vadd.s32 64, %v15124_v15 }
 0x283   : > { %12918 = vmatprep.mubr.msk.f32.mxu0 %vm267_vm1, %v3691_v57  ;;  %v4715_v57 = vsel %vm15178_vm6, %v15175_v47, %v15152_v36  ;;  %v4247_v30 = vmul.u32 18, %v4246_v13 }
 0x286   : > { %12919 = vmatmul.mubr.msk.f32.gmra.mrb[20].mxu0 %vm267_vm1, %v3692_v58  ;;  %v15202_v58 = vadd.s32 18, %v15168_v44 }
 0x287   : > { %12921 = vmatprep.mubr.msk.f32.mxu0 %vm267_vm1, %v3693_v59  ;;  %v4236_v59 = vmul.u32 18, %v4235_v48 }
 0x288   : > { %v4714_v40 = vsel %vm15264_vm13, %v15202_v58, %v15168_v44  ;;  %v17633_v44 = vmov 0 }
 0x289   : > { %vm15562_vm6 = vcmp.lt.s32.totalorder %v4714_v40, 16 }
 0x28a   : > { %12922 = vmatmul.mubr.msk.f32.gmra.mrb[22].mxu0 %vm267_vm1, %v3694_v60  ;;  %v15205_v60 = vadd.s32 88, %v15124_v15 }
 0x28b   : > { %12924 = vmatprep.mubr.msk.f32.mxu0 %vm267_vm1, %v3695_v61  ;;  %v15207_v61 = vsub.s32 %v4140_v22, %v4203_v50  ;;  %v15334_v48 = vmul.u32.u64.low 3817748708, %v15288_v28  ;;  %v15335_v50 = vmul.u32.u64.high 3817748708, %v15288_v28, %v15334_v48 }
 0x28c   : > { %v15413_v48 = vadd.s32 160, %v15124_v15 }
 0x28d   : > { %vm4572_vm11 = vcmp.ne.s32.totalorder %v15207_v61, 0  ;;  %vm4608_vm12 = vcmp.lt.s32.totalorder %v15207_v61, 0  ;;  %v15241_v11 = vadd.s32 18, %v15207_v61 }
 0x28e   : > { %12925 = vmatmul.mubr.msk.f32.gmra.mrb[24].mxu0 %vm267_vm1, %v3696_v62  ;;  %v4225_v62 = vmul.u32 18, %v4224_v51  ;;  %vm15294_vm3 = vmand %vm4608_vm12, %vm4572_vm11  ;;  %v15338_v51 = vadd.s32 128, %v15124_v15 }
 0x28f   : > { %12927 = vmatprep.mubr.msk.f32.mxu0 %vm267_vm1, %v3697_v63 }
 0x290   : > { %v15243_v12 = vsub.s32 %v4142_v29, %v4225_v62  ;;  %v17596_v29 = vmov 0 }
 0x291   : > { %v17597_v29 = vsel %vm15294_vm3, 4294967295, %v17596_v29 }
 0x292   : > { %12928 = vmatmul.mubr.msk.f32.gmra.mrb[26].mxu0 %vm267_vm1, %v3698_v0  ;;  %v15210_v63 = vmul.u32.u64.low 3817748708, %v15184_v52  ;;  %v15211_v0 = vmul.u32.u64.high 3817748708, %v15184_v52, %v15210_v63  ;;  %vm4610_vm4 = vcmp.lt.s32.totalorder %v15243_v12, 0  ;;  %v15324_v42 = vadd.s32 18, %v15243_v12 }
 0x293   : > { %12930 = vmatprep.mubr.msk.f32.mxu0 %vm267_vm1, %v3699_v1  ;;  %v15216_v1 = vadd.s32 18, %v15186_v53 }
 0x294   : > { %v4279_v27 = vshrl.u32 %v15211_v0, 4 }
 0x295   : > { %v4717_v41 = vsel %vm15278_vm0, %v15216_v1, %v15186_v53 }
 0x296   : > { %12931 = vmatmul.mubr.msk.f32.gmra.mrb[28].mxu0 %vm267_vm1, %v3700_v2  ;;  %v15219_v2 = vadd.s32 80, %v15124_v15 }
 0x297   : > { %12933 = vmatprep.mubr.msk.f32.mxu0 %vm267_vm1, %v3701_v3  ;;  %v4257_v3 = vshrl.u32 %v15172_v46, 4  ;;  %v4280_v46 = vmul.u32 18, %v4279_v27 }
 0x298   : > { %v15247_v14 = vmul.u32.u64.low 3817748708, %v15219_v2  ;;  %v15248_v16 = vmul.u32.u64.high 3817748708, %v15219_v2, %v15247_v14 }
 0x299   : > { %v4258_v18 = vmul.u32 18, %v4257_v3  ;;  %v15370_v13 = vmul.u32.u64.low 3817748708, %v15338_v51  ;;  %v15371_v14 = vmul.u32.u64.high 3817748708, %v15338_v51, %v15370_v13 }
 0x29a   : > { %12934 = vmatmul.mubr.msk.f32.gmra.mrb[30].mxu0 %vm267_vm1, %v3702_v4  ;;  %v4290_v62 = vshrl.u32 %v15248_v16, 4  ;;  %v17602_v16 = vmov 0 }
 0x29b   : > { %12936 = vmatprep.mubr.msk.f32.mxu0 %vm267_vm1, %v3703_v5  ;;  %v15223_v4 = vmul.u32.u64.low 3817748708, %v15195_v56  ;;  %v15224_v5 = vmul.u32.u64.high 3817748708, %v15195_v56, %v15223_v4  ;;  %v15308_v34 = vsub.s32 %v15156_v39, %v4258_v18 }
 0x29c   : > { %v4291_v18 = vmul.u32 18, %v4290_v62 }
 0x29d   : > { %v4268_v35 = vshrl.u32 %v15224_v5, 4  ;;  %vm4577_vm8 = vcmp.ne.s32.totalorder %v15308_v34, 0  ;;  %vm4613_vm9 = vcmp.lt.s32.totalorder %v15308_v34, 0  ;;  %v4312_v5 = vshrl.u32 %v15272_v24, 4 }
 0x29e   : > { %12937 = vmatmul.mubr.msk.f32.gmra.mrb[32].mxu0 %vm267_vm1, %v3704_v6  ;;  %v15227_v6 = vadd.s32 104, %v15124_v15  ;;  %vm15373_vm10 = vmand %vm4613_vm9, %vm4577_vm8  ;;  %v4334_v24 = vshrl.u32 %v15313_v38, 4 }
 0x29f   : > { %12939 = vmatprep.mubr.msk.f32.mxu0 %vm267_vm1, %v3705_v7  ;;  %v15229_v7 = vsub.s32 %v4143_v26, %v4236_v59  ;;  %v15349_v59 = vsub.s32 %v15165_v43, %v4247_v30  ;;  %v4269_v63 = vmul.u32 18, %v4268_v35  ;;  %v15361_v43 = vadd.s32 152, %v15124_v15 }
 0x2a0   : > { %v15254_v19 = vmul.u32.u64.low 3817748708, %v15227_v6  ;;  %v15255_v20 = vmul.u32.u64.high 3817748708, %v15227_v6, %v15254_v19  ;;  %v17603_v16 = vsel %vm15373_vm10, 4294967295, %v17602_v16  ;;  %v4313_v30 = vmul.u32 18, %v4312_v5  ;;  %v15624_v5 = vld [vmem:[%s17556_s2] ss:$0 sm:$0xff] }
 0x2a1   : > { %vm4575_vm14 = vcmp.ne.s32.totalorder %v15229_v7, 0  ;;  %vm4611_vm15 = vcmp.lt.s32.totalorder %v15229_v7, 0  ;;  %v15283_v26 = vadd.s32 18, %v15229_v7  ;;  %vm4576_vm11 = vcmp.ne.s32.totalorder %v15349_v59, 0 }
 0x2a2   : > { %12940 = vmatmul.mubr.msk.f32.gmra.mrb[34].mxu0 %vm267_vm1, %v3706_v8  ;;  %v15232_v8 = vmul.u32.u64.low 3817748708, %v15205_v60  ;;  %v15233_v9 = vmul.u32.u64.high 3817748708, %v15205_v60, %v15232_v8  ;;  %vm4574_vm1 = vcmp.ne.s32.totalorder %v15243_v12, 0  ;;  %vm15303_vm5 = vmand %vm4611_vm15, %vm4575_vm14  ;;  %v4323_v0 = vshrl.u32 %v15255_v20, 4 }
 0x2a3   : > { %v17599_v33 = vsel %vm15303_vm5, 4294967295, %v17598_v33  ;;  %vm15329_vm7 = vmand %vm4610_vm4, %vm4574_vm1  ;;  %v15364_v8 = vadd.s32 18, %v15308_v34  ;;  %vm4612_vm12 = vcmp.lt.s32.totalorder %v15349_v59, 0  ;;  %v4345_v19 = vshrl.u32 %v15301_v32, 4 }
 0x2a4   : > { %v4301_v39 = vshrl.u32 %v15233_v9, 4  ;;  %v17601_v45 = vsel %vm15329_vm7, 4294967295, %v17600_v45  ;;  %v15367_v9 = vsub.s32 %v15184_v52, %v4280_v46  ;;  %v15381_v20 = vadd.s32 18, %v15349_v59  ;;  %vm15432_vm2 = vmand %vm4612_vm12, %vm4576_vm11 }
 0x2a5   : > { %v15384_v52 = vsub.s32 %v15195_v56, %v4269_v63  ;;  %v4324_v23 = vmul.u32 18, %v4323_v0  ;;  %v15391_v31 = vmul.u32.u64.low 3817748708, %v15361_v43  ;;  %v15392_v35 = vmul.u32.u64.high 3817748708, %v15361_v43, %v15391_v31 }
 0x2a6   : > { %v4302_v4 = vmul.u32 18, %v4301_v39  ;;  %vm4579_vm14 = vcmp.ne.s32.totalorder %v15367_v9, 0  ;;  %v4367_v56 = vshrl.u32 %v15335_v50, 4  ;;  %vm4615_vm15 = vcmp.lt.s32.totalorder %v15367_v9, 0 }
 0x2a7   : > { %v4346_v38 = vmul.u32 18, %v4345_v19  ;;  %v15408_v39 = vadd.s32 168, %v15124_v15  ;;  %vm4578_vm1 = vcmp.ne.s32.totalorder %v15384_v52, 0  ;;  %vm4614_vm4 = vcmp.lt.s32.totalorder %v15384_v52, 0  ;;  %vm15448_vm8 = vmand %vm4615_vm15, %vm4579_vm14 }
 0x2a8   : > { %v15388_v27 = vsub.s32 %v15205_v60, %v4302_v4  ;;  %v15405_v60 = vsub.s32 %v15219_v2, %v4291_v18  ;;  %v4335_v46 = vmul.u32 18, %v4334_v24  ;;  %v15418_v50 = vsub.s32 %v15227_v6, %v4324_v23  ;;  %vm15467_vm12 = vmand %vm4614_vm4, %vm4578_vm1 }
 0x2a9   : > { %v15421_v2 = vsub.s32 %v15236_v10, %v4313_v30  ;;  %v4368_v62 = vmul.u32 18, %v4367_v56  ;;  %v4356_v63 = vshrl.u32 %v15371_v14, 4  ;;  %v15438_v6 = vsub.s32 %v15251_v17, %v4346_v38 }
 0x2aa   : > { %v15425_v0 = vmul.u32.u64.low 3817748708, %v15401_v37  ;;  %v15426_v4 = vmul.u32.u64.high 3817748708, %v15401_v37, %v15425_v0  ;;  %v15441_v10 = vmul.u32.u64.low 3817748708, %v15408_v39  ;;  %v15442_v13 = vmul.u32.u64.high 3817748708, %v15408_v39, %v15441_v10 }
 0x2ab   : > { %v15454_v18 = vsub.s32 %v15258_v21, %v4335_v46  ;;  %v15457_v17 = vmul.u32.u64.low 3817748708, %v15413_v48  ;;  %v15458_v19 = vmul.u32.u64.high 3817748708, %v15413_v48, %v15457_v17  ;;  %v15461_v23 = vadd.s32 18, %v15367_v9 }
 0x2ac   : > { %vm4583_vm14 = vcmp.ne.s32.totalorder %v15418_v50, 0  ;;  %vm4619_vm15 = vcmp.lt.s32.totalorder %v15418_v50, 0  ;;  %v4389_v21 = vshrl.u32 %v15392_v35, 4  ;;  %vm17610_vm11 = vcmp.ne.s32.totalorder %v15388_v27, 0 }
 0x2ad   : > { %vm17611_vm9 = vcmp.lt.s32.totalorder %v15388_v27, 0  ;;  %v15485_v31 = vsub.s32 %v15288_v28, %v4368_v62  ;;  %v4357_v56 = vmul.u32 18, %v4356_v63  ;;  %v15488_v38 = vadd.s32 18, %v15384_v52  ;;  %vm15510_vm5 = vmand %vm4619_vm15, %vm4583_vm14 }
 0x2ae   : > { %vm15478_vm10 = vmand %vm17611_vm9, %vm17610_vm11  ;;  %v15491_v35 = vadd.s32 18, %v15388_v27  ;;  %vm17615_vm4 = vcmp.ne.s32.totalorder %v15405_v60, 0  ;;  %vm17616_vm9 = vcmp.lt.s32.totalorder %v15405_v60, 0  ;;  %vm4621_vm7 = vcmp.lt.s32.totalorder %v15438_v6, 0 }
 0x2af   : > { %17614 = vst [vmem:[#allocation6_spill] sm:$0xff] %v15485_v31  ;;  %vm15497_vm11 = vmand %vm17616_vm9, %vm17615_vm4  ;;  %v15504_v28 = vadd.s32 18, %v15405_v60  ;;  %v15515_v63 = vadd.s32 18, %v15418_v50  ;;  %vm4584_vm4 = vcmp.ne.s32.totalorder %v15454_v18, 0  ;;  %vm17621_vm1 = vcmp.ne.s32.totalorder %v15421_v2, 0 }
 0x2b0   : > { %vm17622_vm3 = vcmp.lt.s32.totalorder %v15421_v2, 0  ;;  %v17623_v0 = vmov 0  ;;  %v15528_v10 = vadd.s32 18, %v15421_v2  ;;  %v15531_v17 = vadd.s32 18, %v15438_v6 }
 0x2b1   : > { %vm15523_vm0 = vmand %vm17622_vm3, %vm17621_vm1  ;;  %v15534_v32 = vadd.s32 18, %v15454_v18  ;;  %v4390_v3 = vmul.u32 18, %v4389_v21  ;;  %vm15541_vm14 = vcmp.lt.s32.totalorder %v4715_v57, 16  ;;  %vm17627_vm3 = vcmp.ne.s32.totalorder %v15438_v6, 0 }
 0x2b2   : > { %v17624_v0 = vsel %vm15523_vm0, 4294967295, %v17623_v0  ;;  %vm15547_vm15 = vmand %vm4621_vm7, %vm17627_vm3  ;;  %vm4587_vm1 = vcmp.ne.s32.totalorder %v15485_v31, 0  ;;  %vm4623_vm9 = vcmp.lt.s32.totalorder %v15485_v31, 0  ;;  %v15554_v21 = vsub.s32 %v15338_v51, %v4357_v56 }
 0x2b3   : > { %v17629_v54 = vsel %vm15547_vm15, 4294967295, %v17628_v54  ;;  %v4378_v49 = vshrl.u32 %v15426_v4, 4  ;;  %v4720_v47 = vsel %vm15432_vm2, %v15381_v20, %v15349_v59  ;;  %vm17632_vm13 = vcmp.lt.s32.totalorder %v15454_v18, 0  ;;  %vm15614_vm2 = vmand %vm4623_vm9, %vm4587_vm1 }
 0x2b4   : > { %vm15582_vm7 = vmand %vm17632_vm13, %vm4584_vm4  ;;  %v4411_v58 = vshrl.u32 %v15442_v13, 4  ;;  %v15592_v51 = vadd.s32 18, %v15485_v31  ;;  %v4400_v59 = vshrl.u32 %v15458_v19, 4  ;;  %v15596_v20 = vadd.s32 184, %v15124_v15 }
 0x2b5   : > { %v17634_v44 = vsel %vm15582_vm7, 4294967295, %v17633_v44  ;;  %v17635_v19 = vmov 0  ;;  %v15619_v56 = vsub.s32 %v15361_v43, %v4390_v3  ;;  %vm15631_vm3 = vcmp.lt.s32.totalorder %v4717_v41, 16 }
 0x2b6   : > { %v17636_v19 = vsel %vm15614_vm2, 4294967295, %v17635_v19  ;;  %v4379_v25 = vmul.u32 18, %v4378_v49  ;;  %vm17640_vm1 = vnez %v17597_v29  ;;  %v15655_v41 = vadd.s32 18, %v15554_v21 }
 0x2b7   : > { %v17641_v53 = vsel %vm17640_vm1, %v15241_v11, %v15207_v61  ;;  %v4412_v3 = vmul.u32 18, %v4411_v58  ;;  %v15658_v43 = vadd.s32 176, %v15124_v15  ;;  %v4401_v61 = vmul.u32 18, %v4400_v59 }
 0x2b8   : > { %vm15649_vm13 = vcmp.lt.s32.totalorder %v17641_v53, 16  ;;  %v15665_v11 = vmul.u32.u64.low 3817748708, %v15596_v20  ;;  %v15666_v49 = vmul.u32.u64.high 3817748708, %v15596_v20, %v15665_v11  ;;  %v15672_v58 = vadd.s32 200, %v15124_v15 }
 0x2b9   : > { %vm17644_vm9 = vnez %v17599_v33  ;;  %v15688_v11 = vsub.s32 %v15401_v37, %v4379_v25  ;;  %v15691_v57 = vadd.s32 192, %v15124_v15  ;;  %vm17648_vm4 = vnez %v17601_v45 }
 0x2ba   : > { %v17645_v59 = vsel %vm17644_vm9, %v15283_v26, %v15229_v7  ;;  %v17649_v33 = vsel %vm17648_vm4, %v15324_v42, %v15243_v12  ;;  %v15703_v26 = vsub.s32 %v15408_v39, %v4412_v3  ;;  %v15713_v45 = vadd.s32 216, %v15124_v15 }
 0x2bb   : > { %vm15680_vm2 = vcmp.lt.s32.totalorder %v17645_v59, 16  ;;  %vm15698_vm9 = vcmp.lt.s32.totalorder %v17649_v33, 16  ;;  %v15716_v12 = vadd.s32 208, %v15124_v15  ;;  %vm17653_vm4 = vcmask 64512  }
 0x2bc   : > { %vm17654_vm1 = vnez %v17603_v16  ;;  %vm17658_vm0 = vmmov %vm17653_vm4  ;;  %v15746_v16 = vadd.s32 18, %v15688_v11  ;;  %vm17662_vm15 = vcmp.lt.s32.totalorder %v15554_v21, 0  ;;  %v17673_v14 = vsel %vm15467_vm12, %v15488_v38, %v15384_v52 }
 0x2bd   : > { %17652 = vst [vmem:[#allocation7_spill] sm:$0xff] %v15716_v12  ;;  %v17655_v55 = vsel %vm17654_vm1, %v15364_v8, %v15308_v34  ;;  %v15749_v34 = vmul.u32.u64.low 3817748708, %v15691_v57  ;;  %v15750_v8 = vmul.u32.u64.high 3817748708, %v15691_v57, %v15749_v34  ;;  %vm17680_vm12 = vcmp.ne.s32.totalorder %v15703_v26, 0 }
 0x2be   : > { %v15864_v7 = vadd.s32 232, %v15124_v15 }
 0x331   : > { %v12890_v4 = vpop.f32.mrb[0].mxu0 }
 0x332   : > { %v13446_v53 = vadd.f32 %v12890_v4, %v15624_v5  ;;  %v3886_v40 = vpop.f32.mrb[1].mxu0  ;;  %v15685_v4 = vadd.s32 18, %v15619_v56 }
 0x333   : > { %v13447_v22 = vadd.f32 %v15624_v5, %v3886_v40  ;;  %v15706_v40 = vmul.u32.u64.low 3817748708, %v15658_v43  ;;  %v15707_v37 = vmul.u32.u64.high 3817748708, %v15658_v43, %v15706_v40 }
 0x334   : > { %v4102_v31 = vmax.f32 %v13446_v53, 0.0  ;;  %v15710_v53 = vsub.s32 %v15413_v48, %v4401_v61  ;;  %v15722_v33 = vmul.u32.u64.low 3817748708, %v15672_v58  ;;  %v15723_v40 = vmul.u32.u64.high 3817748708, %v15672_v58, %v15722_v33 }
 0x335   : > { %v4101_v25 = vmax.f32 %v13447_v22, 0.0  ;;  %v12893_v59 = vpop.f32.mrb[2].mxu0 }
 0x336   : > { %v4859_v42 = vsel %vm15541_vm14, %v4102_v31, 0.0  ;;  %v13448_v39 = vadd.f32 %v12893_v59, %v15624_v5  ;;  %v3896_v3 = vpop.f32.mrb[3].mxu0  ;;  %vm15734_vm14 = vcmp.lt.s32.totalorder %v17655_v55, 16  ;;  %v15793_v1 = vadd.s32 18, %v15710_v53 }
 0x337   : > { %4903 = vst.msk [vmem:[#allocation2 + $0x1b] sm:$0xff] %vm17653_vm4, %v4859_v42  ;;  %v4858_v48 = vsel %vm15562_vm6, %v4101_v25, 0.0  ;;  %v13449_v22 = vadd.f32 %v15624_v5, %v3896_v3  ;;  %vm15741_vm4 = vcmp.lt.s32.totalorder %v4720_v47, 16  ;;  %v4433_v42 = vshrl.u32 %v15666_v49, 4 }
 0x338   : > { %4902 = vst.msk [vmem:[#allocation2 + $0x13] sm:$0xff] %vm17658_vm0, %v4858_v48  ;;  %v4104_v61 = vmax.f32 %v13448_v39, 0.0  ;;  %vm17661_vm0 = vcmp.ne.s32.totalorder %v15554_v21, 0  ;;  %v15767_v48 = vadd.s32 18, %v15703_v26  ;;  %vm17665_vm6 = vcmask 64512  }
 0x339   : > { %v4103_v25 = vmax.f32 %v13449_v22, 0.0  ;;  %v12896_v59 = vpop.f32.mrb[4].mxu0  ;;  %vm15762_vm7 = vmand %vm17662_vm15, %vm17661_vm0  ;;  %v17666_v22 = vsel %vm15448_vm8, %v15461_v23, %v15367_v9  ;;  %vm17670_vm0 = vcmp.lt.s32.totalorder %v15619_v56, 0  ;;  %vm15801_vm8 = vcmp.lt.s32.totalorder %v17673_v14, 16 }
 0x33a   : > { %v4861_v47 = vsel %vm15631_vm3, %v4104_v61, 0.0  ;;  %v13450_v39 = vadd.f32 %v12896_v59, %v15624_v5  ;;  %v3906_v3 = vpop.f32.mrb[5].mxu0  ;;  %vm15779_vm15 = vcmp.lt.s32.totalorder %v17666_v22, 16  ;;  %vm17669_vm3 = vcmp.ne.s32.totalorder %v15619_v56, 0 }
 0x33b   : > { %4905 = vst.msk [vmem:[#allocation2 + $0x2b] sm:$0xff] %vm17665_vm6, %v4861_v47  ;;  %v4860_v13 = vsel %vm15649_vm13, %v4103_v25, 0.0  ;;  %v13451_v49 = vadd.f32 %v15624_v5, %v3906_v3  ;;  %vm15787_vm1 = vmand %vm17670_vm0, %vm17669_vm3  ;;  %v17674_v23 = vmov 0  ;;  %vm17676_vm3 = vcmp.ne.s32.totalorder %v15688_v11, 0 }
 0x33c   : > { %4904 = vst.msk [vmem:[#allocation2 + $0x23] sm:$0xff] %vm17665_vm6, %v4860_v13  ;;  %v4106_v9 = vmax.f32 %v13450_v39, 0.0  ;;  %v17675_v23 = vsel %vm15801_vm8, 4294967295, %v17674_v23  ;;  %vm17677_vm0 = vcmp.lt.s32.totalorder %v15688_v11, 0  ;;  %v4422_v25 = vshrl.u32 %v15707_v37, 4 }
 0x33d   : > { %vm15809_vm13 = vmand %vm17677_vm0, %vm17676_vm3  ;;  %v15815_v59 = vmul.u32.u64.low 3817748708, %v15713_v45  ;;  %v15816_v24 = vmul.u32.u64.high 3817748708, %v15713_v45, %v15815_v59  ;;  %v4105_v47 = vmax.f32 %v13451_v49, 0.0  ;;  %v12899_v52 = vpop.f32.mrb[6].mxu0  ;;  %vm17681_vm6 = vcmp.lt.s32.totalorder %v15703_v26, 0 }
 0x33e   : > { %vm15822_vm8 = vmand %vm17681_vm6, %vm17680_vm12  ;;  %v4434_v39 = vmul.u32 18, %v4433_v42  ;;  %v15827_v3 = vmul.u32.u64.low 3817748708, %v15716_v12  ;;  %v15828_v13 = vmul.u32.u64.high 3817748708, %v15716_v12, %v15827_v3  ;;  %v4863_v37 = vsel %vm15680_vm2, %v4106_v9, 0.0  ;;  %v3916_v49 = vpop.f32.mrb[7].mxu0  ;;  %v17723_v12 = vld [vmem:[#allocation6_spill] sm:$0xff] }
 0x33f   : > { %v13452_v22 = vadd.f32 %v12899_v52, %v15624_v5  ;;  %vm17684_vm3 = vcmp.ne.s32.totalorder %v15710_v53, 0  ;;  %vm17685_vm0 = vcmp.lt.s32.totalorder %v15710_v53, 0  ;;  %v17686_v42 = vmov 0  ;;  %v4947_v52 = vld [vmem:[#allocation2 + $0x10] sm:$0xff]  ;;  %v4948_v3 = vld [vmem:[#allocation2 + $0x18] sm:$0xff] }
 0x340   : > { %vm15841_vm12 = vmand %vm17685_vm0, %vm17684_vm3  ;;  %v4455_v59 = vshrl.u32 %v15723_v40, 4  ;;  %vm17688_vm6 = vcmask 64512   ;;  %v4862_v29 = vsel %vm15698_vm9, %v4105_v47, 0.0  ;;  %v13453_v9 = vadd.f32 %v15624_v5, %v3916_v49 }
 0x341   : > { %v17687_v42 = vsel %vm15841_vm12, 4294967295, %v17686_v42  ;;  %4907 = vst.msk [vmem:[#allocation2 + $0x3b] sm:$0xff] %vm17688_vm6, %v4863_v37  ;;  %v17689_v14 = vsel %vm15478_vm10, %v15491_v35, %v15388_v27  ;;  %v4733_v40 = vsel %vm15787_vm1, %v15685_v4, %v15619_v56  ;;  %vm17692_vm9 = vmmov %vm17688_vm6  ;;  %v4108_v47 = vmax.f32 %v13452_v22, 0.0 }
 0x342   : > { %vm15855_vm2 = vcmp.lt.s32.totalorder %v17689_v14, 16  ;;  %4906 = vst.msk [vmem:[#allocation2 + $0x33] sm:$0xff] %vm17692_vm9, %v4862_v29  ;;  %vm17693_vm3 = vmmov %vm17688_vm6  ;;  %v17694_v27 = vsel %vm15497_vm11, %v15504_v28, %v15405_v60  ;;  %v4732_v35 = vsel %vm15809_vm13, %v15746_v16, %v15688_v11  ;;  %v4423_v37 = vmul.u32 18, %v4422_v25  ;;  %v12902_v14 = vpop.f32.mrb[8].mxu0 }
 0x343   : > { %12947 = vmatprep.mubr.msk.f32.mxu1 %vm17693_vm3, %v4947_v52  ;;  %vm15873_vm10 = vcmp.lt.s32.totalorder %v17694_v27, 16  ;;  %v4444_v49 = vshrl.u32 %v15750_v8, 4  ;;  %v4107_v22 = vmax.f32 %v13453_v9, 0.0  ;;  %vm17697_vm0 = vmmov %vm17693_vm3  ;;  %v4735_v60 = vsel %vm15822_vm8, %v15767_v48, %v15703_v26  ;;  %v3926_v29 = vpop.f32.mrb[9].mxu0  ;;  %v4949_v46 = vld [vmem:[#allocation2 + $0x20] sm:$0xff] }
 0x344   : > { %12948 = vmatmul.mubr.msk.f32.gmra.mrb[2].mxu1 %vm17697_vm0, %v4948_v3  ;;  %v15892_v28 = vsub.s32 %v15596_v20, %v4434_v39  ;;  %v4865_v8 = vsel %vm15734_vm14, %v4108_v47, 0.0  ;;  %v13454_v25 = vadd.f32 %v12902_v14, %v15624_v5  ;;  %v4456_v9 = vmul.u32 18, %v4455_v59  ;;  %vm17698_vm11 = vmmov %vm17697_vm0  ;;  %v4950_v20 = vld [vmem:[#allocation2 + $0x28] sm:$0xff] }
 0x345   : > { %v15898_v52 = vadd.s32 224, %v15124_v15  ;;  %4909 = vst.msk [vmem:[#allocation2 + $0x4b] sm:$0xff] %vm17698_vm11, %v4865_v8  ;;  %v4864_v3 = vsel %vm15741_vm4, %v4107_v22, 0.0  ;;  %v13455_v27 = vadd.f32 %v15624_v5, %v3926_v29  ;;  %v17699_v31 = vsel %vm15510_vm5, %v15515_v63, %v15418_v50  ;;  %vm17702_vm6 = vmmov %vm17697_vm0 }
 0x346   : > { %vm15909_vm14 = vcmp.lt.s32.totalorder %v17699_v31, 16  ;;  %v15914_v59 = vmul.u32.u64.low 3817748708, %v15864_v7  ;;  %v15915_v47 = vmul.u32.u64.high 3817748708, %v15864_v7, %v15914_v59  ;;  %4908 = vst.msk [vmem:[#allocation2 + $0x43] sm:$0xff] %vm17702_vm6, %v4864_v3  ;;  %v4110_v36 = vmax.f32 %v13454_v25, 0.0  ;;  %vm17703_vm4 = vmmov %vm17697_vm0  ;;  %v12905_v25 = vpop.f32.mrb[10].mxu0 }
 0x347   : > { %12950 = vmatprep.mubr.msk.f32.mxu1 %vm17703_vm4, %v4949_v46  ;;  %vm17704_vm9 = vnez %v17624_v0  ;;  %v15929_v63 = vsub.s32 %v15658_v43, %v4423_v37  ;;  %v4445_v22 = vmul.u32 18, %v4444_v49  ;;  %v15932_v14 = vadd.s32 248, %v15124_v15  ;;  %vm17708_vm5 = vmmov %vm17697_vm0  ;;  %v3936_v37 = vpop.f32.mrb[11].mxu0 }
 0x348   : > { %v17705_v62 = vsel %vm17704_vm9, %v15528_v10, %v15421_v2  ;;  %v4109_v8 = vmax.f32 %v13455_v27, 0.0  ;;  %12951 = vmatmul.mubr.msk.f32.gmra.mrb[4].mxu1 %vm17708_vm5, %v4950_v20  ;;  %v4477_v0 = vshrl.u32 %v15816_v24, 4  ;;  %v4466_v2 = vshrl.u32 %v15828_v13, 4  ;;  %vm17709_vm6 = vmmov %vm17697_vm0 }
 0x349   : > { %vm15924_vm3 = vcmp.lt.s32.totalorder %v17705_v62, 16  ;;  %v4867_v10 = vsel %vm15779_vm15, %v4110_v36, 0.0  ;;  %v13456_v43 = vadd.f32 %v12905_v25, %v15624_v5  ;;  %v15943_v49 = vsub.s32 %v15672_v58, %v4456_v9  ;;  %v4951_v29 = vld [vmem:[#allocation2 + $0x30] sm:$0xff]  ;;  %v4952_v13 = vld [vmem:[#allocation2 + $0x38] sm:$0xff]  ;;  %vm17715_vm5 = vmmov %vm17697_vm0  ;;  %v12908_v20 = vpop.f32.mrb[12].mxu0 }
 0x34a   : > { %4911 = vst.msk [vmem:[#allocation2 + $0x5b] sm:$0xff] %vm17709_vm6, %v4867_v10  ;;  %vm17710_vm4 = vnez %v17675_v23  ;;  %v13457_v24 = vadd.f32 %v15624_v5, %v3936_v37  ;;  %vm17711_vm9 = vnez %v17629_v54  ;;  %v15959_v58 = vadd.s32 18, %v15892_v28  ;;  %vm17716_vm6 = vmmov %vm17697_vm0  ;;  %v3946_v36 = vpop.f32.mrb[13].mxu0 }
 0x34b   : > { %v4866_v46 = vsel %vm17710_vm4, %v4109_v8, 0.0  ;;  %v17712_v55 = vsel %vm17711_vm9, %v15531_v17, %v15438_v6  ;;  %v15962_v9 = vadd.s32 240, %v15124_v15  ;;  %v4112_v23 = vmax.f32 %v13456_v43, 0.0  ;;  %12953 = vmatprep.mubr.msk.f32.mxu1 %vm17716_vm6, %v4951_v29 }
 0x34c   : > { %vm15954_vm15 = vcmp.lt.s32.totalorder %v17712_v55, 16  ;;  %4910 = vst.msk [vmem:[#allocation2 + $0x53] sm:$0xff] %vm17715_vm5, %v4866_v46  ;;  %vm17717_vm4 = vnez %v17634_v44  ;;  %v15978_v17 = vsub.s32 %v15691_v57, %v4445_v22  ;;  %v4111_v27 = vmax.f32 %v13457_v24, 0.0  ;;  %vm17721_vm5 = vmmov %vm17697_vm0 }
 0x34d   : > { %v17718_v54 = vsel %vm17717_vm4, %v15534_v32, %v15454_v18  ;;  %12954 = vmatmul.mubr.msk.f32.gmra.mrb[6].mxu1 %vm17721_vm5, %v4952_v13  ;;  %v15982_v44 = vadd.s32 18, %v15929_v63  ;;  %v4478_v31 = vmul.u32 18, %v4477_v0  ;;  %v4467_v32 = vmul.u32 18, %v4466_v2  ;;  %v4953_v22 = vld [vmem:[#allocation2 + $0x40] sm:$0xff]  ;;  %v4954_v8 = vld [vmem:[#allocation2 + $0x48] sm:$0xff] }
 0x34e   : > { %vm15971_vm9 = vcmp.lt.s32.totalorder %v17718_v54, 16  ;;  %v4869_v18 = vsel %vm15855_vm2, %v4112_v23, 0.0  ;;  %v13458_v59 = vadd.f32 %v12908_v20, %v15624_v5  ;;  %v4868_v57 = vsel %vm15873_vm10, %v4111_v27, 0.0  ;;  %vm17731_vm10 = vmmov %vm17698_vm11 }
 0x34f   : > { %4913 = vst.msk [vmem:[#allocation2 + $0x6b] sm:$0xff] %vm17697_vm0, %v4869_v18  ;;  %v13459_v62 = vadd.f32 %v15624_v5, %v3946_v36  ;;  %vm17722_vm5 = vnez %v17636_v19  ;;  %v17725_v0 = vmov 0  ;;  %vm17727_vm4 = vcmp.ne.s32.totalorder %v15892_v28, 0 }
 0x350   : > { %v17724_v25 = vsel %vm17722_vm5, %v15592_v51, %v17723_v12  ;;  %vm17728_vm0 = vcmp.lt.s32.totalorder %v15892_v28, 0  ;;  %v16011_v2 = vmul.u32.u64.low 3817748708, %v15898_v52  ;;  %v16012_v10 = vmul.u32.u64.high 3817748708, %v15898_v52, %v16011_v2  ;;  %4912 = vst.msk [vmem:[#allocation2 + $0x63] sm:$0xff] %vm17731_vm10, %v4868_v57  ;;  %vm17732_vm5 = vmmov %vm17731_vm10 }
 0x351   : > { %vm15998_vm2 = vcmp.lt.s32.totalorder %v17724_v25, 16  ;;  %vm16006_vm6 = vmand %vm17728_vm0, %vm17727_vm4  ;;  %v4114_v19 = vmax.f32 %v13458_v59, 0.0  ;;  %12956 = vmatprep.mubr.msk.f32.mxu1 %vm17732_vm5, %v4953_v22  ;;  %v17733_v51 = vsel %vm15762_vm7, %v15655_v41, %v15554_v21  ;;  %v17734_v43 = vmov 0  ;;  %v12911_v41 = vpop.f32.mrb[14].mxu0 }
 0x352   : > { %v17726_v0 = vsel %vm15998_vm2, 4294967295, %v17725_v0  ;;  %vm16021_vm11 = vcmp.lt.s32.totalorder %v17733_v51, 16  ;;  %vm17736_vm4 = vcmp.ne.s32.totalorder %v15929_v63, 0  ;;  %vm17737_vm0 = vcmp.lt.s32.totalorder %v15929_v63, 0  ;;  %v3956_v54 = vpop.f32.mrb[15].mxu0 }
 0x353   : > { %v17735_v43 = vsel %vm16021_vm11, 4294967295, %v17734_v43  ;;  %vm16029_vm2 = vmand %vm17737_vm0, %vm17736_vm4  ;;  %v16034_v46 = vadd.s32 18, %v15943_v49  ;;  %vm4594_vm10 = vcmp.ne.s32.totalorder %v15978_v17, 0  ;;  %vm4630_vm5 = vcmp.lt.s32.totalorder %v15978_v17, 0  ;;  %v4955_v39 = vld [vmem:[#allocation2 + $0x50] sm:$0xff]  ;;  %v4956_v59 = vld [vmem:[#allocation2 + $0x58] sm:$0xff] }
 0x354   : > { %v4113_v21 = vmax.f32 %v13459_v62, 0.0  ;;  %vm17740_vm7 = vcmask 64512   ;;  %vm17741_vm11 = vcmp.ne.s32.totalorder %v15943_v49, 0  ;;  %vm17742_vm12 = vcmp.lt.s32.totalorder %v15943_v49, 0  ;;  %v12914_v57 = vpop.f32.mrb[16].mxu0 }
 0x355   : > { %12957 = vmatmul.mubr.msk.f32.gmra.mrb[8].mxu1 %vm17740_vm7, %v4954_v8  ;;  %vm16043_vm8 = vmand %vm17742_vm12, %vm17741_vm11  ;;  %v4499_v24 = vshrl.u32 %v15915_v47, 4  ;;  %v16049_v29 = vmul.u32.u64.low 3817748708, %v15932_v14  ;;  %v16050_v13 = vmul.u32.u64.high 3817748708, %v15932_v14, %v16049_v29  ;;  %v4871_v55 = vsel %vm15909_vm14, %v4114_v19, 0.0  ;;  %v3966_v62 = vpop.f32.mrb[17].mxu0 }
 0x356   : > { %v13460_v23 = vadd.f32 %v12911_v41, %v15624_v5  ;;  %v4737_v27 = vsel %vm16006_vm6, %v15959_v58, %v15892_v28  ;;  %v16060_v20 = vadd.s32 18, %v15978_v17  ;;  %vm17745_vm12 = vmmov %vm17740_vm7  ;;  %v4870_v47 = vsel %vm15924_vm3, %v4113_v21, 0.0  ;;  %v17754_v58 = vld [vmem:[#allocation7_spill] sm:$0xff]  ;;  %v12917_v51 = vpop.f32.mrb[18].mxu0 }
 0x357   : > { %4915 = vst.msk [vmem:[#allocation2 + $0x7b] sm:$0xff] %vm17745_vm12, %v4871_v55  ;;  %v13461_v18 = vadd.f32 %v15624_v5, %v3956_v54  ;;  %vm16071_vm14 = vcmp.lt.s32.totalorder %v4733_v40, 16  ;;  %vm16079_vm11 = vmand %vm4630_vm5, %vm4594_vm10  ;;  %v16084_v50 = vsub.s32 %v15713_v45, %v4478_v31  ;;  %v16087_v61 = vadd.s32 264, %v15124_v15  ;;  %v4957_v3 = vld [vmem:[#allocation2 + $0x60] sm:$0xff]  ;;  %v4958_v25 = vld [vmem:[#allocation2 + $0x68] sm:$0xff]  ;;  %v3976_v37 = vpop.f32.mrb[19].mxu0 }
 0x358   : > { %vm17750_vm3 = vmmov %vm17740_vm7  ;;  %v4116_v56 = vmax.f32 %v13460_v23, 0.0  ;;  %vm16096_vm6 = vcmp.lt.s32.totalorder %v4732_v35, 16  ;;  %v4736_v45 = vsel %vm16029_vm2, %v15982_v44, %v15929_v63  ;;  %v4739_v40 = vsel %vm16043_vm8, %v16034_v46, %v15943_v49 }
 0x359   : > { %4914 = vst.msk [vmem:[#allocation2 + $0x73] sm:$0xff] %vm17750_vm3, %v4870_v47  ;;  %vm17751_vm1 = vmmov %vm17750_vm3  ;;  %v16109_v31 = vsub.s32 %v17754_v58, %v4467_v32  ;;  %v4115_v34 = vmax.f32 %v13461_v18, 0.0  ;;  %v4500_v11 = vmul.u32 18, %v4499_v24  ;;  %v13462_v44 = vadd.f32 %v12914_v57, %v15624_v5 }
 0x35a   : > { %12959 = vmatprep.mubr.msk.f32.mxu1 %vm17751_vm1, %v4955_v39  ;;  %vm17755_vm13 = vmmov %vm17751_vm1  ;;  %v16113_v16 = vmul.u32.u64.low 3817748708, %v15962_v9  ;;  %v16114_v35 = vmul.u32.u64.high 3817748708, %v15962_v9, %v16113_v16  ;;  %v4873_v63 = vsel %vm15954_vm15, %v4116_v56, 0.0  ;;  %v4738_v32 = vsel %vm16079_vm11, %v16060_v20, %v15978_v17 }
 0x35b   : > { %12960 = vmatmul.mubr.msk.f32.gmra.mrb[10].mxu1 %vm17755_vm13, %v4956_v59  ;;  %v16124_v22 = vadd.s32 256, %v15124_v15  ;;  %vm17756_vm2 = vmmov %vm17751_vm1  ;;  %v4872_v8 = vsel %vm15971_vm9, %v4115_v34, 0.0  ;;  %v13463_v12 = vadd.f32 %v15624_v5, %v3966_v62  ;;  %vm16135_vm4 = vcmp.lt.s32.totalorder %v4735_v60, 16  ;;  %v12920_v59 = vpop.f32.mrb[20].mxu0 }
 0x35c   : > { %4917 = vst.msk [vmem:[#allocation2 + $0x8b] sm:$0xff] %vm17756_vm2, %v4873_v63  ;;  %vm4597_vm0 = vcmp.ne.s32.totalorder %v16084_v50, 0  ;;  %vm4633_vm10 = vcmp.lt.s32.totalorder %v16084_v50, 0  ;;  %vm17760_vm5 = vmmov %vm17751_vm1  ;;  %v4118_v6 = vmax.f32 %v13462_v44, 0.0  ;;  %vm17762_vm7 = vnez %v17687_v42  ;;  %v3986_v63 = vpop.f32.mrb[21].mxu0 }
 0x35d   : > { %4916 = vst.msk [vmem:[#allocation2 + $0x83] sm:$0xff] %vm17760_vm5, %v4872_v8  ;;  %vm17761_vm9 = vmmov %vm17751_vm1  ;;  %v17763_v38 = vsel %vm17762_vm7, %v15793_v1, %v15710_v53  ;;  %v4488_v48 = vshrl.u32 %v16012_v10, 4  ;;  %v16154_v60 = vmul.u32.u64.low 3817748708, %v16087_v61  ;;  %v16155_v2 = vmul.u32.u64.high 3817748708, %v16087_v61, %v16154_v60 }
 0x35e   : > { %12962 = vmatprep.mubr.msk.f32.mxu1 %vm17761_vm9, %v4957_v3  ;;  %vm16148_vm12 = vcmp.lt.s32.totalorder %v17763_v38, 16  ;;  %v4117_v19 = vmax.f32 %v13463_v12, 0.0  ;;  %vm17766_vm3 = vmmov %vm17751_vm1  ;;  %vm4596_vm1 = vcmp.ne.s32.totalorder %v16109_v31, 0  ;;  %v4521_v42 = vshrl.u32 %v16050_v13, 4  ;;  %v12923_v38 = vpop.f32.mrb[22].mxu0 }
 0x35f   : > { %12963 = vmatmul.mubr.msk.f32.gmra.mrb[12].mxu1 %vm17766_vm3, %v4958_v25  ;;  %v16161_v53 = vadd.s32 280, %v15124_v15  ;;  %vm17767_vm13 = vnez %v17726_v0  ;;  %v13464_v10 = vadd.f32 %v12917_v51, %v15624_v5  ;;  %vm17768_vm15 = vnez %v17735_v43  ;;  %vm17771_vm7 = vmmov %vm17756_vm2 }
 0x360   : > { %v4875_v1 = vsel %vm17767_vm13, %v4118_v6, 0.0  ;;  %v16167_v21 = vmul.u32.u64.low 3817748708, %v16124_v22  ;;  %v16168_v41 = vmul.u32.u64.high 3817748708, %v16124_v22, %v16167_v21  ;;  %v4874_v24 = vsel %vm17768_vm15, %v4117_v19, 0.0  ;;  %v4959_v13 = vld [vmem:[#allocation2 + $0x70] sm:$0xff]  ;;  %v4960_v55 = vld [vmem:[#allocation2 + $0x78] sm:$0xff]  ;;  %vm17772_vm3 = vmmov %vm17756_vm2 }
 0x361   : > { %4919 = vst.msk [vmem:[#allocation2 + $0x9b] sm:$0xff] %vm17756_vm2, %v4875_v1  ;;  %v13465_v29 = vadd.f32 %v15624_v5, %v3976_v37  ;;  %vm16174_vm5 = vcmp.lt.s32.totalorder %v4737_v27, 16  ;;  %vm4632_vm9 = vcmp.lt.s32.totalorder %v16109_v31, 0  ;;  %v16180_v0 = vadd.s32 272, %v15124_v15  ;;  %12965 = vmatprep.mubr.msk.f32.mxu1 %vm17772_vm3, %v4959_v13  ;;  %vm16199_vm15 = vmand %vm4633_vm10, %vm4597_vm0 }
 0x362   : > { %4918 = vst.msk [vmem:[#allocation2 + $0x93] sm:$0xff] %vm17771_vm7, %v4874_v24  ;;  %v4120_v54 = vmax.f32 %v13464_v10, 0.0  ;;  %vm16184_vm13 = vcmp.lt.s32.totalorder %v4736_v45, 16  ;;  %v16189_v47 = vadd.s32 18, %v16084_v50  ;;  %v16192_v27 = vadd.s32 18, %v16109_v31  ;;  %vm16214_vm0 = vmand %vm4632_vm9, %vm4596_vm1 }
 0x363   : > { %v4489_v18 = vmul.u32 18, %v4488_v48  ;;  %v4119_v39 = vmax.f32 %v13465_v29, 0.0  ;;  %12966 = vmatmul.mubr.msk.f32.gmra.mrb[14].mxu1 %vm17756_vm2, %v4960_v55  ;;  %v16204_v45 = vsub.s32 %v15864_v7, %v4500_v11  ;;  %v4522_v58 = vmul.u32 18, %v4521_v42  ;;  %vm17779_vm10 = vmmov %vm17756_vm2 }
 0x364   : > { %v4510_v34 = vshrl.u32 %v16114_v35, 4  ;;  %v4877_v57 = vsel %vm16071_vm14, %v4120_v54, 0.0  ;;  %v13466_v16 = vadd.f32 %v12920_v59, %v15624_v5  ;;  %v13467_v35 = vadd.f32 %v15624_v5, %v3986_v63  ;;  %v4961_v62 = vld [vmem:[#allocation2 + $0x80] sm:$0xff]  ;;  %v4962_v8 = vld [vmem:[#allocation2 + $0x88] sm:$0xff]  ;;  %vm17782_vm1 = vmmov %vm17756_vm2 }
 0x365   : > { %v16219_v7 = vmul.u32.u64.low 3817748708, %v16161_v53  ;;  %v16220_v11 = vmul.u32.u64.high 3817748708, %v16161_v53, %v16219_v7  ;;  %4921 = vst.msk [vmem:[#allocation2 + $0xab] sm:$0xff] %vm17779_vm10, %v4877_v57  ;;  %v4876_v36 = vsel %vm16096_vm6, %v4119_v39, 0.0  ;;  %vm16231_vm14 = vcmp.lt.s32.totalorder %v4739_v40, 16  ;;  %vm17783_vm6 = vmmov %vm17782_vm1 }
 0x366   : > { %v16236_v3 = vmul.u32.u64.low 3817748708, %v16180_v0  ;;  %v16237_v25 = vmul.u32.u64.high 3817748708, %v16180_v0, %v16236_v3  ;;  %4920 = vst.msk [vmem:[#allocation2 + $0xa3] sm:$0xff] %vm17782_vm1, %v4876_v36  ;;  %v4122_v4 = vmax.f32 %v13466_v16, 0.0  ;;  %12968 = vmatprep.mubr.msk.f32.mxu1 %vm17783_vm6, %v4961_v62  ;;  %vm16246_vm9 = vcmp.lt.s32.totalorder %v4738_v32, 16  ;;  %vm17786_vm8 = vmmov %vm17782_vm1  ;;  %v3996_v32 = vpop.f32.mrb[23].mxu0 }
 0x367   : > { %v4741_v46 = vsel %vm16199_vm15, %v16189_v47, %v16084_v50  ;;  %v16255_v33 = vsub.s32 %v15898_v52, %v4489_v18  ;;  %v4543_v40 = vshrl.u32 %v16155_v2, 4  ;;  %v4121_v6 = vmax.f32 %v13467_v35, 0.0  ;;  %12969 = vmatmul.mubr.msk.f32.gmra.mrb[16].mxu1 %vm17786_vm8, %v4962_v8  ;;  %vm17787_vm7 = vmmov %vm17782_vm1  ;;  %v12926_v42 = vpop.f32.mrb[24].mxu0 }
 0x368   : > { %v4740_v17 = vsel %vm16214_vm0, %v16192_v27, %v16109_v31  ;;  %v16264_v20 = vsub.s32 %v15932_v14, %v4522_v58  ;;  %v4511_v28 = vmul.u32 18, %v4510_v34  ;;  %v4879_v50 = vsel %vm16135_vm4, %v4122_v4, 0.0  ;;  %vm17788_vm4 = vmmov %vm17782_vm1  ;;  %v4006_v21 = vpop.f32.mrb[25].mxu0 }
 0x369   : > { %v13468_v52 = vadd.f32 %v12923_v38, %v15624_v5  ;;  %vm4599_vm11 = vcmp.ne.s32.totalorder %v16204_v45, 0  ;;  %v4532_v48 = vshrl.u32 %v16168_v41, 4  ;;  %4923 = vst.msk [vmem:[#allocation2 + $0xbb] sm:$0xff] %vm17787_vm7, %v4879_v50  ;;  %v4878_v60 = vsel %vm16148_vm12, %v4121_v6, 0.0  ;;  %v4963_v14 = vld [vmem:[#allocation2 + $0x90] sm:$0xff]  ;;  %v4964_v2 = vld [vmem:[#allocation2 + $0x98] sm:$0xff]  ;;  %vm17789_vm2 = vmmov %vm17782_vm1 }
 0x36a   : > { %v13469_v31 = vadd.f32 %v15624_v5, %v3996_v32  ;;  %vm4635_vm3 = vcmp.lt.s32.totalorder %v16204_v45, 0  ;;  %v4707_v30 = vadd.s32 18, %v16204_v45  ;;  %4922 = vst.msk [vmem:[#allocation2 + $0xb3] sm:$0xff] %vm17788_vm4, %v4878_v60  ;;  %12971 = vmatprep.mubr.msk.f32.mxu1 %vm17789_vm2, %v4963_v14  ;;  %vm4598_vm15 = vcmp.ne.s32.totalorder %v16255_v33, 0  ;;  %vm17790_vm12 = vmmov %vm17782_vm1  ;;  %v12929_v58 = vpop.f32.mrb[26].mxu0  ;;  %v5373_v38 = vld [vmem:[#allocation2 + $0x11] sm:$0xff] }
 0x36b   : > { %v4124_v19 = vmax.f32 %v13468_v52, 0.0  ;;  %vm4634_vm0 = vcmp.lt.s32.totalorder %v16255_v33, 0  ;;  %v4544_v51 = vmul.u32 18, %v4543_v40  ;;  %12972 = vmatmul.mubr.msk.f32.gmra.mrb[18].mxu1 %vm17790_vm12, %v4964_v2  ;;  %vm4601_vm10 = vcmp.ne.s32.totalorder %v16264_v20, 0  ;;  %vm16294_vm6 = vmand %vm4635_vm3, %vm4599_vm11  ;;  %v4016_v7 = vpop.f32.mrb[27].mxu0  ;;  %v5384_v2 = vld [vmem:[#allocation2 + $0x69] sm:$0xff] }
 0x36c   : > { %v4123_v26 = vmax.f32 %v13469_v31, 0.0  ;;  %vm4637_vm1 = vcmp.lt.s32.totalorder %v16264_v20, 0  ;;  %v16285_v1 = vsub.s32 %v15962_v9, %v4511_v28  ;;  %v13470_v37 = vadd.f32 %v12926_v42, %v15624_v5  ;;  %vm17793_vm8 = vmmov %vm17789_vm2  ;;  %v12932_v49 = vpop.f32.mrb[28].mxu0 }
 0x36d   : > { %v4881_v10 = vsel %vm16174_vm5, %v4124_v19, 0.0  ;;  %v4533_v24 = vmul.u32 18, %v4532_v48  ;;  %v4565_v29 = vshrl.u32 %v16220_v11, 4  ;;  %v13471_v13 = vadd.f32 %v15624_v5, %v4006_v21  ;;  %v4965_v55 = vld [vmem:[#allocation2 + $0xa0] sm:$0xff]  ;;  %v4966_v54 = vld [vmem:[#allocation2 + $0xa8] sm:$0xff]  ;;  %vm17796_vm11 = vmmov %vm17789_vm2 }
 0x36e   : > { %4925 = vst.msk [vmem:[#allocation2 + $0xcb] sm:$0xff] %vm17793_vm8, %v4881_v10  ;;  %v4880_v9 = vsel %vm16184_vm13, %v4123_v26, 0.0  ;;  %vm16303_vm5 = vcmp.lt.s32.totalorder %v4741_v46, 16  ;;  %v4554_v47 = vshrl.u32 %v16237_v25, 4  ;;  %v4126_v27 = vmax.f32 %v13470_v37, 0.0  ;;  %vm17797_vm7 = vmmov %vm17789_vm2 }
 0x36f   : > { %4924 = vst.msk [vmem:[#allocation2 + $0xc3] sm:$0xff] %vm17796_vm11, %v4880_v9  ;;  %12974 = vmatprep.mubr.msk.f32.mxu1 %vm17797_vm7, %v4965_v55  ;;  %vm16310_vm3 = vcmp.lt.s32.totalorder %v4740_v17, 16  ;;  %vm16318_vm13 = vmand %vm4634_vm0, %vm4598_vm15  ;;  %v4706_v39 = vadd.s32 18, %v16255_v33  ;;  %v4709_v59 = vadd.s32 18, %v16264_v20  ;;  %v4125_v56 = vmax.f32 %v13471_v13, 0.0 }
 0x370   : > { %vm17802_vm4 = vmmov %vm17789_vm2  ;;  %v4743_v34 = vsel %vm16294_vm6, %v4707_v30, %v16204_v45  ;;  %vm4600_vm15 = vcmp.ne.s32.totalorder %v16285_v1, 0  ;;  %v16338_v16 = vsub.s32 %v16087_v61, %v4544_v51  ;;  %v4883_v63 = vsel %vm16231_vm14, %v4126_v27, 0.0  ;;  %v5386_v30 = vld [vmem:[#allocation2 + $0x79] sm:$0xff] }
 0x371   : > { %12975 = vmatmul.mubr.msk.f32.gmra.mrb[20].mxu1 %vm17802_vm4, %v4966_v54  ;;  %vm16332_vm2 = vmand %vm4637_vm1, %vm4601_vm10  ;;  %v13472_v44 = vadd.f32 %v12929_v58, %v15624_v5  ;;  %v16344_v45 = vsub.s32 %v16124_v22, %v4533_v24  ;;  %v4566_v11 = vmul.u32 18, %v4565_v29  ;;  %v4882_v36 = vsel %vm16246_vm9, %v4125_v56, 0.0  ;;  %v4967_v62 = vld [vmem:[#allocation2 + $0xb0] sm:$0xff]  ;;  %v4968_v61 = vld [vmem:[#allocation2 + $0xb8] sm:$0xff] }
 0x372   : > { %vm17805_vm0 = vmmov %vm17802_vm4  ;;  %v13473_v35 = vadd.f32 %v15624_v5, %v4016_v7  ;;  %vm4636_vm12 = vcmp.lt.s32.totalorder %v16285_v1, 0  ;;  %v4555_v8 = vmul.u32 18, %v4554_v47  ;;  %vm16353_vm1 = vcmp.lt.s32.totalorder %v4743_v34, 16 }
 0x373   : > { %4927 = vst.msk [vmem:[#allocation2 + $0xdb] sm:$0xff] %vm17805_vm0, %v4883_v63  ;;  %vm17806_vm14 = vmmov %vm17805_vm0  ;;  %v4128_v12 = vmax.f32 %v13472_v44, 0.0  ;;  %v4742_v3 = vsel %vm16318_vm13, %v4706_v39, %v16255_v33  ;;  %v4745_v25 = vsel %vm16332_vm2, %v4709_v59, %v16264_v20  ;;  %v4708_v46 = vadd.s32 18, %v16285_v1  ;;  %v4026_v33 = vpop.f32.mrb[29].mxu0 }
 0x374   : > { %4926 = vst.msk [vmem:[#allocation2 + $0xd3] sm:$0xff] %vm17806_vm14, %v4882_v36  ;;  %vm17807_vm10 = vmmov %vm17805_vm0  ;;  %v4127_v4 = vmax.f32 %v13473_v35, 0.0  ;;  %vm4603_vm6 = vcmp.ne.s32.totalorder %v16338_v16, 0  ;;  %vm4639_vm8 = vcmp.lt.s32.totalorder %v16338_v16, 0  ;;  %v13474_v6 = vadd.f32 %v12932_v49, %v15624_v5  ;;  %v12935_v14 = vpop.f32.mrb[30].mxu0 }
 0x375   : > { %12977 = vmatprep.mubr.msk.f32.mxu1 %vm17807_vm10, %v4967_v62  ;;  %vm17810_vm9 = vmmov %vm17805_vm0  ;;  %v4885_v40 = vsel %vm16303_vm5, %v4128_v12, 0.0  ;;  %vm4602_vm7 = vcmp.ne.s32.totalorder %v16344_v45, 0  ;;  %v16380_v17 = vsub.s32 %v16161_v53, %v4566_v11  ;;  %v13475_v28 = vadd.f32 %v15624_v5, %v4026_v33  ;;  %v4036_v42 = vpop.f32.mrb[31].mxu0  ;;  %v16490_v33 = vld [vmem:[%s17557_s3 + $0x18] sm:$0xff]  ;;  %v5380_v53 = vld [vmem:[#allocation2 + $0x49] sm:$0xff] }
 0x376   : > { %12978 = vmatmul.mubr.msk.f32.gmra.mrb[22].mxu1 %vm17810_vm9, %v4968_v61  ;;  %vm16374_vm11 = vmand %vm4636_vm12, %vm4600_vm15  ;;  %v4884_v20 = vsel %vm16310_vm3, %v4127_v4, 0.0  ;;  %v4969_v50 = vld [vmem:[#allocation2 + $0xc0] sm:$0xff]  ;;  %v4970_v52 = vld [vmem:[#allocation2 + $0xc8] sm:$0xff]  ;;  %vm4638_vm5 = vcmp.lt.s32.totalorder %v16344_v45, 0  ;;  %v16388_v32 = vsub.s32 %v16180_v0, %v4555_v8  ;;  %v4130_v48 = vmax.f32 %v13474_v6, 0.0  ;;  %v12938_v55 = vpop.f32.mrb[32].mxu0 }
 0x377   : > { %vm17813_vm13 = vmmov %vm17805_vm0  ;;  %vm16391_vm2 = vcmp.lt.s32.totalorder %v4742_v3, 16  ;;  %v4711_v60 = vadd.s32 18, %v16338_v16  ;;  %v4129_v31 = vmax.f32 %v13475_v28, 0.0  ;;  %vm16397_vm3 = vcmp.lt.s32.totalorder %v4745_v25, 16  ;;  %v4046_v43 = vpop.f32.mrb[33].mxu0  ;;  %v5372_v6 = vld [vmem:[#allocation2 + $0x9] sm:$0xff] }
 0x378   : > { %4929 = vst.msk [vmem:[#allocation2 + $0xeb] sm:$0xff] %vm17813_vm13, %v4885_v40  ;;  %vm17814_vm4 = vmmov %vm17805_vm0  ;;  %v4744_v0 = vsel %vm16374_vm11, %v4708_v46, %v16285_v1  ;;  %v4710_v19 = vadd.s32 18, %v16344_v45  ;;  %v4887_v51 = vsel %vm16353_vm1, %v4130_v48, 0.0  ;;  %v13476_v26 = vadd.f32 %v12935_v14, %v15624_v5  ;;  %v12941_v44 = vpop.f32.mrb[34].mxu0  ;;  %v5371_v40 = vld [vmem:[#allocation2 + $0x1] sm:$0xff] }
 0x379   : > { %4928 = vst.msk [vmem:[#allocation2 + $0xe3] sm:$0xff] %vm17814_vm4, %v4884_v20  ;;  %vm17817_vm15 = vmmov %vm17805_vm0  ;;  %vm4605_vm10 = vcmp.ne.s32.totalorder %v16380_v17, 0  ;;  %vm4641_vm9 = vcmp.lt.s32.totalorder %v16380_v17, 0  ;;  %v4886_v10 = vsel %vm16391_vm2, %v4129_v31, 0.0  ;;  %v13477_v37 = vadd.f32 %v15624_v5, %v4036_v42  ;;  %v4056_v36 = vpop.f32.mrb[35].mxu0  ;;  %v5374_v20 = vld [vmem:[#allocation2 + $0x19] sm:$0xff] }
 0x37a   : > { %12980 = vmatprep.mubr.msk.f32.mxu1 %vm17817_vm15, %v4969_v50  ;;  %vm16409_vm12 = vmand %vm4639_vm8, %vm4603_vm6  ;;  %vm4604_vm1 = vcmp.ne.s32.totalorder %v16388_v32, 0  ;;  %vm4640_vm8 = vcmp.lt.s32.totalorder %v16388_v32, 0  ;;  %v4132_v24 = vmax.f32 %v13476_v26, 0.0  ;;  %v4713_v9 = vadd.s32 18, %v16380_v17  ;;  %v5375_v28 = vld [vmem:[#allocation2 + $0x21] sm:$0xff]  ;;  %v5376_v50 = vld [vmem:[#allocation2 + $0x29] sm:$0xff] }
 0x37b   : > { %12981 = vmatmul.mubr.msk.f32.gmra.mrb[24].mxu1 %vm17805_vm0, %v4970_v52  ;;  %vm16421_vm14 = vmand %vm4638_vm5, %vm4602_vm7  ;;  %v4971_v21 = vld [vmem:[#allocation2 + $0xd0] sm:$0xff]  ;;  %v4972_v41 = vld [vmem:[#allocation2 + $0xd8] sm:$0xff]  ;;  %vm4780_vm7 = vcmp.lt.s32.totalorder %v4744_v0, 16  ;;  %v4747_v29 = vsel %vm16409_vm12, %v4711_v60, %v16338_v16  ;;  %v4131_v13 = vmax.f32 %v13477_v37, 0.0  ;;  %v4712_v47 = vadd.s32 18, %v16388_v32 }
 0x37c   : > { %vm17824_vm6 = vmmov %vm17805_vm0  ;;  %v4746_v23 = vsel %vm16421_vm14, %v4710_v19, %v16344_v45  ;;  %v4889_v27 = vsel %vm16397_vm3, %v4132_v24, 0.0  ;;  %v13478_v18 = vadd.f32 %v12938_v55, %v15624_v5  ;;  %v13479_v56 = vadd.f32 %v15624_v5, %v4046_v43  ;;  %v5377_v52 = vld [vmem:[#allocation2 + $0x31] sm:$0xff]  ;;  %v5379_v48 = vld [vmem:[#allocation2 + $0x41] sm:$0xff] }
 0x37d   : > { %4931 = vst.msk [vmem:[#allocation2 + $0xfb] sm:$0xff] %vm17824_vm6, %v4887_v51  ;;  %vm17825_vm11 = vmmov %vm17805_vm0  ;;  %v4888_v59 = vsel %vm4780_vm7, %v4131_v13, 0.0  ;;  %vm4782_vm12 = vcmp.lt.s32.totalorder %v4746_v23, 16  ;;  %v13480_v11 = vadd.f32 %v12941_v44, %v15624_v5  ;;  %v13481_v62 = vadd.f32 %v15624_v5, %v4056_v36  ;;  %v5381_v60 = vld [vmem:[#allocation2 + $0x51] sm:$0xff]  ;;  %v5382_v31 = vld [vmem:[#allocation2 + $0x59] sm:$0xff] }
 0x37e   : > { %4930 = vst.msk [vmem:[#allocation2 + $0xf3] sm:$0xff] %vm17825_vm11, %v4886_v10  ;;  %vm17826_vm13 = vmmov %vm17805_vm0  ;;  %v4134_v57 = vmax.f32 %v13478_v18, 0.0  ;;  %v4133_v63 = vmax.f32 %v13479_v56, 0.0  ;;  %v5383_v14 = vld [vmem:[#allocation2 + $0x61] sm:$0xff]  ;;  %v5385_v0 = vld [vmem:[#allocation2 + $0x71] sm:$0xff] }
 0x37f   : > { %12983 = vmatprep.mubr.msk.f32.mxu1 %vm17826_vm13, %v4971_v21  ;;  %vm17827_vm5 = vmmov %vm17805_vm0  ;;  %v4136_v12 = vmax.f32 %v13480_v11, 0.0  ;;  %v4135_v22 = vmax.f32 %v13481_v62, 0.0  ;;  %v5387_v19 = vld [vmem:[#allocation2 + $0x81] sm:$0xff]  ;;  %v5388_v51 = vld [vmem:[#allocation2 + $0x89] sm:$0xff] }
 0x380   : > { %12984 = vmatmul.mubr.msk.f32.gmra.mrb[26].mxu1 %vm17827_vm5, %v4972_v41  ;;  %vm16447_vm4 = vmand %vm4641_vm9, %vm4605_vm10  ;;  %v4973_v58 = vld [vmem:[#allocation2 + $0xe0] sm:$0xff]  ;;  %v4974_v34 = vld [vmem:[#allocation2 + $0xe8] sm:$0xff]  ;;  %v4890_v35 = vsel %vm4782_vm12, %v4133_v63, 0.0 }
 0x381   : > { %vm16459_vm2 = vmand %vm4640_vm8, %vm4604_vm1  ;;  %v4749_v16 = vsel %vm16447_vm4, %v4713_v9, %v16380_v17  ;;  %v14225_v17 = vld [vmem:[%s17557_s3 + $0x10] sm:$0xff]  ;;  %v5390_v42 = vld [vmem:[#allocation2 + $0x99] sm:$0xff] }
 0x382   : > { %vm17832_vm15 = vmmov %vm17805_vm0  ;;  %vm4783_vm0 = vcmp.lt.s32.totalorder %v4747_v29, 16  ;;  %v4748_v7 = vsel %vm16459_vm2, %v4712_v47, %v16388_v32  ;;  %vm4785_vm6 = vcmp.lt.s32.totalorder %v4749_v16, 16  ;;  %v5378_v32 = vld [vmem:[#allocation2 + $0x39] sm:$0xff]  ;;  %v5389_v26 = vld [vmem:[#allocation2 + $0x91] sm:$0xff] }
 0x383   : > { %4933 = vst.msk [vmem:[#allocation2 + $0x10b] sm:$0xff] %vm17832_vm15, %v4889_v27  ;;  %vm17833_vm3 = vmmov %vm17827_vm5  ;;  %v4891_v45 = vsel %vm4783_vm0, %v4134_v57, 0.0  ;;  %vm4784_vm8 = vcmp.lt.s32.totalorder %v4748_v7, 16  ;;  %v4893_v3 = vsel %vm4785_vm6, %v4136_v12, 0.0  ;;  %v5391_v1 = vld [vmem:[#allocation2 + $0xa1] sm:$0xff]  ;;  %v5392_v10 = vld [vmem:[#allocation2 + $0xa9] sm:$0xff] }
 0x384   : > { %4932 = vst.msk [vmem:[#allocation2 + $0x103] sm:$0xff] %vm17833_vm3, %v4888_v59  ;;  %vm17834_vm14 = vmmov %vm17833_vm3  ;;  %v4892_v25 = vsel %vm4784_vm8, %v4135_v22, 0.0  ;;  %v5393_v37 = vld [vmem:[#allocation2 + $0xb1] sm:$0xff]  ;;  %v5394_v21 = vld [vmem:[#allocation2 + $0xb9] sm:$0xff] }
 0x385   : > { %12986 = vmatprep.mubr.msk.f32.mxu1 %vm17834_vm14, %v4973_v58  ;;  %vm17835_vm10 = vmmov %vm17833_vm3  ;;  %v4975_v61 = vld [vmem:[#allocation2 + $0xf0] sm:$0xff]  ;;  %v4976_v8 = vld [vmem:[#allocation2 + $0xf8] sm:$0xff] }
 0x386   : > { %12987 = vmatmul.mubr.msk.f32.gmra.mrb[28].mxu1 %vm17835_vm10, %v4974_v34  ;;  %vm17836_vm9 = vmmov %vm17833_vm3  ;;  %v5395_v41 = vld [vmem:[#allocation2 + $0xc1] sm:$0xff]  ;;  %v5396_v24 = vld [vmem:[#allocation2 + $0xc9] sm:$0xff] }
 0x387   : > { %4935 = vst.msk [vmem:[#allocation2 + $0x11b] sm:$0xff] %vm17836_vm9, %v4891_v45  ;;  %vm17837_vm1 = vmmov %vm17833_vm3  ;;  %v5397_v29 = vld [vmem:[#allocation2 + $0xd1] sm:$0xff]  ;;  %v5398_v9 = vld [vmem:[#allocation2 + $0xd9] sm:$0xff] }
 0x388   : > { %4934 = vst.msk [vmem:[#allocation2 + $0x113] sm:$0xff] %vm17837_vm1, %v4890_v35  ;;  %vm17838_vm11 = vmmov %vm17837_vm1  ;;  %v5399_v13 = vld [vmem:[#allocation2 + $0xe1] sm:$0xff]  ;;  %v5400_v55 = vld [vmem:[#allocation2 + $0xe9] sm:$0xff] }
 0x389   : > { %12989 = vmatprep.mubr.msk.f32.mxu1 %vm17838_vm11, %v4975_v61  ;;  %vm17839_vm7 = vmmov %vm17837_vm1  ;;  %v5401_v23 = vld [vmem:[#allocation2 + $0xf1] sm:$0xff]  ;;  %v5402_v54 = vld [vmem:[#allocation2 + $0xf9] sm:$0xff] }
 0x38a   : > { %12990 = vmatmul.mubr.msk.f32.gmra.mrb[30].mxu1 %vm17839_vm7, %v4976_v8  ;;  %vm17840_vm13 = vmmov %vm17837_vm1  ;;  %v5798_v43 = vld [vmem:[#allocation2 + $0x2] sm:$0xff]  ;;  %v5799_v59 = vld [vmem:[#allocation2 + $0xa] sm:$0xff] }
 0x38b   : > { %4937 = vst.msk [vmem:[#allocation2 + $0x12b] sm:$0xff] %vm17840_vm13, %v4893_v3  ;;  %v4977_v4 = vld [vmem:[#allocation2 + $0x100] sm:$0xff]  ;;  %v4978_v49 = vld [vmem:[#allocation2 + $0x108] sm:$0xff]  ;;  %vm17841_vm5 = vmmov %vm17837_vm1 }
 0x38c   : > { %4936 = vst.msk [vmem:[#allocation2 + $0x123] sm:$0xff] %vm17841_vm5, %v4892_v25  ;;  %vm17842_vm4 = vmmov %vm17837_vm1  ;;  %v5403_v47 = vld [vmem:[#allocation2 + $0x101] sm:$0xff]  ;;  %v5404_v27 = vld [vmem:[#allocation2 + $0x109] sm:$0xff] }
 0x38d   : > { %12992 = vmatprep.mubr.msk.f32.mxu1 %vm17842_vm4, %v4977_v4  ;;  %vm17843_vm2 = vmmov %vm17837_vm1  ;;  %v16535_v56 = vld [vmem:[%s17557_s3 + $0x20] sm:$0xff]  ;;  %v16538_v58 = vld [vmem:[#allocation2 + $0x12] sm:$0xff] }
 0x38e   : > { %12993 = vmatmul.mubr.msk.f32.gmra.mrb[32].mxu1 %vm17843_vm2, %v4978_v49  ;;  %vm17844_vm15 = vmmov %vm17837_vm1  ;;  %v16544_v34 = vld [vmem:[#allocation2 + $0x1a] sm:$0xff]  ;;  %v16548_v57 = vld [vmem:[#allocation2 + $0x22] sm:$0xff] }
 0x38f   : > { %v4979_v5 = vld [vmem:[#allocation2 + $0x110] sm:$0xff]  ;;  %v4980_v46 = vld [vmem:[#allocation2 + $0x118] sm:$0xff]  ;;  %vm17845_vm0 = vmmov %vm17837_vm1 }
 0x390   : > { %12995 = vmatprep.mubr.msk.f32.mxu1 %vm17844_vm15, %v4979_v5  ;;  %vm17846_vm3 = vmmov %vm17845_vm0  ;;  %v5405_v18 = vld [vmem:[#allocation2 + $0x111] sm:$0xff]  ;;  %v5406_v39 = vld [vmem:[#allocation2 + $0x119] sm:$0xff] }
 0x391   : > { %vm17847_vm12 = vmmov %vm17845_vm0  ;;  %v16552_v16 = vld [vmem:[#allocation2 + $0x2a] sm:$0xff]  ;;  %v16556_v63 = vld [vmem:[#allocation2 + $0x32] sm:$0xff] }
 0x392   : > { %12996 = vmatmul.mubr.msk.f32.gmra.mrb[34].mxu1 %vm17845_vm0, %v4980_v46  ;;  %vm17848_vm14 = vmmov %vm17845_vm0  ;;  %v16560_v44 = vld [vmem:[#allocation2 + $0x3a] sm:$0xff]  ;;  %v16564_v7 = vld [vmem:[#allocation2 + $0x42] sm:$0xff] }
 0x393   : > { %13000 = vmatprep.mubr.msk.f32.mxu1 %vm17846_vm3, %v5371_v40  ;;  %vm17849_vm10 = vmmov %vm17845_vm0  ;;  %v16568_v45 = vld [vmem:[#allocation2 + $0x4a] sm:$0xff]  ;;  %v16572_v11 = vld [vmem:[#allocation2 + $0x52] sm:$0xff] }
 0x394   : > { %vm17850_vm9 = vmmov %vm17845_vm0  ;;  %v5809_v36 = vld [vmem:[#allocation2 + $0x5a] sm:$0xff]  ;;  %v5810_v35 = vld [vmem:[#allocation2 + $0x62] sm:$0xff] }
 0x395   : > { %vm17851_vm6 = vmmov %vm17845_vm0  ;;  %v5811_v62 = vld [vmem:[#allocation2 + $0x6a] sm:$0xff]  ;;  %v5812_v61 = vld [vmem:[#allocation2 + $0x72] sm:$0xff] }
 0x396   : > { %13001 = vmatmul.mubr.msk.f32.vlgmr.msra.gmra.mrb[0].mxu1 %vm17847_vm12, %v5372_v6  ;;  %vm17852_vm1 = vmmov %vm17845_vm0  ;;  %v5813_v8 = vld [vmem:[#allocation2 + $0x7a] sm:$0xff]  ;;  %v5814_v12 = vld [vmem:[#allocation2 + $0x82] sm:$0xff] }
 0x397   : > { %13055 = vmatpush3.msra.mxu1 %v14225_v17  ;;  %13003 = vmatprep.mubr.msk.f32.mxu1 %vm17848_vm14, %v5373_v38  ;;  %vm17853_vm8 = vmmov %vm17845_vm0  ;;  %v5815_v22 = vld [vmem:[#allocation2 + $0x8a] sm:$0xff]  ;;  %v5816_v3 = vld [vmem:[#allocation2 + $0x92] sm:$0xff] }
 0x398   : > { %13110 = vmatprep.subr.mxu1 %v16490_v33  ;;  %vm17854_vm11 = vmmov %vm17845_vm0  ;;  %v5817_v25 = vld [vmem:[#allocation2 + $0x9a] sm:$0xff]  ;;  %v5818_v4 = vld [vmem:[#allocation2 + $0xa2] sm:$0xff] }
 0x399   : > { %vm17855_vm7 = vmmov %vm17845_vm0  ;;  %v5819_v49 = vld [vmem:[#allocation2 + $0xaa] sm:$0xff]  ;;  %v5820_v5 = vld [vmem:[#allocation2 + $0xb2] sm:$0xff] }
 0x39a   : > { %13004 = vmatmul.mubr.msk.f32.gmra.mrb[2].mxu1 %vm17849_vm10, %v5374_v20  ;;  %vm17856_vm13 = vmmov %vm17845_vm0  ;;  %v5821_v46 = vld [vmem:[#allocation2 + $0xba] sm:$0xff]  ;;  %v5822_v40 = vld [vmem:[#allocation2 + $0xc2] sm:$0xff] }
 0x39b   : > { %13006 = vmatprep.mubr.msk.f32.mxu1 %vm17850_vm9, %v5375_v28  ;;  %vm17857_vm5 = vmmov %vm17845_vm0  ;;  %v5823_v6 = vld [vmem:[#allocation2 + $0xca] sm:$0xff]  ;;  %v5825_v38 = vld [vmem:[#allocation2 + $0xda] sm:$0xff] }
 0x39c   : > { %vm17858_vm4 = vmmov %vm17845_vm0  ;;  %v5826_v17 = vld [vmem:[#allocation2 + $0xe2] sm:$0xff]  ;;  %v5827_v20 = vld [vmem:[#allocation2 + $0xea] sm:$0xff] }
 0x39d   : > { %vm17859_vm2 = vmmov %vm17845_vm0  ;;  %v5828_v28 = vld [vmem:[#allocation2 + $0xf2] sm:$0xff] }
 0x39e   : > { %13007 = vmatmul.mubr.msk.f32.gmra.mrb[4].mxu1 %vm17851_vm6, %v5376_v50  ;;  %vm17860_vm15 = vmmov %vm17845_vm0  ;;  %v5829_v50 = vld [vmem:[#allocation2 + $0xfa] sm:$0xff] }
 0x39f   : > { %13009 = vmatprep.mubr.msk.f32.mxu1 %vm17852_vm1, %v5377_v52  ;;  %vm17861_vm3 = vmmov %vm17845_vm0  ;;  %v5830_v52 = vld [vmem:[#allocation2 + $0x102] sm:$0xff] }
 0x3a0   : > { %vm17862_vm12 = vmmov %vm17845_vm0 }
 0x3a1   : > { %vm17863_vm14 = vmmov %vm17845_vm0 }
 0x3a2   : > { %13010 = vmatmul.mubr.msk.f32.gmra.mrb[6].mxu1 %vm17853_vm8, %v5378_v32  ;;  %vm17864_vm10 = vmmov %vm17845_vm0  ;;  %v5831_v32 = vld [vmem:[#allocation2 + $0x10a] sm:$0xff] }
 0x3a3   : > { %13012 = vmatprep.mubr.msk.f32.mxu1 %vm17854_vm11, %v5379_v48  ;;  %vm17865_vm9 = vmmov %vm17845_vm0  ;;  %v5832_v48 = vld [vmem:[#allocation2 + $0x112] sm:$0xff] }
 0x3a4   : > { %vm17866_vm6 = vmmov %vm17845_vm0 }
 0x3a5   : > { %vm17867_vm1 = vmmov %vm17845_vm0 }
 0x3a6   : > { %13013 = vmatmul.mubr.msk.f32.gmra.mrb[8].mxu1 %vm17855_vm7, %v5380_v53  ;;  %vm17868_vm8 = vmmov %vm17845_vm0  ;;  %v5833_v53 = vld [vmem:[#allocation2 + $0x11a] sm:$0xff] }
 0x3a7   : > { %13015 = vmatprep.mubr.msk.f32.mxu1 %vm17856_vm13, %v5381_v60  ;;  %vm17869_vm11 = vmmov %vm17845_vm0  ;;  %v11586_v60 = vld [vmem:[%s17557_s3 + $0x28] sm:$0xff] }
 0x3a8   : > { %vm17870_vm7 = vmmov %vm17845_vm0 }
 0x3a9   : > { %vm17871_vm13 = vmmov %vm17845_vm0 }
 0x3aa   : > { %13016 = vmatmul.mubr.msk.f32.gmra.mrb[10].mxu1 %vm17857_vm5, %v5382_v31  ;;  %vm17872_vm5 = vmmov %vm17845_vm0  ;;  %v6259_v31 = vld [vmem:[#allocation2 + $0x122] sm:$0xff] }
 0x3ab   : > { %13018 = vmatprep.mubr.msk.f32.mxu1 %vm17858_vm4, %v5383_v14  ;;  %vm17873_vm4 = vmmov %vm17845_vm0  ;;  %v6260_v14 = vld [vmem:[#allocation2 + $0x12a] sm:$0xff] }
 0x3ae   : > { %13019 = vmatmul.mubr.msk.f32.gmra.mrb[12].mxu1 %vm17859_vm2, %v5384_v2  ;;  %vm17874_vm2 = vmmov %vm17845_vm0  ;;  %v6652_v2 = vld [vmem:[#allocation2 + $0x13] sm:$0xff] }
 0x3af   : > { %13021 = vmatprep.mubr.msk.f32.mxu1 %vm17860_vm15, %v5385_v0  ;;  %vm17875_vm15 = vmmov %vm17845_vm0  ;;  %v6653_v0 = vld [vmem:[#allocation2 + $0x1b] sm:$0xff] }
 0x3b2   : > { %13022 = vmatmul.mubr.msk.f32.gmra.mrb[14].mxu1 %vm17845_vm0, %v5386_v30  ;;  %v16654_v30 = vld [vmem:[%s17557_s3 + $0x30] sm:$0xff] }
 0x3b3   : > { %13024 = vmatprep.mubr.msk.f32.mxu1 %vm17861_vm3, %v5387_v19  ;;  %vm17876_vm3 = vmmov %vm17845_vm0  ;;  %v6654_v19 = vld [vmem:[#allocation2 + $0x23] sm:$0xff] }
 0x3b6   : > { %13025 = vmatmul.mubr.msk.f32.gmra.mrb[16].mxu1 %vm17862_vm12, %v5388_v51  ;;  %vm17877_vm12 = vmmov %vm17845_vm0  ;;  %v6655_v51 = vld [vmem:[#allocation2 + $0x2b] sm:$0xff] }
 0x3b7   : > { %13027 = vmatprep.mubr.msk.f32.mxu1 %vm17863_vm14, %v5389_v26  ;;  %vm17878_vm14 = vmmov %vm17845_vm0  ;;  %v6656_v26 = vld [vmem:[#allocation2 + $0x33] sm:$0xff] }
 0x3ba   : > { %13028 = vmatmul.mubr.msk.f32.gmra.mrb[18].mxu1 %vm17864_vm10, %v5390_v42  ;;  %vm17879_vm10 = vmmov %vm17845_vm0  ;;  %v6657_v42 = vld [vmem:[#allocation2 + $0x3b] sm:$0xff] }
 0x3bb   : > { %13030 = vmatprep.mubr.msk.f32.mxu1 %vm17865_vm9, %v5391_v1  ;;  %vm17880_vm9 = vmmov %vm17845_vm0  ;;  %v6658_v1 = vld [vmem:[#allocation2 + $0x43] sm:$0xff] }
 0x3be   : > { %13031 = vmatmul.mubr.msk.f32.gmra.mrb[20].mxu1 %vm17866_vm6, %v5392_v10  ;;  %vm17881_vm6 = vmmov %vm17845_vm0  ;;  %v6659_v10 = vld [vmem:[#allocation2 + $0x4b] sm:$0xff] }
 0x3bf   : > { %13033 = vmatprep.mubr.msk.f32.mxu1 %vm17867_vm1, %v5393_v37  ;;  %vm17882_vm1 = vmmov %vm17845_vm0  ;;  %v6660_v37 = vld [vmem:[#allocation2 + $0x53] sm:$0xff] }
 0x3c2   : > { %13034 = vmatmul.mubr.msk.f32.gmra.mrb[22].mxu1 %vm17868_vm8, %v5394_v21  ;;  %vm17883_vm8 = vmmov %vm17845_vm0  ;;  %v6661_v21 = vld [vmem:[#allocation2 + $0x5b] sm:$0xff] }
 0x3c3   : > { %13036 = vmatprep.mubr.msk.f32.mxu1 %vm17869_vm11, %v5395_v41  ;;  %vm17884_vm11 = vmmov %vm17845_vm0  ;;  %v6662_v41 = vld [vmem:[#allocation2 + $0x63] sm:$0xff] }
 0x3c6   : > { %13037 = vmatmul.mubr.msk.f32.gmra.mrb[24].mxu1 %vm17870_vm7, %v5396_v24  ;;  %vm17885_vm7 = vmmov %vm17845_vm0  ;;  %v6663_v24 = vld [vmem:[#allocation2 + $0x6b] sm:$0xff] }
 0x3c7   : > { %13039 = vmatprep.mubr.msk.f32.mxu1 %vm17871_vm13, %v5397_v29  ;;  %vm17886_vm13 = vmmov %vm17845_vm0  ;;  %v6664_v29 = vld [vmem:[#allocation2 + $0x73] sm:$0xff] }
 0x3ca   : > { %13040 = vmatmul.mubr.msk.f32.gmra.mrb[26].mxu1 %vm17872_vm5, %v5398_v9  ;;  %vm17887_vm5 = vmmov %vm17845_vm0  ;;  %v6665_v9 = vld [vmem:[#allocation2 + $0x7b] sm:$0xff] }
 0x3cb   : > { %13042 = vmatprep.mubr.msk.f32.mxu1 %vm17873_vm4, %v5399_v13  ;;  %vm17888_vm4 = vmmov %vm17845_vm0  ;;  %v6666_v13 = vld [vmem:[#allocation2 + $0x83] sm:$0xff] }
 0x3ce   : > { %13043 = vmatmul.mubr.msk.f32.gmra.mrb[28].mxu1 %vm17874_vm2, %v5400_v55  ;;  %vm17889_vm2 = vmmov %vm17845_vm0  ;;  %v6667_v55 = vld [vmem:[#allocation2 + $0x8b] sm:$0xff] }
 0x3cf   : > { %13045 = vmatprep.mubr.msk.f32.mxu1 %vm17875_vm15, %v5401_v23  ;;  %vm17890_vm15 = vmmov %vm17845_vm0  ;;  %v6668_v23 = vld [vmem:[#allocation2 + $0x93] sm:$0xff] }
 0x3d2   : > { %13046 = vmatmul.mubr.msk.f32.gmra.mrb[30].mxu1 %vm17845_vm0, %v5402_v54  ;;  %v6669_v54 = vld [vmem:[#allocation2 + $0x9b] sm:$0xff] }
 0x3d3   : > { %13048 = vmatprep.mubr.msk.f32.mxu1 %vm17876_vm3, %v5403_v47  ;;  %vm17891_vm3 = vmmov %vm17845_vm0  ;;  %v6670_v47 = vld [vmem:[#allocation2 + $0xa3] sm:$0xff] }
 0x3d6   : > { %13049 = vmatmul.mubr.msk.f32.gmra.mrb[32].mxu1 %vm17877_vm12, %v5404_v27  ;;  %vm17892_vm12 = vmmov %vm17845_vm0  ;;  %v6671_v27 = vld [vmem:[#allocation2 + $0xab] sm:$0xff] }
 0x3d7   : > { %13051 = vmatprep.mubr.msk.f32.mxu1 %vm17878_vm14, %v5405_v18  ;;  %vm17893_vm14 = vmmov %vm17845_vm0  ;;  %v6672_v18 = vld [vmem:[#allocation2 + $0xb3] sm:$0xff] }
 0x3da   : > { %13052 = vmatmul.mubr.msk.f32.gmra.mrb[34].mxu1 %vm17879_vm10, %v5406_v39  ;;  %vm17894_vm10 = vmmov %vm17845_vm0  ;;  %v6674_v39 = vld [vmem:[#allocation2 + $0xc3] sm:$0xff] }
 0x3db   : > { %13056 = vmatprep.mubr.msk.f32.mxu1 %vm17880_vm9, %v5798_v43  ;;  %vm17895_vm9 = vmmov %vm17845_vm0  ;;  %v6673_v43 = vld [vmem:[#allocation2 + $0xbb] sm:$0xff] }
 0x3de   : > { %13057 = vmatmul.mubr.msk.f32.vlgmr.msra.gmra.mrb[0].mxu1 %vm17881_vm6, %v5799_v59  ;;  %vm17896_vm6 = vmmov %vm17845_vm0  ;;  %v6675_v59 = vld [vmem:[#allocation2 + $0xcb] sm:$0xff] }
 0x3df   : > { %13111 = vmatpush3.msra.mxu1 %v16490_v33  ;;  %13059 = vmatprep.mubr.msk.f32.mxu1 %vm17882_vm1, %v16538_v58  ;;  %vm17897_vm1 = vmmov %vm17845_vm0  ;;  %v5824_v33 = vld [vmem:[#allocation2 + $0xd2] sm:$0xff] }
 0x3e0   : > { %13166 = vmatprep.subr.mxu1 %v16535_v56 }
 0x3e2   : > { %13060 = vmatmul.mubr.msk.f32.gmra.mrb[2].mxu1 %vm17883_vm8, %v16544_v34  ;;  %vm17898_vm8 = vmmov %vm17845_vm0 }
 0x3e3   : > { %13062 = vmatprep.mubr.msk.f32.mxu1 %vm17884_vm11, %v16548_v57  ;;  %vm17899_vm11 = vmmov %vm17845_vm0 }
 0x3e6   : > { %13063 = vmatmul.mubr.msk.f32.gmra.mrb[4].mxu1 %vm17885_vm7, %v16552_v16  ;;  %vm17900_vm7 = vmmov %vm17845_vm0 }
 0x3e7   : > { %13065 = vmatprep.mubr.msk.f32.mxu1 %vm17886_vm13, %v16556_v63  ;;  %vm17901_vm13 = vmmov %vm17845_vm0 }
 0x3ea   : > { %13066 = vmatmul.mubr.msk.f32.gmra.mrb[6].mxu1 %vm17887_vm5, %v16560_v44  ;;  %vm17902_vm5 = vmmov %vm17845_vm0 }
 0x3eb   : > { %13068 = vmatprep.mubr.msk.f32.mxu1 %vm17888_vm4, %v16564_v7  ;;  %vm17903_vm4 = vmmov %vm17845_vm0 }
 0x3ee   : > { %13069 = vmatmul.mubr.msk.f32.gmra.mrb[8].mxu1 %vm17889_vm2, %v16568_v45  ;;  %vm17904_vm2 = vmmov %vm17845_vm0 }
 0x3ef   : > { %13071 = vmatprep.mubr.msk.f32.mxu1 %vm17890_vm15, %v16572_v11  ;;  %vm17905_vm15 = vmmov %vm17845_vm0 }
 0x3f2   : > { %13072 = vmatmul.mubr.msk.f32.gmra.mrb[10].mxu1 %vm17845_vm0, %v5809_v36 }
 0x3f3   : > { %13074 = vmatprep.mubr.msk.f32.mxu1 %vm17891_vm3, %v5810_v35  ;;  %vm17906_vm3 = vmmov %vm17845_vm0 }
 0x3f6   : > { %13075 = vmatmul.mubr.msk.f32.gmra.mrb[12].mxu1 %vm17892_vm12, %v5811_v62  ;;  %vm17907_vm12 = vmmov %vm17845_vm0 }
 0x3f7   : > { %13077 = vmatprep.mubr.msk.f32.mxu1 %vm17893_vm14, %v5812_v61  ;;  %vm17908_vm14 = vmmov %vm17845_vm0 }
 0x3fa   : > { %13078 = vmatmul.mubr.msk.f32.gmra.mrb[14].mxu1 %vm17894_vm10, %v5813_v8  ;;  %vm17909_vm10 = vmmov %vm17845_vm0 }
 0x3fb   : > { %13080 = vmatprep.mubr.msk.f32.mxu1 %vm17895_vm9, %v5814_v12  ;;  %vm17910_vm9 = vmmov %vm17845_vm0 }
 0x3fe   : > { %13081 = vmatmul.mubr.msk.f32.gmra.mrb[16].mxu1 %vm17896_vm6, %v5815_v22  ;;  %vm17911_vm6 = vmmov %vm17845_vm0 }
 0x3ff   : > { %13083 = vmatprep.mubr.msk.f32.mxu1 %vm17897_vm1, %v5816_v3  ;;  %vm17912_vm1 = vmmov %vm17845_vm0 }
 0x402   : > { %13084 = vmatmul.mubr.msk.f32.gmra.mrb[18].mxu1 %vm17898_vm8, %v5817_v25  ;;  %vm17913_vm8 = vmmov %vm17845_vm0 }
 0x403   : > { %13086 = vmatprep.mubr.msk.f32.mxu1 %vm17899_vm11, %v5818_v4  ;;  %vm17914_vm11 = vmmov %vm17845_vm0 }
 0x406   : > { %13087 = vmatmul.mubr.msk.f32.gmra.mrb[20].mxu1 %vm17900_vm7, %v5819_v49  ;;  %vm17915_vm7 = vmmov %vm17845_vm0 }
 0x407   : > { %13089 = vmatprep.mubr.msk.f32.mxu1 %vm17901_vm13, %v5820_v5  ;;  %vm17916_vm13 = vmmov %vm17845_vm0 }
 0x40a   : > { %13090 = vmatmul.mubr.msk.f32.gmra.mrb[22].mxu1 %vm17902_vm5, %v5821_v46  ;;  %vm17917_vm5 = vmmov %vm17845_vm0 }
 0x40b   : > { %13092 = vmatprep.mubr.msk.f32.mxu1 %vm17903_vm4, %v5822_v40  ;;  %vm17918_vm4 = vmmov %vm17845_vm0 }
 0x40e   : > { %13093 = vmatmul.mubr.msk.f32.gmra.mrb[24].mxu1 %vm17904_vm2, %v5823_v6  ;;  %vm17919_vm2 = vmmov %vm17845_vm0 }
 0x40f   : > { %13095 = vmatprep.mubr.msk.f32.mxu1 %vm17905_vm15, %v5824_v33  ;;  %vm17920_vm15 = vmmov %vm17845_vm0 }
 0x412   : > { %13096 = vmatmul.mubr.msk.f32.gmra.mrb[26].mxu1 %vm17845_vm0, %v5825_v38 }
 0x413   : > { %13098 = vmatprep.mubr.msk.f32.mxu1 %vm17906_vm3, %v5826_v17  ;;  %vm17921_vm3 = vmmov %vm17845_vm0 }
 0x416   : > { %13099 = vmatmul.mubr.msk.f32.gmra.mrb[28].mxu1 %vm17907_vm12, %v5827_v20  ;;  %vm17922_vm12 = vmmov %vm17845_vm0 }
 0x417   : > { %13101 = vmatprep.mubr.msk.f32.mxu1 %vm17908_vm14, %v5828_v28  ;;  %vm17923_vm14 = vmmov %vm17845_vm0 }
 0x41a   : > { %13102 = vmatmul.mubr.msk.f32.gmra.mrb[30].mxu1 %vm17909_vm10, %v5829_v50  ;;  %vm17924_vm10 = vmmov %vm17845_vm0 }
 0x41b   : > { %13104 = vmatprep.mubr.msk.f32.mxu1 %vm17910_vm9, %v5830_v52  ;;  %vm17925_vm9 = vmmov %vm17845_vm0 }
 0x41e   : > { %13105 = vmatmul.mubr.msk.f32.gmra.mrb[32].mxu1 %vm17911_vm6, %v5831_v32  ;;  %vm17926_vm6 = vmmov %vm17845_vm0 }
 0x41f   : > { %13107 = vmatprep.mubr.msk.f32.mxu1 %vm17912_vm1, %v5832_v48  ;;  %vm17927_vm1 = vmmov %vm17845_vm0 }
 0x422   : > { %13108 = vmatmul.mubr.msk.f32.gmra.mrb[34].mxu1 %vm17913_vm8, %v5833_v53  ;;  %vm17928_vm8 = vmmov %vm17845_vm0 }
 0x423   : > { %13112 = vmatprep.mubr.msk.f32.mxu1 %vm17914_vm11, %v16538_v58  ;;  %vm17929_vm11 = vmmov %vm17845_vm0  ;;  %v6677_v58 = vld [vmem:[#allocation2 + $0xdb] sm:$0xff] }
 0x426   : > { %13113 = vmatmul.mubr.msk.f32.vlgmr.msra.gmra.mrb[0].mxu1 %vm17915_vm7, %v16544_v34  ;;  %vm17930_vm7 = vmmov %vm17845_vm0  ;;  %v6678_v34 = vld [vmem:[#allocation2 + $0xe3] sm:$0xff] }
 0x427   : > { %13167 = vmatpush3.msra.mxu1 %v16535_v56  ;;  %13115 = vmatprep.mubr.msk.f32.mxu1 %vm17916_vm13, %v16548_v57  ;;  %vm17931_vm13 = vmmov %vm17845_vm0  ;;  %v6676_v56 = vld [vmem:[#allocation2 + $0xd3] sm:$0xff]  ;;  %v6679_v57 = vld [vmem:[#allocation2 + $0xeb] sm:$0xff] }
 0x428   : > { %13222 = vmatprep.subr.mxu1 %v11586_v60 }
 0x42a   : > { %13116 = vmatmul.mubr.msk.f32.gmra.mrb[2].mxu1 %vm17917_vm5, %v16552_v16  ;;  %vm17932_vm5 = vmmov %vm17845_vm0  ;;  %v6680_v16 = vld [vmem:[#allocation2 + $0xf3] sm:$0xff] }
 0x42b   : > { %13118 = vmatprep.mubr.msk.f32.mxu1 %vm17918_vm4, %v16556_v63  ;;  %vm17933_vm4 = vmmov %vm17845_vm0  ;;  %v6681_v63 = vld [vmem:[#allocation2 + $0xfb] sm:$0xff] }
 0x42e   : > { %13119 = vmatmul.mubr.msk.f32.gmra.mrb[4].mxu1 %vm17919_vm2, %v16560_v44  ;;  %vm17934_vm2 = vmmov %vm17845_vm0  ;;  %v6682_v44 = vld [vmem:[#allocation2 + $0x103] sm:$0xff] }
 0x42f   : > { %13121 = vmatprep.mubr.msk.f32.mxu1 %vm17920_vm15, %v16564_v7  ;;  %vm17935_vm15 = vmmov %vm17845_vm0  ;;  %v6683_v7 = vld [vmem:[#allocation2 + $0x10b] sm:$0xff] }
 0x432   : > { %13122 = vmatmul.mubr.msk.f32.gmra.mrb[6].mxu1 %vm17845_vm0, %v16568_v45  ;;  %v6684_v45 = vld [vmem:[#allocation2 + $0x113] sm:$0xff] }
 0x433   : > { %13124 = vmatprep.mubr.msk.f32.mxu1 %vm17921_vm3, %v16572_v11  ;;  %vm17936_vm3 = vmmov %vm17845_vm0  ;;  %v6685_v11 = vld [vmem:[#allocation2 + $0x11b] sm:$0xff] }
 0x436   : > { %13125 = vmatmul.mubr.msk.f32.gmra.mrb[8].mxu1 %vm17922_vm12, %v5809_v36  ;;  %vm17937_vm12 = vmmov %vm17845_vm0  ;;  %v6686_v36 = vld [vmem:[#allocation2 + $0x123] sm:$0xff] }
 0x437   : > { %13127 = vmatprep.mubr.msk.f32.mxu1 %vm17923_vm14, %v5810_v35  ;;  %vm17938_vm14 = vmmov %vm17845_vm0  ;;  %v6687_v35 = vld [vmem:[#allocation2 + $0x12b] sm:$0xff] }
 0x43a   : > { %13128 = vmatmul.mubr.msk.f32.gmra.mrb[10].mxu1 %vm17924_vm10, %v5811_v62  ;;  %vm17939_vm10 = vmmov %vm17845_vm0  ;;  %v7079_v62 = vld [vmem:[#allocation2 + $0x14] sm:$0xff] }
 0x43b   : > { %13130 = vmatprep.mubr.msk.f32.mxu1 %vm17925_vm9, %v5812_v61  ;;  %vm17940_vm9 = vmmov %vm17845_vm0  ;;  %v7080_v61 = vld [vmem:[#allocation2 + $0x1c] sm:$0xff] }
 0x43e   : > { %13131 = vmatmul.mubr.msk.f32.gmra.mrb[12].mxu1 %vm17926_vm6, %v5813_v8  ;;  %vm17941_vm6 = vmmov %vm17845_vm0  ;;  %v16696_v8 = vld [vmem:[%s17557_s3 + $0x38] sm:$0xff] }
 0x43f   : > { %13133 = vmatprep.mubr.msk.f32.mxu1 %vm17927_vm1, %v5814_v12  ;;  %vm17942_vm1 = vmmov %vm17845_vm0  ;;  %v16699_v12 = vld [vmem:[#allocation2 + $0x24] sm:$0xff] }
 0x442   : > { %13134 = vmatmul.mubr.msk.f32.gmra.mrb[14].mxu1 %vm17928_vm8, %v5815_v22  ;;  %vm17943_vm8 = vmmov %vm17845_vm0  ;;  %v16705_v22 = vld [vmem:[#allocation2 + $0x2c] sm:$0xff] }
 0x443   : > { %13136 = vmatprep.mubr.msk.f32.mxu1 %vm17929_vm11, %v5816_v3  ;;  %vm17944_vm11 = vmmov %vm17845_vm0  ;;  %v16709_v3 = vld [vmem:[#allocation2 + $0x34] sm:$0xff] }
 0x446   : > { %13137 = vmatmul.mubr.msk.f32.gmra.mrb[16].mxu1 %vm17930_vm7, %v5817_v25  ;;  %vm17945_vm7 = vmmov %vm17845_vm0  ;;  %v16713_v25 = vld [vmem:[#allocation2 + $0x3c] sm:$0xff] }
 0x447   : > { %13139 = vmatprep.mubr.msk.f32.mxu1 %vm17931_vm13, %v5818_v4  ;;  %vm17946_vm13 = vmmov %vm17845_vm0  ;;  %v16717_v4 = vld [vmem:[#allocation2 + $0x44] sm:$0xff] }
 0x44a   : > { %13140 = vmatmul.mubr.msk.f32.gmra.mrb[18].mxu1 %vm17932_vm5, %v5819_v49  ;;  %vm17947_vm5 = vmmov %vm17845_vm0  ;;  %v16721_v49 = vld [vmem:[#allocation2 + $0x4c] sm:$0xff] }
 0x44b   : > { %13142 = vmatprep.mubr.msk.f32.mxu1 %vm17933_vm4, %v5820_v5  ;;  %vm17948_vm4 = vmmov %vm17845_vm0  ;;  %v16725_v5 = vld [vmem:[#allocation2 + $0x54] sm:$0xff] }
 0x44e   : > { %13143 = vmatmul.mubr.msk.f32.gmra.mrb[20].mxu1 %vm17934_vm2, %v5821_v46  ;;  %vm17949_vm2 = vmmov %vm17845_vm0  ;;  %v16729_v46 = vld [vmem:[#allocation2 + $0x5c] sm:$0xff] }
 0x44f   : > { %13145 = vmatprep.mubr.msk.f32.mxu1 %vm17935_vm15, %v5822_v40  ;;  %vm17950_vm15 = vmmov %vm17845_vm0  ;;  %v16733_v40 = vld [vmem:[#allocation2 + $0x64] sm:$0xff] }
 0x452   : > { %13146 = vmatmul.mubr.msk.f32.gmra.mrb[22].mxu1 %vm17845_vm0, %v5823_v6  ;;  %v7090_v6 = vld [vmem:[#allocation2 + $0x6c] sm:$0xff] }
 0x453   : > { %13148 = vmatprep.mubr.msk.f32.mxu1 %vm17936_vm3, %v5824_v33  ;;  %vm17951_vm3 = vmmov %vm17845_vm0  ;;  %v7091_v33 = vld [vmem:[#allocation2 + $0x74] sm:$0xff] }
 0x456   : > { %13149 = vmatmul.mubr.msk.f32.gmra.mrb[24].mxu1 %vm17937_vm12, %v5825_v38  ;;  %vm17952_vm12 = vmmov %vm17845_vm0  ;;  %v7092_v38 = vld [vmem:[#allocation2 + $0x7c] sm:$0xff] }
 0x457   : > { %13151 = vmatprep.mubr.msk.f32.mxu1 %vm17938_vm14, %v5826_v17  ;;  %vm17953_vm14 = vmmov %vm17845_vm0  ;;  %v7093_v17 = vld [vmem:[#allocation2 + $0x84] sm:$0xff] }
 0x45a   : > { %13152 = vmatmul.mubr.msk.f32.gmra.mrb[26].mxu1 %vm17939_vm10, %v5827_v20  ;;  %vm17954_vm10 = vmmov %vm17845_vm0  ;;  %v7094_v20 = vld [vmem:[#allocation2 + $0x8c] sm:$0xff] }
 0x45b   : > { %13154 = vmatprep.mubr.msk.f32.mxu1 %vm17940_vm9, %v5828_v28  ;;  %vm17955_vm9 = vmmov %vm17845_vm0  ;;  %v7095_v28 = vld [vmem:[#allocation2 + $0x94] sm:$0xff] }
 0x45e   : > { %13155 = vmatmul.mubr.msk.f32.gmra.mrb[28].mxu1 %vm17941_vm6, %v5829_v50  ;;  %vm17956_vm6 = vmmov %vm17845_vm0  ;;  %v7096_v50 = vld [vmem:[#allocation2 + $0x9c] sm:$0xff] }
 0x45f   : > { %13157 = vmatprep.mubr.msk.f32.mxu1 %vm17942_vm1, %v5830_v52  ;;  %vm17957_vm1 = vmmov %vm17845_vm0  ;;  %v7097_v52 = vld [vmem:[#allocation2 + $0xa4] sm:$0xff] }
 0x462   : > { %13158 = vmatmul.mubr.msk.f32.gmra.mrb[30].mxu1 %vm17943_vm8, %v5831_v32  ;;  %vm17958_vm8 = vmmov %vm17845_vm0  ;;  %v7098_v32 = vld [vmem:[#allocation2 + $0xac] sm:$0xff] }
 0x463   : > { %13160 = vmatprep.mubr.msk.f32.mxu1 %vm17944_vm11, %v5832_v48  ;;  %vm17959_vm11 = vmmov %vm17845_vm0  ;;  %v7099_v48 = vld [vmem:[#allocation2 + $0xb4] sm:$0xff] }
 0x466   : > { %13161 = vmatmul.mubr.msk.f32.gmra.mrb[32].mxu1 %vm17945_vm7, %v5833_v53  ;;  %vm17960_vm7 = vmmov %vm17845_vm0  ;;  %v7100_v53 = vld [vmem:[#allocation2 + $0xbc] sm:$0xff] }
 0x467   : > { %13163 = vmatprep.mubr.msk.f32.mxu1 %vm17946_vm13, %v6259_v31  ;;  %vm17961_vm13 = vmmov %vm17845_vm0  ;;  %v7102_v31 = vld [vmem:[#allocation2 + $0xcc] sm:$0xff] }
 0x46a   : > { %13164 = vmatmul.mubr.msk.f32.gmra.mrb[34].mxu1 %vm17947_vm5, %v6260_v14  ;;  %vm17962_vm5 = vmmov %vm17845_vm0  ;;  %v7103_v14 = vld [vmem:[#allocation2 + $0xd4] sm:$0xff] }
 0x46b   : > { %13168 = vmatprep.mubr.msk.f32.mxu1 %vm17948_vm4, %v6652_v2  ;;  %vm17963_vm4 = vmmov %vm17845_vm0  ;;  %v7104_v2 = vld [vmem:[#allocation2 + $0xdc] sm:$0xff] }
 0x46e   : > { %13169 = vmatmul.mubr.msk.f32.vlgmr.msra.gmra.mrb[0].mxu1 %vm17949_vm2, %v6653_v0  ;;  %vm17964_vm2 = vmmov %vm17845_vm0  ;;  %v7105_v0 = vld [vmem:[#allocation2 + $0xe4] sm:$0xff] }
 0x46f   : > { %13223 = vmatpush3.msra.mxu1 %v11586_v60  ;;  %13171 = vmatprep.mubr.msk.f32.mxu1 %vm17950_vm15, %v6654_v19  ;;  %vm17965_vm15 = vmmov %vm17845_vm0  ;;  %v7101_v60 = vld [vmem:[#allocation2 + $0xc4] sm:$0xff]  ;;  %v7107_v19 = vld [vmem:[#allocation2 + $0xf4] sm:$0xff] }
 0x470   : > { %13278 = vmatprep.subr.mxu1 %v16654_v30 }
 0x472   : > { %13172 = vmatmul.mubr.msk.f32.gmra.mrb[2].mxu1 %vm17845_vm0, %v6655_v51  ;;  %v7108_v51 = vld [vmem:[#allocation2 + $0xfc] sm:$0xff] }
 0x473   : > { %13174 = vmatprep.mubr.msk.f32.mxu1 %vm17951_vm3, %v6656_v26  ;;  %vm17966_vm3 = vmmov %vm17845_vm0  ;;  %v7109_v26 = vld [vmem:[#allocation2 + $0x104] sm:$0xff] }
 0x476   : > { %13175 = vmatmul.mubr.msk.f32.gmra.mrb[4].mxu1 %vm17952_vm12, %v6657_v42  ;;  %vm17967_vm12 = vmmov %vm17845_vm0  ;;  %v7110_v42 = vld [vmem:[#allocation2 + $0x10c] sm:$0xff] }
 0x477   : > { %13177 = vmatprep.mubr.msk.f32.mxu1 %vm17953_vm14, %v6658_v1  ;;  %vm17968_vm14 = vmmov %vm17845_vm0  ;;  %v7111_v1 = vld [vmem:[#allocation2 + $0x114] sm:$0xff] }
 0x47a   : > { %13178 = vmatmul.mubr.msk.f32.gmra.mrb[6].mxu1 %vm17954_vm10, %v6659_v10  ;;  %vm17969_vm10 = vmmov %vm17845_vm0  ;;  %v7112_v10 = vld [vmem:[#allocation2 + $0x11c] sm:$0xff] }
 0x47b   : > { %13180 = vmatprep.mubr.msk.f32.mxu1 %vm17955_vm9, %v6660_v37  ;;  %vm17970_vm9 = vmmov %vm17845_vm0  ;;  %v7113_v37 = vld [vmem:[#allocation2 + $0x124] sm:$0xff] }
 0x47e   : > { %13181 = vmatmul.mubr.msk.f32.gmra.mrb[8].mxu1 %vm17956_vm6, %v6661_v21  ;;  %vm17971_vm6 = vmmov %vm17845_vm0  ;;  %v7114_v21 = vld [vmem:[#allocation2 + $0x12c] sm:$0xff] }
 0x47f   : > { %13183 = vmatprep.mubr.msk.f32.mxu1 %vm17957_vm1, %v6662_v41  ;;  %vm17972_vm1 = vmmov %vm17845_vm0  ;;  %v11697_v41 = vld [vmem:[%s17557_s3 + $0x40] sm:$0xff] }
 0x482   : > { %13184 = vmatmul.mubr.msk.f32.gmra.mrb[10].mxu1 %vm17958_vm8, %v6663_v24  ;;  %vm17973_vm8 = vmmov %vm17845_vm0  ;;  %v7540_v24 = vld [vmem:[#allocation2 + $0x134] sm:$0xff] }
 0x483   : > { %13186 = vmatprep.mubr.msk.f32.mxu1 %vm17959_vm11, %v6664_v29  ;;  %vm17974_vm11 = vmmov %vm17845_vm0  ;;  %v7541_v29 = vld [vmem:[#allocation2 + $0x13c] sm:$0xff] }
 0x486   : > { %13187 = vmatmul.mubr.msk.f32.gmra.mrb[12].mxu1 %vm17960_vm7, %v6665_v9  ;;  %vm17975_vm7 = vmmov %vm17845_vm0  ;;  %v7933_v9 = vld [vmem:[#allocation2 + $0x25] sm:$0xff] }
 0x487   : > { %13189 = vmatprep.mubr.msk.f32.mxu1 %vm17961_vm13, %v6666_v13  ;;  %vm17976_vm13 = vmmov %vm17845_vm0  ;;  %v7934_v13 = vld [vmem:[#allocation2 + $0x2d] sm:$0xff] }
 0x48a   : > { %13190 = vmatmul.mubr.msk.f32.gmra.mrb[14].mxu1 %vm17962_vm5, %v6667_v55  ;;  %vm17977_vm5 = vmmov %vm17845_vm0  ;;  %v7935_v55 = vld [vmem:[#allocation2 + $0x35] sm:$0xff] }
 0x48b   : > { %13192 = vmatprep.mubr.msk.f32.mxu1 %vm17963_vm4, %v6668_v23  ;;  %vm17978_vm4 = vmmov %vm17845_vm0  ;;  %v7936_v23 = vld [vmem:[#allocation2 + $0x3d] sm:$0xff] }
 0x48e   : > { %13193 = vmatmul.mubr.msk.f32.gmra.mrb[16].mxu1 %vm17964_vm2, %v6669_v54  ;;  %vm17979_vm2 = vmmov %vm17845_vm0  ;;  %v7937_v54 = vld [vmem:[#allocation2 + $0x45] sm:$0xff] }
 0x48f   : > { %13195 = vmatprep.mubr.msk.f32.mxu1 %vm17965_vm15, %v6670_v47  ;;  %vm17980_vm15 = vmmov %vm17845_vm0  ;;  %v7938_v47 = vld [vmem:[#allocation2 + $0x4d] sm:$0xff] }
 0x492   : > { %13196 = vmatmul.mubr.msk.f32.gmra.mrb[18].mxu1 %vm17845_vm0, %v6671_v27  ;;  %v7939_v27 = vld [vmem:[#allocation2 + $0x55] sm:$0xff] }
 0x493   : > { %13198 = vmatprep.mubr.msk.f32.mxu1 %vm17966_vm3, %v6672_v18  ;;  %vm17981_vm3 = vmmov %vm17845_vm0  ;;  %v7940_v18 = vld [vmem:[#allocation2 + $0x5d] sm:$0xff] }
 0x496   : > { %13199 = vmatmul.mubr.msk.f32.gmra.mrb[20].mxu1 %vm17967_vm12, %v6673_v43  ;;  %vm17982_vm12 = vmmov %vm17845_vm0  ;;  %v7941_v43 = vld [vmem:[#allocation2 + $0x65] sm:$0xff] }
 0x497   : > { %13201 = vmatprep.mubr.msk.f32.mxu1 %vm17968_vm14, %v6674_v39  ;;  %vm17983_vm14 = vmmov %vm17845_vm0  ;;  %v7942_v39 = vld [vmem:[#allocation2 + $0x6d] sm:$0xff] }
 0x49a   : > { %13202 = vmatmul.mubr.msk.f32.gmra.mrb[22].mxu1 %vm17969_vm10, %v6675_v59  ;;  %vm17984_vm10 = vmmov %vm17845_vm0  ;;  %v7943_v59 = vld [vmem:[#allocation2 + $0x75] sm:$0xff] }
 0x49b   : > { %13204 = vmatprep.mubr.msk.f32.mxu1 %vm17970_vm9, %v6676_v56  ;;  %vm17985_vm9 = vmmov %vm17845_vm0  ;;  %v7944_v56 = vld [vmem:[#allocation2 + $0x7d] sm:$0xff] }
 0x49e   : > { %13205 = vmatmul.mubr.msk.f32.gmra.mrb[24].mxu1 %vm17971_vm6, %v6677_v58  ;;  %vm17986_vm6 = vmmov %vm17845_vm0  ;;  %v7945_v58 = vld [vmem:[#allocation2 + $0x85] sm:$0xff] }
 0x49f   : > { %13207 = vmatprep.mubr.msk.f32.mxu1 %vm17972_vm1, %v6678_v34  ;;  %vm17987_vm1 = vmmov %vm17845_vm0  ;;  %v7946_v34 = vld [vmem:[#allocation2 + $0x8d] sm:$0xff] }
 0x4a2   : > { %13208 = vmatmul.mubr.msk.f32.gmra.mrb[26].mxu1 %vm17973_vm8, %v6679_v57  ;;  %vm17988_vm8 = vmmov %vm17845_vm0  ;;  %v7947_v57 = vld [vmem:[#allocation2 + $0x95] sm:$0xff] }
 0x4a3   : > { %13210 = vmatprep.mubr.msk.f32.mxu1 %vm17974_vm11, %v6680_v16  ;;  %vm17989_vm11 = vmmov %vm17845_vm0  ;;  %v7948_v16 = vld [vmem:[#allocation2 + $0x9d] sm:$0xff] }
 0x4a6   : > { %13211 = vmatmul.mubr.msk.f32.gmra.mrb[28].mxu1 %vm17975_vm7, %v6681_v63  ;;  %vm17990_vm7 = vmmov %vm17845_vm0  ;;  %v7949_v63 = vld [vmem:[#allocation2 + $0xa5] sm:$0xff] }
 0x4a7   : > { %13213 = vmatprep.mubr.msk.f32.mxu1 %vm17976_vm13, %v6682_v44  ;;  %vm17991_vm13 = vmmov %vm17845_vm0  ;;  %v7950_v44 = vld [vmem:[#allocation2 + $0xad] sm:$0xff] }
 0x4aa   : > { %13214 = vmatmul.mubr.msk.f32.gmra.mrb[30].mxu1 %vm17977_vm5, %v6683_v7  ;;  %vm17992_vm5 = vmmov %vm17845_vm0  ;;  %v7951_v7 = vld [vmem:[#allocation2 + $0xb5] sm:$0xff] }
 0x4ab   : > { %13216 = vmatprep.mubr.msk.f32.mxu1 %vm17978_vm4, %v6684_v45  ;;  %vm17993_vm4 = vmmov %vm17845_vm0  ;;  %v7952_v45 = vld [vmem:[#allocation2 + $0xbd] sm:$0xff] }
 0x4ae   : > { %13217 = vmatmul.mubr.msk.f32.gmra.mrb[32].mxu1 %vm17979_vm2, %v6685_v11  ;;  %vm17994_vm2 = vmmov %vm17845_vm0  ;;  %v7953_v11 = vld [vmem:[#allocation2 + $0xc5] sm:$0xff] }
 0x4af   : > { %13219 = vmatprep.mubr.msk.f32.mxu1 %vm17980_vm15, %v6686_v36  ;;  %vm17995_vm15 = vmmov %vm17845_vm0  ;;  %v7954_v36 = vld [vmem:[#allocation2 + $0xcd] sm:$0xff] }
 0x4b2   : > { %13220 = vmatmul.mubr.msk.f32.gmra.mrb[34].mxu1 %vm17845_vm0, %v6687_v35  ;;  %v7955_v35 = vld [vmem:[#allocation2 + $0xd5] sm:$0xff] }
 0x4b3   : > { %13224 = vmatprep.mubr.msk.f32.mxu1 %vm17981_vm3, %v7079_v62  ;;  %vm17996_vm3 = vmmov %vm17845_vm0  ;;  %v7956_v62 = vld [vmem:[#allocation2 + $0xdd] sm:$0xff] }
 0x4b6   : > { %13225 = vmatmul.mubr.msk.f32.vlgmr.msra.gmra.mrb[0].mxu1 %vm17982_vm12, %v7080_v61  ;;  %vm17997_vm12 = vmmov %vm17845_vm0  ;;  %v7957_v61 = vld [vmem:[#allocation2 + $0xe5] sm:$0xff] }
 0x4b7   : > { %13279 = vmatpush3.msra.mxu1 %v16654_v30  ;;  %13227 = vmatprep.mubr.msk.f32.mxu1 %vm17983_vm14, %v16699_v12  ;;  %vm17998_vm14 = vmmov %vm17845_vm0  ;;  %v7106_v30 = vld [vmem:[#allocation2 + $0xec] sm:$0xff] }
 0x4b8   : > { %13334 = vmatprep.subr.mxu1 %v16696_v8 }
 0x4ba   : > { %13228 = vmatmul.mubr.msk.f32.gmra.mrb[2].mxu1 %vm17984_vm10, %v16705_v22  ;;  %vm17999_vm10 = vmmov %vm17845_vm0 }
 0x4bb   : > { %13230 = vmatprep.mubr.msk.f32.mxu1 %vm17985_vm9, %v16709_v3  ;;  %vm18000_vm9 = vmmov %vm17845_vm0 }
 0x4be   : > { %13231 = vmatmul.mubr.msk.f32.gmra.mrb[4].mxu1 %vm17986_vm6, %v16713_v25  ;;  %vm18001_vm6 = vmmov %vm17845_vm0 }
 0x4bf   : > { %13233 = vmatprep.mubr.msk.f32.mxu1 %vm17987_vm1, %v16717_v4  ;;  %vm18002_vm1 = vmmov %vm17845_vm0 }
 0x4c2   : > { %13234 = vmatmul.mubr.msk.f32.gmra.mrb[6].mxu1 %vm17988_vm8, %v16721_v49  ;;  %vm18003_vm8 = vmmov %vm17845_vm0 }
 0x4c3   : > { %13236 = vmatprep.mubr.msk.f32.mxu1 %vm17989_vm11, %v16725_v5  ;;  %vm18004_vm11 = vmmov %vm17845_vm0 }
 0x4c6   : > { %13237 = vmatmul.mubr.msk.f32.gmra.mrb[8].mxu1 %vm17990_vm7, %v16729_v46  ;;  %vm18005_vm7 = vmmov %vm17845_vm0 }
 0x4c7   : > { %13239 = vmatprep.mubr.msk.f32.mxu1 %vm17991_vm13, %v16733_v40  ;;  %vm18006_vm13 = vmmov %vm17845_vm0 }
 0x4ca   : > { %13240 = vmatmul.mubr.msk.f32.gmra.mrb[10].mxu1 %vm17992_vm5, %v7090_v6  ;;  %vm18007_vm5 = vmmov %vm17845_vm0 }
 0x4cb   : > { %13242 = vmatprep.mubr.msk.f32.mxu1 %vm17993_vm4, %v7091_v33  ;;  %vm18008_vm4 = vmmov %vm17845_vm0 }
 0x4ce   : > { %13243 = vmatmul.mubr.msk.f32.gmra.mrb[12].mxu1 %vm17994_vm2, %v7092_v38  ;;  %vm18009_vm2 = vmmov %vm17845_vm0 }
 0x4cf   : > { %13245 = vmatprep.mubr.msk.f32.mxu1 %vm17995_vm15, %v7093_v17  ;;  %vm18010_vm15 = vmmov %vm17845_vm0 }
 0x4d2   : > { %13246 = vmatmul.mubr.msk.f32.gmra.mrb[14].mxu1 %vm17845_vm0, %v7094_v20 }
 0x4d3   : > { %13248 = vmatprep.mubr.msk.f32.mxu1 %vm17996_vm3, %v7095_v28  ;;  %vm18011_vm3 = vmmov %vm17845_vm0 }
 0x4d6   : > { %13249 = vmatmul.mubr.msk.f32.gmra.mrb[16].mxu1 %vm17997_vm12, %v7096_v50  ;;  %vm18012_vm12 = vmmov %vm17845_vm0 }
 0x4d7   : > { %13251 = vmatprep.mubr.msk.f32.mxu1 %vm17998_vm14, %v7097_v52  ;;  %vm18013_vm14 = vmmov %vm17845_vm0 }
 0x4da   : > { %13252 = vmatmul.mubr.msk.f32.gmra.mrb[18].mxu1 %vm17999_vm10, %v7098_v32  ;;  %vm18014_vm10 = vmmov %vm17845_vm0 }
 0x4db   : > { %13254 = vmatprep.mubr.msk.f32.mxu1 %vm18000_vm9, %v7099_v48  ;;  %vm18015_vm9 = vmmov %vm17845_vm0 }
 0x4de   : > { %13255 = vmatmul.mubr.msk.f32.gmra.mrb[20].mxu1 %vm18001_vm6, %v7100_v53  ;;  %vm18016_vm6 = vmmov %vm17845_vm0 }
 0x4df   : > { %13257 = vmatprep.mubr.msk.f32.mxu1 %vm18002_vm1, %v7101_v60  ;;  %vm18017_vm1 = vmmov %vm17845_vm0 }
 0x4e2   : > { %13258 = vmatmul.mubr.msk.f32.gmra.mrb[22].mxu1 %vm18003_vm8, %v7102_v31  ;;  %vm18018_vm8 = vmmov %vm17845_vm0 }
 0x4e3   : > { %13260 = vmatprep.mubr.msk.f32.mxu1 %vm18004_vm11, %v7103_v14  ;;  %vm18019_vm11 = vmmov %vm17845_vm0 }
 0x4e6   : > { %13261 = vmatmul.mubr.msk.f32.gmra.mrb[24].mxu1 %vm18005_vm7, %v7104_v2  ;;  %vm18020_vm7 = vmmov %vm17845_vm0 }
 0x4e7   : > { %13263 = vmatprep.mubr.msk.f32.mxu1 %vm18006_vm13, %v7105_v0  ;;  %vm18021_vm13 = vmmov %vm17845_vm0 }
 0x4ea   : > { %13264 = vmatmul.mubr.msk.f32.gmra.mrb[26].mxu1 %vm18007_vm5, %v7106_v30  ;;  %vm18022_vm5 = vmmov %vm17845_vm0 }
 0x4eb   : > { %13266 = vmatprep.mubr.msk.f32.mxu1 %vm18008_vm4, %v7107_v19  ;;  %vm18023_vm4 = vmmov %vm17845_vm0 }
 0x4ee   : > { %13267 = vmatmul.mubr.msk.f32.gmra.mrb[28].mxu1 %vm18009_vm2, %v7108_v51  ;;  %vm18024_vm2 = vmmov %vm17845_vm0 }
 0x4ef   : > { %13269 = vmatprep.mubr.msk.f32.mxu1 %vm18010_vm15, %v7109_v26  ;;  %vm18025_vm15 = vmmov %vm17845_vm0 }
 0x4f2   : > { %13270 = vmatmul.mubr.msk.f32.gmra.mrb[30].mxu1 %vm17845_vm0, %v7110_v42 }
 0x4f3   : > { %13272 = vmatprep.mubr.msk.f32.mxu1 %vm18011_vm3, %v7111_v1  ;;  %vm18026_vm3 = vmmov %vm17845_vm0 }
 0x4f6   : > { %13273 = vmatmul.mubr.msk.f32.gmra.mrb[32].mxu1 %vm18012_vm12, %v7112_v10  ;;  %vm18027_vm12 = vmmov %vm17845_vm0 }
 0x4f7   : > { %13275 = vmatprep.mubr.msk.f32.mxu1 %vm18013_vm14, %v7113_v37  ;;  %vm18028_vm14 = vmmov %vm17845_vm0 }
 0x4fa   : > { %13276 = vmatmul.mubr.msk.f32.gmra.mrb[34].mxu1 %vm18014_vm10, %v7114_v21  ;;  %vm18029_vm10 = vmmov %vm17845_vm0 }
 0x4fb   : > { %13280 = vmatprep.mubr.msk.f32.mxu1 %vm18015_vm9, %v16699_v12  ;;  %vm18030_vm9 = vmmov %vm17845_vm0  ;;  %v7959_v12 = vld [vmem:[#allocation2 + $0xf5] sm:$0xff] }
 0x4fe   : > { %13281 = vmatmul.mubr.msk.f32.vlgmr.msra.gmra.mrb[0].mxu1 %vm18016_vm6, %v16705_v22  ;;  %vm18031_vm6 = vmmov %vm17845_vm0  ;;  %v7960_v22 = vld [vmem:[#allocation2 + $0xfd] sm:$0xff] }
 0x4ff   : > { %13335 = vmatpush3.msra.mxu1 %v16696_v8  ;;  %13283 = vmatprep.mubr.msk.f32.mxu1 %vm18017_vm1, %v16709_v3  ;;  %vm18032_vm1 = vmmov %vm17845_vm0  ;;  %v7958_v8 = vld [vmem:[#allocation2 + $0xed] sm:$0xff]  ;;  %v7961_v3 = vld [vmem:[#allocation2 + $0x105] sm:$0xff] }
 0x500   : > { %13390 = vmatprep.subr.mxu1 %v11697_v41 }
 0x502   : > { %13284 = vmatmul.mubr.msk.f32.gmra.mrb[2].mxu1 %vm18018_vm8, %v16713_v25  ;;  %vm18033_vm8 = vmmov %vm17845_vm0  ;;  %v7962_v25 = vld [vmem:[#allocation2 + $0x10d] sm:$0xff] }
 0x503   : > { %13286 = vmatprep.mubr.msk.f32.mxu1 %vm18019_vm11, %v16717_v4  ;;  %vm18034_vm11 = vmmov %vm17845_vm0  ;;  %v7963_v4 = vld [vmem:[#allocation2 + $0x115] sm:$0xff] }
 0x506   : > { %13287 = vmatmul.mubr.msk.f32.gmra.mrb[4].mxu1 %vm18020_vm7, %v16721_v49  ;;  %vm18035_vm7 = vmmov %vm17845_vm0  ;;  %v7964_v49 = vld [vmem:[#allocation2 + $0x11d] sm:$0xff] }
 0x507   : > { %13289 = vmatprep.mubr.msk.f32.mxu1 %vm18021_vm13, %v16725_v5  ;;  %vm18036_vm13 = vmmov %vm17845_vm0  ;;  %v7965_v5 = vld [vmem:[#allocation2 + $0x125] sm:$0xff] }
 0x50a   : > { %13290 = vmatmul.mubr.msk.f32.gmra.mrb[6].mxu1 %vm18022_vm5, %v16729_v46  ;;  %vm18037_vm5 = vmmov %vm17845_vm0  ;;  %v7967_v46 = vld [vmem:[#allocation2 + $0x135] sm:$0xff] }
 0x50b   : > { %13292 = vmatprep.mubr.msk.f32.mxu1 %vm18023_vm4, %v16733_v40  ;;  %vm18038_vm4 = vmmov %vm17845_vm0  ;;  %v7966_v40 = vld [vmem:[#allocation2 + $0x12d] sm:$0xff] }
 0x50e   : > { %13293 = vmatmul.mubr.msk.f32.gmra.mrb[8].mxu1 %vm18024_vm2, %v7090_v6  ;;  %vm18039_vm2 = vmmov %vm17845_vm0  ;;  %v7968_v6 = vld [vmem:[#allocation2 + $0x13d] sm:$0xff] }
 0x50f   : > { %13295 = vmatprep.mubr.msk.f32.mxu1 %vm18025_vm15, %v7091_v33  ;;  %vm18040_vm15 = vmmov %vm17845_vm0  ;;  %v8360_v33 = vld [vmem:[#allocation2 + $0x26] sm:$0xff] }
 0x512   : > { %13296 = vmatmul.mubr.msk.f32.gmra.mrb[10].mxu1 %vm17845_vm0, %v7092_v38  ;;  %v8361_v38 = vld [vmem:[#allocation2 + $0x2e] sm:$0xff] }
 0x513   : > { %13298 = vmatprep.mubr.msk.f32.mxu1 %vm18026_vm3, %v7093_v17  ;;  %vm18041_vm3 = vmmov %vm17845_vm0  ;;  %v8362_v17 = vld [vmem:[#allocation2 + $0x36] sm:$0xff] }
 0x516   : > { %13299 = vmatmul.mubr.msk.f32.gmra.mrb[12].mxu1 %vm18027_vm12, %v7094_v20  ;;  %vm18042_vm12 = vmmov %vm17845_vm0  ;;  %v8363_v20 = vld [vmem:[#allocation2 + $0x3e] sm:$0xff] }
 0x517   : > { %13301 = vmatprep.mubr.msk.f32.mxu1 %vm18028_vm14, %v7095_v28  ;;  %vm18043_vm14 = vmmov %vm17845_vm0  ;;  %v8364_v28 = vld [vmem:[#allocation2 + $0x46] sm:$0xff] }
 0x51a   : > { %13302 = vmatmul.mubr.msk.f32.gmra.mrb[14].mxu1 %vm18029_vm10, %v7096_v50  ;;  %vm18044_vm10 = vmmov %vm17845_vm0  ;;  %v8365_v50 = vld [vmem:[#allocation2 + $0x4e] sm:$0xff] }
 0x51b   : > { %13304 = vmatprep.mubr.msk.f32.mxu1 %vm18030_vm9, %v7097_v52  ;;  %vm18045_vm9 = vmmov %vm17845_vm0  ;;  %v8366_v52 = vld [vmem:[#allocation2 + $0x56] sm:$0xff] }
 0x51e   : > { %13305 = vmatmul.mubr.msk.f32.gmra.mrb[16].mxu1 %vm18031_vm6, %v7098_v32  ;;  %vm18046_vm6 = vmmov %vm17845_vm0  ;;  %v8367_v32 = vld [vmem:[#allocation2 + $0x5e] sm:$0xff] }
 0x51f   : > { %13307 = vmatprep.mubr.msk.f32.mxu1 %vm18032_vm1, %v7099_v48  ;;  %vm18047_vm1 = vmmov %vm17845_vm0  ;;  %v8368_v48 = vld [vmem:[#allocation2 + $0x66] sm:$0xff] }
 0x522   : > { %13308 = vmatmul.mubr.msk.f32.gmra.mrb[18].mxu1 %vm18033_vm8, %v7100_v53  ;;  %vm18048_vm8 = vmmov %vm17845_vm0  ;;  %v8369_v53 = vld [vmem:[#allocation2 + $0x6e] sm:$0xff] }
 0x523   : > { %13310 = vmatprep.mubr.msk.f32.mxu1 %vm18034_vm11, %v7101_v60  ;;  %vm18049_vm11 = vmmov %vm17845_vm0  ;;  %v8370_v60 = vld [vmem:[#allocation2 + $0x76] sm:$0xff] }
 0x526   : > { %13311 = vmatmul.mubr.msk.f32.gmra.mrb[20].mxu1 %vm18035_vm7, %v7102_v31  ;;  %vm18050_vm7 = vmmov %vm17845_vm0  ;;  %v8371_v31 = vld [vmem:[#allocation2 + $0x7e] sm:$0xff] }
 0x527   : > { %13313 = vmatprep.mubr.msk.f32.mxu1 %vm18036_vm13, %v7103_v14  ;;  %vm18051_vm13 = vmmov %vm17845_vm0  ;;  %v8372_v14 = vld [vmem:[#allocation2 + $0x86] sm:$0xff] }
 0x52a   : > { %13314 = vmatmul.mubr.msk.f32.gmra.mrb[22].mxu1 %vm18037_vm5, %v7104_v2  ;;  %vm18052_vm5 = vmmov %vm17845_vm0  ;;  %v8373_v2 = vld [vmem:[#allocation2 + $0x8e] sm:$0xff] }
 0x52b   : > { %13316 = vmatprep.mubr.msk.f32.mxu1 %vm18038_vm4, %v7105_v0  ;;  %vm18053_vm4 = vmmov %vm17845_vm0  ;;  %v8374_v0 = vld [vmem:[#allocation2 + $0x96] sm:$0xff] }
 0x52e   : > { %13317 = vmatmul.mubr.msk.f32.gmra.mrb[24].mxu1 %vm18039_vm2, %v7106_v30  ;;  %vm18054_vm2 = vmmov %vm17845_vm0  ;;  %v8375_v30 = vld [vmem:[#allocation2 + $0x9e] sm:$0xff] }
 0x52f   : > { %13319 = vmatprep.mubr.msk.f32.mxu1 %vm18040_vm15, %v7107_v19  ;;  %vm18055_vm15 = vmmov %vm17845_vm0  ;;  %v8376_v19 = vld [vmem:[#allocation2 + $0xa6] sm:$0xff] }
 0x532   : > { %13320 = vmatmul.mubr.msk.f32.gmra.mrb[26].mxu1 %vm17845_vm0, %v7108_v51  ;;  %v8377_v51 = vld [vmem:[#allocation2 + $0xae] sm:$0xff] }
 0x533   : > { %13322 = vmatprep.mubr.msk.f32.mxu1 %vm18041_vm3, %v7109_v26  ;;  %vm18056_vm3 = vmmov %vm17845_vm0  ;;  %v8378_v26 = vld [vmem:[#allocation2 + $0xb6] sm:$0xff] }
 0x536   : > { %13323 = vmatmul.mubr.msk.f32.gmra.mrb[28].mxu1 %vm18042_vm12, %v7110_v42  ;;  %vm18057_vm12 = vmmov %vm17845_vm0  ;;  %v8379_v42 = vld [vmem:[#allocation2 + $0xbe] sm:$0xff] }
 0x537   : > { %13325 = vmatprep.mubr.msk.f32.mxu1 %vm18043_vm14, %v7111_v1  ;;  %vm18058_vm14 = vmmov %vm17845_vm0  ;;  %v8380_v1 = vld [vmem:[#allocation2 + $0xc6] sm:$0xff] }
 0x53a   : > { %13326 = vmatmul.mubr.msk.f32.gmra.mrb[30].mxu1 %vm18044_vm10, %v7112_v10  ;;  %vm18059_vm10 = vmmov %vm17845_vm0  ;;  %v8381_v10 = vld [vmem:[#allocation2 + $0xce] sm:$0xff] }
 0x53b   : > { %13328 = vmatprep.mubr.msk.f32.mxu1 %vm18045_vm9, %v7113_v37  ;;  %vm18060_vm9 = vmmov %vm17845_vm0  ;;  %v8382_v37 = vld [vmem:[#allocation2 + $0xd6] sm:$0xff] }
 0x53e   : > { %13329 = vmatmul.mubr.msk.f32.gmra.mrb[32].mxu1 %vm18046_vm6, %v7114_v21  ;;  %vm18061_vm6 = vmmov %vm17845_vm0  ;;  %v8383_v21 = vld [vmem:[#allocation2 + $0xde] sm:$0xff] }
 0x53f   : > { %13331 = vmatprep.mubr.msk.f32.mxu1 %vm18047_vm1, %v7540_v24  ;;  %vm18062_vm1 = vmmov %vm17845_vm0  ;;  %v8385_v24 = vld [vmem:[#allocation2 + $0xee] sm:$0xff] }
 0x542   : > { %13332 = vmatmul.mubr.msk.f32.gmra.mrb[34].mxu1 %vm18048_vm8, %v7541_v29  ;;  %vm18063_vm8 = vmmov %vm17845_vm0  ;;  %v8386_v29 = vld [vmem:[#allocation2 + $0xf6] sm:$0xff] }
 0x543   : > { %13336 = vmatprep.mubr.msk.f32.mxu1 %vm18049_vm11, %v7933_v9  ;;  %vm18064_vm11 = vmmov %vm17845_vm0  ;;  %v8387_v9 = vld [vmem:[#allocation2 + $0xfe] sm:$0xff] }
 0x546   : > { %13337 = vmatmul.mubr.msk.f32.vlgmr.msra.gmra.mrb[0].mxu1 %vm18050_vm7, %v7934_v13  ;;  %vm18065_vm7 = vmmov %vm17845_vm0  ;;  %v8388_v13 = vld [vmem:[#allocation2 + $0x106] sm:$0xff] }
 0x547   : > { %13391 = vmatpush3.msra.mxu1 %v11697_v41  ;;  %13339 = vmatprep.mubr.msk.f32.mxu1 %vm18051_vm13, %v7935_v55  ;;  %vm18066_vm13 = vmmov %vm17845_vm0  ;;  %v8384_v41 = vld [vmem:[#allocation2 + $0xe6] sm:$0xff]  ;;  %v8389_v55 = vld [vmem:[#allocation2 + $0x10e] sm:$0xff] }
 0x54a   : > { %13340 = vmatmul.mubr.msk.f32.gmra.mrb[2].mxu1 %vm18052_vm5, %v7936_v23  ;;  %vm18067_vm5 = vmmov %vm17845_vm0  ;;  %v8390_v23 = vld [vmem:[#allocation2 + $0x116] sm:$0xff] }
 0x54b   : > { %13342 = vmatprep.mubr.msk.f32.mxu1 %vm18053_vm4, %v7937_v54  ;;  %vm18068_vm4 = vmmov %vm17845_vm0  ;;  %v8391_v54 = vld [vmem:[#allocation2 + $0x11e] sm:$0xff] }
 0x54e   : > { %13343 = vmatmul.mubr.msk.f32.gmra.mrb[4].mxu1 %vm18054_vm2, %v7938_v47  ;;  %vm18069_vm2 = vmmov %vm17845_vm0  ;;  %v8392_v47 = vld [vmem:[#allocation2 + $0x126] sm:$0xff] }
 0x54f   : > { %13345 = vmatprep.mubr.msk.f32.mxu1 %vm18055_vm15, %v7939_v27  ;;  %vm18070_vm15 = vmmov %vm17845_vm0  ;;  %v8394_v27 = vld [vmem:[#allocation2 + $0x136] sm:$0xff] }
 0x552   : > { %13346 = vmatmul.mubr.msk.f32.gmra.mrb[6].mxu1 %vm17845_vm0, %v7940_v18  ;;  %v8393_v18 = vld [vmem:[#allocation2 + $0x12e] sm:$0xff] }
 0x553   : > { %13348 = vmatprep.mubr.msk.f32.mxu1 %vm18056_vm3, %v7941_v43  ;;  %vm18071_vm3 = vmmov %vm17845_vm0  ;;  %v8395_v43 = vld [vmem:[#allocation2 + $0x13e] sm:$0xff] }
 0x556   : > { %13349 = vmatmul.mubr.msk.f32.gmra.mrb[8].mxu1 %vm18057_vm12, %v7942_v39  ;;  %vm18072_vm12 = vmmov %vm17845_vm0  ;;  %v14291_v39 = vmov 1983009808  }
 0x557   : > { %13351 = vmatprep.mubr.msk.f32.mxu1 %vm18058_vm14, %v7943_v59  ;;  %vm18073_vm14 = vmmov %vm17845_vm0  ;;  %v8861_v59 = vunpack.c.l.s4 %v14291_v39 }
 0x55a   : > { %13352 = vmatmul.mubr.msk.f32.gmra.mrb[10].mxu1 %vm18059_vm10, %v7944_v56  ;;  %vm18074_vm10 = vmmov %vm17845_vm0  ;;  %v8862_v56 = vunpack.c.0.s8 %v8861_v59 }
 0x55b   : > { %13354 = vmatprep.mubr.msk.f32.mxu1 %vm18060_vm9, %v7945_v58  ;;  %vm18075_vm9 = vmmov %vm17845_vm0  ;;  %v16886_v58 = vld [vmem:[%s17558_s4] ss:$0 sm:$0xff] }
 0x55e   : > { %13355 = vmatmul.mubr.msk.f32.gmra.mrb[12].mxu1 %vm18061_vm6, %v7946_v34  ;;  %vm18076_vm6 = vmmov %vm17845_vm0 }
 0x55f   : > { %13357 = vmatprep.mubr.msk.f32.mxu1 %vm18062_vm1, %v7947_v57  ;;  %vm18077_vm1 = vmmov %vm17845_vm0  ;;  %v14292_v57 = vmov 1934713408  }
 0x562   : > { %13358 = vmatmul.mubr.msk.f32.gmra.mrb[14].mxu1 %vm18063_vm8, %v7948_v16  ;;  %vm18078_vm8 = vmmov %vm17845_vm0  ;;  %v9593_v16 = vunpack.c.l.s4 %v14292_v57 }
 0x563   : > { %13360 = vmatprep.mubr.msk.f32.mxu1 %vm18064_vm11, %v7949_v63  ;;  %vm18079_vm11 = vmmov %vm17845_vm0 }
 0x566   : > { %13361 = vmatmul.mubr.msk.f32.gmra.mrb[16].mxu1 %vm18065_vm7, %v7950_v44  ;;  %vm18080_vm7 = vmmov %vm17845_vm0  ;;  %v16890_v44 = vsub.s32 %v8862_v56, %v15124_v15 }
 0x567   : > { %13363 = vmatprep.mubr.msk.f32.mxu1 %vm18066_vm13, %v7951_v7  ;;  %vm18081_vm13 = vmmov %vm17845_vm0 }
 0x56a   : > { %13364 = vmatmul.mubr.msk.f32.gmra.mrb[18].mxu1 %vm18067_vm5, %v7952_v45  ;;  %vm18082_vm5 = vmmov %vm17845_vm0 }
 0x56b   : > { %13366 = vmatprep.mubr.msk.f32.mxu1 %vm18068_vm4, %v7953_v11  ;;  %vm18083_vm4 = vmmov %vm17845_vm0 }
 0x56e   : > { %13367 = vmatmul.mubr.msk.f32.gmra.mrb[20].mxu1 %vm18069_vm2, %v7954_v36  ;;  %vm18084_vm2 = vmmov %vm17845_vm0 }
 0x56f   : > { %13369 = vmatprep.mubr.msk.f32.mxu1 %vm18070_vm15, %v7955_v35  ;;  %vm18085_vm15 = vmmov %vm17845_vm0 }
 0x572   : > { %13370 = vmatmul.mubr.msk.f32.gmra.mrb[22].mxu1 %vm17845_vm0, %v7956_v62  ;;  %v9594_v62 = vunpack.c.0.s8 %v9593_v16 }
 0x573   : > { %13372 = vmatprep.mubr.msk.f32.mxu1 %vm18071_vm3, %v7957_v61  ;;  %vm18086_vm3 = vmmov %vm17845_vm0 }
 0x576   : > { %13373 = vmatmul.mubr.msk.f32.gmra.mrb[24].mxu1 %vm18072_vm12, %v7958_v8  ;;  %vm18087_vm12 = vmmov %vm17845_vm0 }
 0x577   : > { %13375 = vmatprep.mubr.msk.f32.mxu1 %vm18073_vm14, %v7959_v12  ;;  %vm18088_vm14 = vmmov %vm17845_vm0 }
 0x57a   : > { %13376 = vmatmul.mubr.msk.f32.gmra.mrb[26].mxu1 %vm18074_vm10, %v7960_v22  ;;  %vm18089_vm10 = vmmov %vm17845_vm0 }
 0x57b   : > { %13378 = vmatprep.mubr.msk.f32.mxu1 %vm18075_vm9, %v7961_v3  ;;  %vm18090_vm9 = vmmov %vm17845_vm0 }
 0x57e   : > { %13379 = vmatmul.mubr.msk.f32.gmra.mrb[28].mxu1 %vm18076_vm6, %v7962_v25  ;;  %vm18091_vm6 = vmmov %vm17845_vm0 }
 0x57f   : > { %13381 = vmatprep.mubr.msk.f32.mxu1 %vm18077_vm1, %v7963_v4  ;;  %vm18092_vm1 = vmmov %vm17845_vm0 }
 0x582   : > { %13382 = vmatmul.mubr.msk.f32.gmra.mrb[30].mxu1 %vm18078_vm8, %v7964_v49  ;;  %vm18093_vm8 = vmmov %vm17845_vm0 }
 0x583   : > { %13384 = vmatprep.mubr.msk.f32.mxu1 %vm18079_vm11, %v7965_v5  ;;  %vm18094_vm11 = vmmov %vm17845_vm0 }
 0x586   : > { %13385 = vmatmul.mubr.msk.f32.gmra.mrb[32].mxu1 %vm18080_vm7, %v7966_v40  ;;  %vm18095_vm7 = vmmov %vm17845_vm0 }
 0x587   : > { %13387 = vmatprep.mubr.msk.f32.mxu1 %vm18081_vm13, %v7967_v46  ;;  %vm18096_vm13 = vmmov %vm17845_vm0 }
 0x58a   : > { %13388 = vmatmul.mubr.msk.f32.gmra.mrb[34].mxu1 %vm18082_vm5, %v7968_v6  ;;  %vm18097_vm5 = vmmov %vm17845_vm0  ;;  %v16900_v6 = vsub.s32 %v9594_v62, %v15124_v15 }
 0x58b   : > { %13392 = vmatprep.mubr.msk.f32.mxu1 %vm18083_vm4, %v8360_v33  ;;  %vm18098_vm4 = vmmov %vm17845_vm0 }
 0x58e   : > { %13393 = vmatmul.mubr.msk.f32.vlgmr.msra.gmra.mrb[0].mxu1 %vm18084_vm2, %v8361_v38  ;;  %vm18099_vm2 = vmmov %vm17845_vm0 }
 0x58f   : > { %13395 = vmatprep.mubr.msk.f32.mxu1 %vm18085_vm15, %v8362_v17  ;;  %vm18100_vm15 = vmmov %vm17845_vm0 }
 0x592   : > { %13396 = vmatmul.mubr.msk.f32.gmra.mrb[2].mxu1 %vm17845_vm0, %v8363_v20 }
 0x593   : > { %13398 = vmatprep.mubr.msk.f32.mxu1 %vm18086_vm3, %v8364_v28  ;;  %vm18101_vm3 = vmmov %vm17845_vm0 }
 0x596   : > { %13399 = vmatmul.mubr.msk.f32.gmra.mrb[4].mxu1 %vm18087_vm12, %v8365_v50  ;;  %vm18102_vm12 = vmmov %vm17845_vm0 }
 0x597   : > { %13401 = vmatprep.mubr.msk.f32.mxu1 %vm18088_vm14, %v8366_v52  ;;  %vm18103_vm14 = vmmov %vm17845_vm0 }
 0x59a   : > { %13402 = vmatmul.mubr.msk.f32.gmra.mrb[6].mxu1 %vm18089_vm10, %v8367_v32  ;;  %vm18104_vm10 = vmmov %vm17845_vm0 }
 0x59b   : > { %13404 = vmatprep.mubr.msk.f32.mxu1 %vm18090_vm9, %v8368_v48  ;;  %vm18105_vm9 = vmmov %vm17845_vm0 }
 0x59e   : > { %13405 = vmatmul.mubr.msk.f32.gmra.mrb[8].mxu1 %vm18091_vm6, %v8369_v53  ;;  %vm18106_vm6 = vmmov %vm17845_vm0 }
 0x59f   : > { %13407 = vmatprep.mubr.msk.f32.mxu1 %vm18092_vm1, %v8370_v60  ;;  %vm18107_vm1 = vmmov %vm17845_vm0 }
 0x5a2   : > { %13408 = vmatmul.mubr.msk.f32.gmra.mrb[10].mxu1 %vm18093_vm8, %v8371_v31  ;;  %vm18108_vm8 = vmmov %vm17845_vm0 }
 0x5a3   : > { %13410 = vmatprep.mubr.msk.f32.mxu1 %vm18094_vm11, %v8372_v14  ;;  %vm18109_vm11 = vmmov %vm17845_vm0 }
 0x5a6   : > { %13411 = vmatmul.mubr.msk.f32.gmra.mrb[12].mxu1 %vm18095_vm7, %v8373_v2  ;;  %vm18110_vm7 = vmmov %vm17845_vm0 }
 0x5a7   : > { %13413 = vmatprep.mubr.msk.f32.mxu1 %vm18096_vm13, %v8374_v0  ;;  %vm18111_vm13 = vmmov %vm17845_vm0 }
 0x5aa   : > { %13414 = vmatmul.mubr.msk.f32.gmra.mrb[14].mxu1 %vm18097_vm5, %v8375_v30  ;;  %vm18112_vm5 = vmmov %vm17845_vm0 }
 0x5ab   : > { %13416 = vmatprep.mubr.msk.f32.mxu1 %vm18098_vm4, %v8376_v19  ;;  %vm18113_vm4 = vmmov %vm17845_vm0 }
 0x5ae   : > { %13417 = vmatmul.mubr.msk.f32.gmra.mrb[16].mxu1 %vm18099_vm2, %v8377_v51  ;;  %vm18114_vm2 = vmmov %vm17845_vm0 }
 0x5af   : > { %13419 = vmatprep.mubr.msk.f32.mxu1 %vm18100_vm15, %v8378_v26  ;;  %vm18115_vm15 = vmmov %vm17845_vm0 }
 0x5b2   : > { %13420 = vmatmul.mubr.msk.f32.gmra.mrb[18].mxu1 %vm17845_vm0, %v8379_v42 }
 0x5b3   : > { %13422 = vmatprep.mubr.msk.f32.mxu1 %vm18101_vm3, %v8380_v1  ;;  %vm18148_vm3 = vmmov %vm17845_vm0 }
 0x5b6   : > { %13423 = vmatmul.mubr.msk.f32.gmra.mrb[20].mxu1 %vm18102_vm12, %v8381_v10  ;;  %vm10933_vm12 = vcmask 130048  }
 0x5b7   : > { %13425 = vmatprep.mubr.msk.f32.mxu1 %vm18103_vm14, %v8382_v37  ;;  %vm10936_vm14 = vcmask 195584  }
 0x5ba   : > { %13426 = vmatmul.mubr.msk.f32.gmra.mrb[22].mxu1 %vm18104_vm10, %v8383_v21  ;;  %vm10939_vm10 = vcmask 261120  }
 0x5bb   : > { %13428 = vmatprep.mubr.msk.f32.mxu1 %vm18105_vm9, %v8384_v41  ;;  %vm10942_vm9 = vcmask 326656  }
 0x5be   : > { %13429 = vmatmul.mubr.msk.f32.gmra.mrb[24].mxu1 %vm18106_vm6, %v8385_v24  ;;  %vm10945_vm6 = vcmask 392192  }
 0x5bf   : > { %13431 = vmatprep.mubr.msk.f32.mxu1 %vm18107_vm1, %v8386_v29  ;;  %vm10948_vm1 = vcmask 457728  }
 0x5c2   : > { %13432 = vmatmul.mubr.msk.f32.gmra.mrb[26].mxu1 %vm18108_vm8, %v8387_v9  ;;  %vm10951_vm8 = vcmask 523264  }
 0x5c3   : > { %13434 = vmatprep.mubr.msk.f32.mxu1 %vm18109_vm11, %v8388_v13  ;;  %vm10954_vm11 = vcmask 588800  }
 0x5c6   : > { %13435 = vmatmul.mubr.msk.f32.gmra.mrb[28].mxu1 %vm18110_vm7, %v8389_v55  ;;  %vm10957_vm7 = vcmask 654336  }
 0x5c7   : > { %13437 = vmatprep.mubr.msk.f32.mxu1 %vm18111_vm13, %v8390_v23  ;;  %vm10960_vm13 = vcmask 719872  }
 0x5ca   : > { %13438 = vmatmul.mubr.msk.f32.gmra.mrb[30].mxu1 %vm18112_vm5, %v8391_v54  ;;  %vm10963_vm5 = vcmask 785408  }
 0x5cb   : > { %13440 = vmatprep.mubr.msk.f32.mxu1 %vm18113_vm4, %v8392_v47  ;;  %vm10966_vm4 = vcmask 850944  }
 0x5ce   : > { %13441 = vmatmul.mubr.msk.f32.gmra.mrb[32].mxu1 %vm18114_vm2, %v8393_v18  ;;  %vm10969_vm2 = vcmask 916480  }
 0x5cf   : > { %13443 = vmatprep.mubr.msk.f32.mxu1 %vm18115_vm15, %v8394_v27  ;;  %vm10972_vm15 = vcmask 982016  }
 0x5d2   : > { %13444 = vmatmul.mubr.msk.f32.gmra.mrb[34].mxu1 %vm17845_vm0, %v8395_v43 }
 0x661   : > { %v13394_v34 = vpop.f32.mrb[0].mxu1 }
 0x662   : > { %v13482_v63 = vadd.f32 %v13394_v34, %v16886_v58  ;;  %v8572_v7 = vpop.f32.mrb[1].mxu1 }
 0x663   : > { %v13483_v45 = vadd.f32 %v16886_v58, %v8572_v7 }
 0x664   : > { %v8788_v11 = vmax.f32 %v13482_v63, 0.0 }
 0x665   : > { %v8787_v36 = vmax.f32 %v13483_v45, 0.0  ;;  %v13397_v35 = vpop.f32.mrb[2].mxu1 }
 0x666   : > { %v8876_v61 = vcombine.high %v8788_v11, %v8788_v11  ;;  %v8883_v8 = vrot.slane %v8788_v11, %v16890_v44  ;;  %v13484_v12 = vadd.f32 %v13397_v35, %v16886_v58  ;;  %v8582_v22 = vpop.f32.mrb[3].mxu1 }
 0x667   : > { %v8859_v3 = vcombine.high %v8787_v36, %v8787_v36  ;;  %v8866_v25 = vrot.slane %v8787_v36, %v16890_v44  ;;  %v13485_v4 = vadd.f32 %v16886_v58, %v8582_v22 }
 0x668   : > { %v8890_v49 = vrot.slane %v8876_v61, %v16890_v44  ;;  %v8790_v5 = vmax.f32 %v13484_v12, 0.0  ;;  %v8891_v46 = vcombine.high %v8883_v8, %v8883_v8 }
 0x669   : > { %v8873_v40 = vrot.slane %v8859_v3, %v16890_v44  ;;  %v8789_v33 = vmax.f32 %v13485_v4, 0.0  ;;  %v13400_v38 = vpop.f32.mrb[4].mxu1  ;;  %v8874_v17 = vcombine.high %v8866_v25, %v8866_v25 }
 0x66a   : > { %v8910_v20 = vcombine.high %v8790_v5, %v8790_v5  ;;  %v8917_v28 = vrot.slane %v8790_v5, %v16890_v44  ;;  %v13486_v50 = vadd.f32 %v13400_v38, %v16886_v58  ;;  %v8592_v52 = vpop.f32.mrb[5].mxu1  ;;  %v8892_v2 = vcombine.high %v8890_v49, %v8890_v49 }
 0x66b   : > { %v8875_v32 = vcombine.high %v8873_v40, %v8873_v40  ;;  %v8893_v48 = vcombine.high %v8789_v33, %v8789_v33  ;;  %v8900_v53 = vrot.slane %v8789_v33, %v16890_v44  ;;  %v13487_v60 = vadd.f32 %v16886_v58, %v8592_v52 }
 0x66c   : > { %v8924_v31 = vrot.slane %v8910_v20, %v16890_v44  ;;  %v8925_v14 = vcombine.high %v8917_v28, %v8917_v28  ;;  %v8792_v15 = vmax.f32 %v13486_v50, 0.0 }
 0x66d   : > { %v9807_v0 = vcombine.low %v8875_v32, %v8917_v28  ;;  %v8907_v30 = vrot.slane %v8893_v48, %v16890_v44  ;;  %v8908_v19 = vcombine.high %v8900_v53, %v8900_v53  ;;  %v8791_v51 = vmax.f32 %v13487_v60, 0.0  ;;  %v13403_v26 = vpop.f32.mrb[6].mxu1 }
 0x66e   : > { %v8926_v42 = vcombine.high %v8924_v31, %v8924_v31  ;;  %v9879_v1 = vcombine.low %v8883_v8, %v8925_v14  ;;  %v9951_v10 = vcombine.low %v8891_v46, %v8924_v31  ;;  %v8943_v37 = vcombine.high %v8792_v15, %v8792_v15  ;;  %v8602_v21 = vpop.f32.mrb[7].mxu1 }
 0x66f   : > { %v16909_v41 = vrot.slane %v9807_v0, %v16900_v6  ;;  %v8909_v24 = vcombine.high %v8907_v30, %v8907_v30  ;;  %v9591_v29 = vcombine.low %v8866_v25, %v8908_v19  ;;  %v9663_v9 = vcombine.low %v8874_v17, %v8907_v30 }
 0x670   : > { %v16912_v13 = vrot.slane %v9879_v1, %v16900_v6  ;;  %v16915_v55 = vrot.slane %v9951_v10, %v16900_v6  ;;  %v16917_v23 = vcombine.low %v8890_v49, %v8926_v42  ;;  %v8950_v54 = vrot.slane %v8792_v15, %v16890_v44 }
 0x671   : > { %v16920_v47 = vcombine.low %v8873_v40, %v8909_v24  ;;  %v8957_v27 = vrot.slane %v8943_v37, %v16890_v44  ;;  %v8927_v18 = vcombine.high %v8791_v51, %v8791_v51  ;;  %v8934_v43 = vrot.slane %v8791_v51, %v16890_v44  ;;  %v13406_v39 = vpop.f32.mrb[8].mxu1 }
 0x672   : > { %v8958_v59 = vcombine.high %v8950_v54, %v8950_v54  ;;  %v13488_v56 = vadd.f32 %v13403_v26, %v16886_v58  ;;  %v13489_v34 = vadd.f32 %v16886_v58, %v8602_v21  ;;  %v13490_v57 = vadd.f32 %v13406_v39, %v16886_v58  ;;  %v8612_v16 = vpop.f32.mrb[9].mxu1 }
 0x673   : > { %v8941_v63 = vrot.slane %v8927_v18, %v16890_v44  ;;  %v10095_v7 = vcombine.low %v8892_v2, %v8934_v43  ;;  %v13491_v45 = vadd.f32 %v16886_v58, %v8612_v16  ;;  %v8959_v11 = vcombine.high %v8957_v27, %v8957_v27 }
 0x674   : > { %v8794_v36 = vmax.f32 %v13488_v56, 0.0  ;;  %v8793_v35 = vmax.f32 %v13489_v34, 0.0  ;;  %v8796_v62 = vmax.f32 %v13490_v57, 0.0  ;;  %v16930_v61 = vrot.slane %v9591_v29, %v16900_v6 }
 0x675   : > { %v16933_v8 = vrot.slane %v10095_v7, %v16900_v6  ;;  %v8942_v12 = vcombine.high %v8941_v63, %v8941_v63  ;;  %v8795_v22 = vmax.f32 %v13491_v45, 0.0  ;;  %v13409_v3 = vpop.f32.mrb[10].mxu1  ;;  %v16936_v25 = vrot.slane %v9663_v9, %v16900_v6 }
 0x676   : > { %18116 = vst [vmem:[#allocation6_spill] sm:$0xff] %v16930_v61  ;;  %v8977_v4 = vcombine.high %v8794_v36, %v8794_v36  ;;  %v8984_v49 = vrot.slane %v8794_v36, %v16890_v44  ;;  %v8960_v5 = vcombine.high %v8793_v35, %v8793_v35  ;;  %v8967_v46 = vrot.slane %v8793_v35, %v16890_v44  ;;  %v8622_v40 = vpop.f32.mrb[11].mxu1 }
 0x677   : > { %18117 = vst [vmem:[#allocation7_spill] sm:$0xff] %v16933_v8  ;;  %v9010_v33 = vcombine.high %v8796_v62, %v8796_v62  ;;  %v9017_v38 = vrot.slane %v8796_v62, %v16890_v44  ;;  %v8994_v17 = vcombine.high %v8795_v22, %v8795_v22  ;;  %v9001_v20 = vrot.slane %v8795_v22, %v16890_v44 }
 0x678   : > { %v8991_v28 = vrot.slane %v8977_v4, %v16890_v44  ;;  %v8992_v50 = vcombine.high %v8984_v49, %v8984_v49  ;;  %v9672_v52 = vcombine.low %v8942_v12, %v8984_v49  ;;  %v8974_v32 = vrot.slane %v8960_v5, %v16890_v44 }
 0x679   : > { %v8975_v48 = vcombine.high %v8967_v46, %v8967_v46  ;;  %v9024_v53 = vrot.slane %v9010_v33, %v16890_v44  ;;  %v9025_v60 = vcombine.high %v9017_v38, %v9017_v38  ;;  %v9008_v31 = vrot.slane %v8994_v17, %v16890_v44  ;;  %v13412_v14 = vpop.f32.mrb[12].mxu1 }
 0x67a   : > { %v8993_v15 = vcombine.high %v8991_v28, %v8991_v28  ;;  %v16947_v2 = vrot.slane %v9672_v52, %v16900_v6  ;;  %v9744_v0 = vcombine.low %v8950_v54, %v8992_v50  ;;  %v9816_v30 = vcombine.low %v8958_v59, %v8991_v28  ;;  %v8632_v19 = vpop.f32.mrb[13].mxu1 }
 0x67b   : > { %v8976_v51 = vcombine.high %v8974_v32, %v8974_v32  ;;  %v9009_v26 = vcombine.high %v9001_v20, %v9001_v20  ;;  %v9960_v42 = vcombine.low %v8959_v11, %v9001_v20  ;;  %v10104_v1 = vcombine.low %v8975_v48, %v9008_v31 }
 0x67c   : > { %v16950_v10 = vrot.slane %v9744_v0, %v16900_v6  ;;  %v16953_v37 = vrot.slane %v9816_v30, %v16900_v6  ;;  %v16955_v21 = vcombine.low %v8957_v27, %v8993_v15  ;;  %v13492_v24 = vadd.f32 %v13409_v3, %v16886_v58 }
 0x67d   : > { %v9600_v29 = vcombine.low %v8941_v63, %v8976_v51  ;;  %v16959_v9 = vrot.slane %v9960_v42, %v16900_v6  ;;  %v10032_v54 = vcombine.low %v8967_v46, %v9009_v26  ;;  %v16962_v18 = vrot.slane %v10104_v1, %v16900_v6  ;;  %v13415_v43 = vpop.f32.mrb[14].mxu1 }
 0x67e   : > { %v8798_v39 = vmax.f32 %v13492_v24, 0.0  ;;  %v13493_v59 = vadd.f32 %v16886_v58, %v8622_v40  ;;  %v13494_v56 = vadd.f32 %v13412_v14, %v16886_v58  ;;  %v13495_v34 = vadd.f32 %v16886_v58, %v8632_v19  ;;  %v8642_v27 = vpop.f32.mrb[15].mxu1 }
 0x67f   : > { %18118 = vst [vmem:[#allocation8_spill] sm:$0xff] %v16962_v18  ;;  %v16968_v57 = vrot.slane %v10032_v54, %v16900_v6  ;;  %v9026_v16 = vcombine.high %v9024_v53, %v9024_v53  ;;  %v13496_v63 = vadd.f32 %v13415_v43, %v16886_v58  ;;  %v13497_v7 = vadd.f32 %v16886_v58, %v8642_v27 }
 0x680   : > { %v9044_v45 = vcombine.high %v8798_v39, %v8798_v39  ;;  %v9051_v11 = vrot.slane %v8798_v39, %v16890_v44  ;;  %v8797_v36 = vmax.f32 %v13493_v59, 0.0  ;;  %v8800_v35 = vmax.f32 %v13494_v56, 0.0 }
 0x681   : > { %18119 = vst [vmem:[#allocation9_spill] sm:$0xff] %v16968_v57  ;;  %v8799_v62 = vmax.f32 %v13495_v34, 0.0  ;;  %v8802_v12 = vmax.f32 %v13496_v63, 0.0  ;;  %v8801_v22 = vmax.f32 %v13497_v7, 0.0  ;;  %v13418_v3 = vpop.f32.mrb[16].mxu1  ;;  %v16974_v4 = vrot.slane %v9600_v29, %v16900_v6 }
 0x682   : > { %v9058_v49 = vrot.slane %v9044_v45, %v16890_v44  ;;  %v9059_v5 = vcombine.high %v9051_v11, %v9051_v11  ;;  %v9027_v46 = vcombine.high %v8797_v36, %v8797_v36  ;;  %v9034_v40 = vrot.slane %v8797_v36, %v16890_v44  ;;  %v8652_v33 = vpop.f32.mrb[17].mxu1 }
 0x683   : > { %18120 = vst [vmem:[#allocation10_spill] sm:$0xff] %v16974_v4  ;;  %v9078_v17 = vcombine.high %v8800_v35, %v8800_v35  ;;  %v9085_v20 = vrot.slane %v8800_v35, %v16890_v44  ;;  %v9061_v28 = vcombine.high %v8799_v62, %v8799_v62  ;;  %v9068_v50 = vrot.slane %v8799_v62, %v16890_v44 }
 0x684   : > { %v9060_v52 = vcombine.high %v9058_v49, %v9058_v49  ;;  %v9609_v32 = vcombine.low %v9017_v38, %v9059_v5  ;;  %v16980_v48 = vcombine.low %v9025_v60, %v9058_v49  ;;  %v9041_v31 = vrot.slane %v9027_v46, %v16890_v44 }
 0x685   : > { %v9042_v14 = vcombine.high %v9034_v40, %v9034_v40  ;;  %v9092_v15 = vrot.slane %v9078_v17, %v16890_v44  ;;  %v9075_v0 = vrot.slane %v9061_v28, %v16890_v44  ;;  %v9076_v30 = vcombine.high %v9068_v50, %v9068_v50  ;;  %v13421_v19 = vpop.f32.mrb[18].mxu1 }
 0x686   : > { %v16985_v51 = vcombine.low %v9024_v53, %v9060_v52  ;;  %v9043_v26 = vcombine.high %v9041_v31, %v9041_v31  ;;  %v9825_v42 = vcombine.low %v9026_v16, %v9068_v50  ;;  %v9111_v1 = vcombine.high %v8802_v12, %v8802_v12  ;;  %v8662_v24 = vpop.f32.mrb[19].mxu1 }
 0x687   : > { %v9077_v29 = vcombine.high %v9075_v0, %v9075_v0  ;;  %v9897_v54 = vcombine.low %v9034_v40, %v9076_v30  ;;  %v9969_v38 = vcombine.low %v9042_v14, %v9075_v0  ;;  %v9118_v60 = vrot.slane %v8802_v12, %v16890_v44 }
 0x688   : > { %v10113_v43 = vcombine.low %v9043_v26, %v9085_v20  ;;  %v16989_v39 = vrot.slane %v9825_v42, %v16900_v6  ;;  %v9125_v59 = vrot.slane %v9111_v1, %v16890_v44  ;;  %v9094_v56 = vcombine.high %v8801_v22, %v8801_v22 }
 0x689   : > { %v16993_v34 = vrot.slane %v9897_v54, %v16900_v6  ;;  %v16996_v53 = vrot.slane %v9969_v38, %v16900_v6  ;;  %v16998_v27 = vcombine.low %v9041_v31, %v9077_v29  ;;  %v9126_v16 = vcombine.high %v9118_v60, %v9118_v60  ;;  %v13424_v63 = vpop.f32.mrb[20].mxu1 }
 0x68a   : > { %v17001_v7 = vrot.slane %v10113_v43, %v16900_v6  ;;  %v9127_v45 = vcombine.high %v9125_v59, %v9125_v59  ;;  %v9101_v11 = vrot.slane %v8801_v22, %v16890_v44  ;;  %v9108_v36 = vrot.slane %v9094_v56, %v16890_v44  ;;  %v8672_v35 = vpop.f32.mrb[21].mxu1 }
 0x68b   : > { %v13498_v62 = vadd.f32 %v13418_v3, %v16886_v58  ;;  %v13499_v12 = vadd.f32 %v16886_v58, %v8652_v33  ;;  %v9093_v49 = vcombine.high %v9092_v15, %v9092_v15  ;;  %v13500_v5 = vadd.f32 %v13421_v19, %v16886_v58 }
 0x68c   : > { %18121 = vst [vmem:[#allocation11_spill] sm:$0xff] %v17001_v7  ;;  %v9618_v46 = vcombine.low %v9092_v15, %v9127_v45  ;;  %v9109_v40 = vcombine.high %v9101_v11, %v9101_v11  ;;  %v9110_v17 = vcombine.high %v9108_v36, %v9108_v36  ;;  %v13501_v20 = vadd.f32 %v16886_v58, %v8662_v24 }
 0x68d   : > { %v8804_v28 = vmax.f32 %v13498_v62, 0.0  ;;  %v8803_v50 = vmax.f32 %v13499_v12, 0.0  ;;  %v8806_v52 = vmax.f32 %v13500_v5, 0.0  ;;  %v13502_v22 = vadd.f32 %v13424_v63, %v16886_v58  ;;  %v13427_v31 = vpop.f32.mrb[22].mxu1 }
 0x68e   : > { %v8805_v14 = vmax.f32 %v13501_v20, 0.0  ;;  %v13503_v0 = vadd.f32 %v16886_v58, %v8672_v35  ;;  %v13504_v3 = vadd.f32 %v13427_v31, %v16886_v58  ;;  %v8682_v33 = vpop.f32.mrb[23].mxu1  ;;  %v17013_v30 = vrot.slane %v9609_v32, %v16900_v6 }
 0x68f   : > { %v9145_v15 = vcombine.high %v8804_v28, %v8804_v28  ;;  %v9152_v19 = vrot.slane %v8804_v28, %v16890_v44  ;;  %v9128_v26 = vcombine.high %v8803_v50, %v8803_v50  ;;  %v9135_v42 = vrot.slane %v8803_v50, %v16890_v44 }
 0x690   : > { %18122 = vst [vmem:[#allocation12_spill] sm:$0xff] %v17013_v30  ;;  %v9178_v1 = vcombine.high %v8806_v52, %v8806_v52  ;;  %v9185_v24 = vrot.slane %v8806_v52, %v16890_v44  ;;  %v9161_v29 = vcombine.high %v8805_v14, %v8805_v14  ;;  %v9168_v54 = vrot.slane %v8805_v14, %v16890_v44 }
 0x691   : > { %v9159_v38 = vrot.slane %v9145_v15, %v16890_v44  ;;  %v9160_v43 = vcombine.high %v9152_v19, %v9152_v19  ;;  %v9978_v59 = vcombine.low %v9110_v17, %v9152_v19  ;;  %v9142_v56 = vrot.slane %v9128_v26, %v16890_v44  ;;  %v13430_v32 = vpop.f32.mrb[24].mxu1 }
 0x692   : > { %v9143_v63 = vcombine.high %v9135_v42, %v9135_v42  ;;  %v9690_v45 = vcombine.low %v9093_v49, %v9135_v42  ;;  %v9192_v35 = vrot.slane %v9178_v1, %v16890_v44  ;;  %v9193_v62 = vcombine.high %v9185_v24, %v9185_v24  ;;  %v17022_v12 = vpop.f32.mrb[25].mxu1 }
 0x693   : > { %v17025_v5 = vrot.slane %v9978_v59, %v16900_v6  ;;  %v10050_v20 = vcombine.low %v9118_v60, %v9160_v43  ;;  %v10122_v28 = vcombine.low %v9126_v16, %v9159_v38  ;;  %v9144_v50 = vcombine.high %v9142_v56, %v9142_v56 }
 0x694   : > { %v17028_v52 = vrot.slane %v9690_v45, %v16900_v6  ;;  %v9762_v17 = vcombine.low %v9101_v11, %v9143_v63  ;;  %v9834_v31 = vcombine.low %v9109_v40, %v9142_v56  ;;  %v9175_v14 = vrot.slane %v9161_v29, %v16890_v44 }
 0x695   : > { %v17032_v49 = vrot.slane %v10050_v20, %v16900_v6  ;;  %v17035_v15 = vrot.slane %v10122_v28, %v16900_v6  ;;  %v17037_v19 = vcombine.low %v9108_v36, %v9144_v50  ;;  %v9176_v26 = vcombine.high %v9168_v54, %v9168_v54  ;;  %v17039_v42 = vpop.f32.mrb[26].mxu1 }
 0x696   : > { %v17042_v60 = vrot.slane %v9762_v17, %v16900_v6  ;;  %v17045_v16 = vrot.slane %v9834_v31, %v16900_v6  ;;  %v8808_v11 = vmax.f32 %v13502_v22, 0.0  ;;  %v9177_v40 = vcombine.high %v9175_v14, %v9175_v14  ;;  %v17047_v1 = vpop.f32.mrb[27].mxu1 }
 0x697   : > { %18123 = vst [vmem:[#allocation13_spill] sm:$0xff] %v17032_v49  ;;  %18124 = vst [vmem:[#allocation14_spill] sm:$0xff] %v17035_v15  ;;  %v8807_v29 = vmax.f32 %v13503_v0, 0.0  ;;  %v8810_v38 = vmax.f32 %v13504_v3, 0.0  ;;  %v13505_v43 = vadd.f32 %v16886_v58, %v8682_v33  ;;  %v9194_v59 = vcombine.high %v9192_v35, %v9192_v35 }
 0x698   : > { %v9212_v36 = vcombine.high %v8808_v11, %v8808_v11  ;;  %v9219_v56 = vrot.slane %v8808_v11, %v16890_v44  ;;  %v13506_v63 = vadd.f32 %v13430_v32, %v16886_v58  ;;  %v17053_v45 = vrot.slane %v9618_v46, %v16900_v6 }
 0x699   : > { %v9195_v20 = vcombine.high %v8807_v29, %v8807_v29  ;;  %v9202_v28 = vrot.slane %v8807_v29, %v16890_v44  ;;  %v9245_v22 = vcombine.high %v8810_v38, %v8810_v38  ;;  %v9252_v50 = vrot.slane %v8810_v38, %v16890_v44  ;;  %v17057_v17 = vpop.f32.mrb[28].mxu1 }
 0x69a   : > { %18125 = vst [vmem:[#allocation15_spill] sm:$0xff] %v17053_v45  ;;  %v9226_v0 = vrot.slane %v9212_v36, %v16890_v44  ;;  %v9227_v3 = vcombine.high %v9219_v56, %v9219_v56  ;;  %v9843_v33 = vcombine.low %v9177_v40, %v9219_v56  ;;  %v8809_v31 = vmax.f32 %v13505_v43, 0.0  ;;  %v17060_v7 = vpop.f32.mrb[29].mxu1 }
 0x69b   : > { %v9209_v32 = vrot.slane %v9195_v20, %v16890_v44  ;;  %v9210_v11 = vcombine.high %v9202_v28, %v9202_v28  ;;  %v17064_v46 = vrot.slane %v9245_v22, %v16890_v44  ;;  %v9260_v15 = vcombine.high %v9252_v50, %v9252_v50 }
 0x69c   : > { %v9228_v29 = vcombine.high %v9226_v0, %v9226_v0  ;;  %v17067_v8 = vrot.slane %v9843_v33, %v16900_v6  ;;  %v9915_v38 = vcombine.low %v9185_v24, %v9227_v3  ;;  %v9987_v18 = vcombine.low %v9193_v62, %v9226_v0 }
 0x69d   : > { %v9211_v49 = vcombine.high %v9209_v32, %v9209_v32  ;;  %v9627_v36 = vcombine.low %v9168_v54, %v9210_v11  ;;  %v9699_v57 = vcombine.low %v9176_v26, %v9209_v32  ;;  %v9229_v40 = vcombine.high %v8809_v31, %v8809_v31  ;;  %v17069_v43 = vpop.f32.mrb[30].mxu1 }
 0x69e   : > { %18126 = vst [vmem:[#allocation16_spill] sm:$0xff] %v17067_v8  ;;  %v17072_v56 = vrot.slane %v9915_v38, %v16900_v6  ;;  %v17075_v20 = vrot.slane %v9987_v18, %v16900_v6  ;;  %v17077_v28 = vcombine.low %v9192_v35, %v9228_v29  ;;  %v9236_v22 = vrot.slane %v8809_v31, %v16890_v44  ;;  %v17080_v33 = vpop.f32.mrb[31].mxu1 }
 0x69f   : > { %v17083_v24 = vrot.slane %v9627_v36, %v16900_v6  ;;  %v17086_v54 = vrot.slane %v9699_v57, %v16900_v6  ;;  %v17088_v62 = vcombine.low %v9175_v14, %v9211_v49  ;;  %v9243_v26 = vrot.slane %v9229_v40, %v16890_v44 }
 0x6a0   : > { %18127 = vst [vmem:[#allocation17_spill] sm:$0xff] %v17072_v56  ;;  %v10131_v0 = vcombine.low %v9194_v59, %v9236_v22  ;;  %v8812_v3 = vmax.f32 %v13506_v63, 0.0  ;;  %v11734_v35 = vcombine.high %v16930_v61, %v16974_v4  ;;  %v11735_v32 = vcombine.high %v17013_v30, %v17053_v45 }
 0x6a1   : > { %v9244_v31 = vcombine.high %v9243_v26, %v9243_v26  ;;  %v13507_v14 = vadd.f32 %v16886_v58, %v17022_v12  ;;  %v17101_v49 = vpop.f32.mrb[32].mxu1  ;;  %v9688_v22 = vrot.slane %v16980_v48, %v16900_v6  ;;  %v10267_v12 = vcombine.low %v16936_v25, %v16947_v2 }
 0x6a2   : > { %v17104_v59 = vrot.slane %v10131_v0, %v16900_v6  ;;  %v9279_v63 = vcombine.high %v8812_v3, %v8812_v3  ;;  %v9286_v11 = vrot.slane %v8812_v3, %v16890_v44  ;;  %v10227_v29 = vrot.slane %v11734_v35, %v16890_v44  ;;  %v17108_v38 = vpop.f32.mrb[33].mxu1 }
 0x6a3   : > { %v10234_v36 = vrot.slane %v11735_v32, %v16890_v44  ;;  %v8811_v40 = vmax.f32 %v13507_v14, 0.0  ;;  %v13508_v3 = vadd.f32 %v17039_v42, %v16886_v58  ;;  %v10268_v32 = vcombine.low %v9688_v22, %v17028_v52 }
 0x6a4   : > { %18128 = vst [vmem:[#allocation18_spill] sm:$0xff] %v17104_v59  ;;  %v9293_v57 = vrot.slane %v9279_v63, %v16890_v44  ;;  %v9294_v0 = vcombine.high %v9286_v11, %v9286_v11  ;;  %v9708_v18 = vcombine.low %v9244_v31, %v9286_v11  ;;  %v10275_v11 = vrot.slane %v10267_v12, %v16890_v44 }
 0x6a5   : > { %v10235_v45 = vcombine.low %v10227_v29, %v10234_v36  ;;  %v9262_v35 = vcombine.high %v8811_v40, %v8811_v40  ;;  %v9269_v30 = vrot.slane %v8811_v40, %v16890_v44  ;;  %v17120_v14 = vpop.f32.mrb[34].mxu1  ;;  %v10282_v29 = vrot.slane %v10268_v32, %v16890_v44 }
 0x6a6   : > { %v9295_v4 = vcombine.high %v9293_v57, %v9293_v57  ;;  %v17123_v48 = vrot.slane %v9708_v18, %v16900_v6  ;;  %v9780_v61 = vcombine.low %v9252_v50, %v9294_v0  ;;  %v9852_v56 = vcombine.low %v9260_v15, %v9293_v57  ;;  %v17125_v63 = vpop.f32.mrb[35].mxu1 }
 0x6a7   : > { %10253 = vrot.lane.b32.xlu0 %v10235_v45, %s14293_s26  ;;  %v9276_v42 = vrot.slane %v9262_v35, %v16890_v44  ;;  %v9277_v31 = vcombine.high %v9269_v30, %v9269_v30  ;;  %v8814_v50 = vmax.f32 %v13508_v3, 0.0  ;;  %v10283_v40 = vcombine.low %v10275_v11, %v10282_v29 }
 0x6a8   : > { %v17132_v36 = vrot.slane %v9780_v61, %v16900_v6  ;;  %v17135_v18 = vrot.slane %v9852_v56, %v16900_v6  ;;  %v17138_v15 = vcombine.low %v17064_v46, %v9295_v4  ;;  %v11738_v45 = vcombine.high %v16936_v25, %v16947_v2 }
 0x6a9   : > { %v9278_v57 = vcombine.high %v9276_v42, %v9276_v42  ;;  %v11739_v0 = vcombine.high %v9688_v22, %v17028_v52  ;;  %v9312_v12 = vcombine.high %v8814_v50, %v8814_v50  ;;  %v9319_v35 = vrot.slane %v8814_v50, %v16890_v44  ;;  %10301 = vrot.lane.b32.xlu1 %v10283_v40, %s14294_s30 }
 0x6aa   : > { %18129 = vst [vmem:[#allocation19_spill] sm:$0xff] %v17135_v18  ;;  %18130 = vst [vmem:[#allocation20_spill] sm:$0xff] %v17138_v15  ;;  %v13509_v61 = vadd.f32 %v16886_v58, %v17047_v1  ;;  %v9261_v56 = vcombine.high %v17064_v46, %v17064_v46  ;;  %v10323_v4 = vrot.slane %v11738_v45, %v16890_v44 }
 0x6ab   : > { %v9636_v32 = vcombine.low %v9243_v26, %v9278_v57  ;;  %v10330_v3 = vrot.slane %v11739_v0, %v16890_v44  ;;  %v13510_v25 = vadd.f32 %v17057_v17, %v16886_v58  ;;  %v17154_v2 = vrot.slane %v9312_v12, %v16890_v44 }
 0x6ac   : > { %v9327_v52 = vcombine.high %v9319_v35, %v9319_v35  ;;  %v8813_v22 = vmax.f32 %v13509_v61, 0.0  ;;  %v10651_v1 = vcombine.low %v16915_v55, %v16959_v9  ;;  %v10652_v11 = vcombine.low %v16996_v53, %v17025_v5 }
 0x6ad   : > { %v17159_v46 = vrot.slane %v9636_v32, %v16900_v6  ;;  %v10331_v26 = vcombine.low %v10323_v4, %v10330_v3  ;;  %v8816_v42 = vmax.f32 %v13510_v25, 0.0  ;;  %v13511_v57 = vadd.f32 %v16886_v58, %v17060_v7 }
 0x6ae   : > { %v9296_v29 = vcombine.high %v8813_v22, %v8813_v22  ;;  %v9303_v50 = vrot.slane %v8813_v22, %v16890_v44  ;;  %v10659_v17 = vrot.slane %v10651_v1, %v16890_v44  ;;  %v10666_v0 = vrot.slane %v10652_v11, %v16890_v44 }
 0x6af   : > { %10349 = vrot.lane.b32.xlu0 %v10331_v26, %s14295_s6  ;;  %v9346_v40 = vcombine.high %v8816_v42, %v8816_v42  ;;  %v9353_v45 = vrot.slane %v8816_v42, %v16890_v44  ;;  %v13512_v12 = vadd.f32 %v17069_v43, %v16886_v58  ;;  %v8815_v3 = vmax.f32 %v13511_v57, 0.0 }
 0x6b0   : > { %v9310_v61 = vrot.slane %v9296_v29, %v16890_v44  ;;  %v9311_v32 = vcombine.high %v9303_v50, %v9303_v50  ;;  %v9996_v4 = vcombine.low %v9261_v56, %v9303_v50  ;;  %v10667_v7 = vcombine.low %v10659_v17, %v10666_v0 }
 0x6b1   : > { %v9360_v25 = vrot.slane %v9346_v40, %v16890_v44  ;;  %v9361_v22 = vcombine.high %v9353_v45, %v9353_v45  ;;  %v8818_v1 = vmax.f32 %v13512_v12, 0.0  ;;  %v9329_v15 = vcombine.high %v8815_v3, %v8815_v3 }
 0x6b2   : > { %v17175_v26 = vrot.slane %v9996_v4, %v16900_v6  ;;  %v10068_v59 = vcombine.low %v9269_v30, %v9311_v32  ;;  %v10140_v42 = vcombine.low %v9277_v31, %v9310_v61  ;;  %v9336_v43 = vrot.slane %v8815_v3, %v16890_v44 }
 0x6b3   : > { %v9362_v11 = vcombine.high %v9360_v25, %v9360_v25  ;;  %v9645_v8 = vcombine.low %v9319_v35, %v9361_v22  ;;  %v9717_v18 = vcombine.low %v9327_v52, %v9360_v25  ;;  %10685 = vrot.lane.b32.xlu0 %v10667_v7, %s14296_s7  ;;  %v9343_v50 = vrot.slane %v9329_v15, %v16890_v44 }
 0x6b4   : > { %v17180_v56 = vrot.slane %v10068_v59, %v16900_v6  ;;  %v17183_v29 = vrot.slane %v10140_v42, %v16900_v6  ;;  %v9380_v17 = vcombine.high %v8818_v1, %v8818_v1  ;;  %v9344_v52 = vcombine.high %v9336_v43, %v9336_v43 }
 0x6b5   : > { %v17187_v30 = vrot.slane %v9645_v8, %v16900_v6  ;;  %v17190_v31 = vrot.slane %v9717_v18, %v16900_v6  ;;  %v17193_v35 = vcombine.low %v17154_v2, %v9362_v11  ;;  %v9345_v57 = vcombine.high %v9343_v50, %v9343_v50 }
 0x6b6   : > { %v9387_v59 = vrot.slane %v8818_v1, %v16890_v44  ;;  %v17197_v40 = vrot.slane %v9380_v17, %v16890_v44  ;;  %v11754_v15 = vcombine.high %v16915_v55, %v16959_v9  ;;  %v11755_v8 = vcombine.high %v16996_v53, %v17025_v5 }
 0x6b7   : > { %v13513_v18 = vadd.f32 %v16886_v58, %v17080_v33  ;;  %v9328_v45 = vcombine.high %v17154_v2, %v17154_v2  ;;  %v13514_v0 = vadd.f32 %v17101_v49, %v16886_v58  ;;  %v9742_v32 = vrot.slane %v16920_v47, %v16900_v6 }
 0x6b8   : > { %v10149_v12 = vcombine.low %v9345_v57, %v9387_v59  ;;  %v10707_v61 = vrot.slane %v11754_v15, %v16890_v44  ;;  %v9760_v55 = vrot.slane %v16985_v51, %v16900_v6  ;;  %v10714_v9 = vrot.slane %v11755_v8, %v16890_v44 }
 0x6b9   : > { %v8817_v53 = vmax.f32 %v13513_v18, 0.0  ;;  %v8820_v5 = vmax.f32 %v13514_v0, 0.0  ;;  %v13515_v33 = vadd.f32 %v16886_v58, %v17108_v38  ;;  %v10363_v49 = vcombine.low %v9742_v32, %v16950_v10 }
 0x6ba   : > { %v17218_v2 = vrot.slane %v10149_v12, %v16900_v6  ;;  %v10364_v4 = vcombine.low %v9760_v55, %v17042_v60  ;;  %v13516_v47 = vadd.f32 %v17120_v14, %v16886_v58  ;;  %v10715_v3 = vcombine.low %v10707_v61, %v10714_v9 }
 0x6bb   : > { %v9363_v25 = vcombine.high %v8817_v53, %v8817_v53  ;;  %v9370_v51 = vrot.slane %v8817_v53, %v16890_v44  ;;  %v9413_v22 = vcombine.high %v8820_v5, %v8820_v5  ;;  %v9420_v7 = vrot.slane %v8820_v5, %v16890_v44 }
 0x6bc   : > { %v10371_v1 = vrot.slane %v10363_v49, %v16890_v44  ;;  %v10378_v38 = vrot.slane %v10364_v4, %v16890_v44  ;;  %v8819_v42 = vmax.f32 %v13515_v33, 0.0  ;;  %10733 = vrot.lane.b32.xlu0 %v10715_v3, %s14297_s8  ;;  %v8822_v49 = vmax.f32 %v13516_v47, 0.0 }
 0x6bd   : > { %v9377_v11 = vrot.slane %v9363_v25, %v16890_v44  ;;  %v9378_v17 = vcombine.high %v9370_v51, %v9370_v51  ;;  %v9861_v57 = vcombine.low %v9328_v45, %v9370_v51  ;;  %v9427_v14 = vrot.slane %v9413_v22, %v16890_v44 }
 0x6be   : > { %v9428_v59 = vcombine.high %v9420_v7, %v9420_v7  ;;  %v10379_v15 = vcombine.low %v10371_v1, %v10378_v38  ;;  %v9396_v8 = vcombine.high %v8819_v42, %v8819_v42  ;;  %v9403_v18 = vrot.slane %v8819_v42, %v16890_v44 }
 0x6bf   : > { %v9379_v0 = vcombine.high %v9377_v11, %v9377_v11  ;;  %v17233_v12 = vrot.slane %v9861_v57, %v16900_v6  ;;  %v9933_v61 = vcombine.low %v9336_v43, %v9378_v17  ;;  %v10005_v9 = vcombine.low %v9344_v52, %v9377_v11 }
 0x6c0   : > { %v9429_v53 = vcombine.high %v9427_v14, %v9427_v14  ;;  %v9410_v5 = vrot.slane %v9396_v8, %v16890_v44  ;;  %v9411_v33 = vcombine.high %v9403_v18, %v9403_v18  ;;  %10397 = vrot.lane.b32.xlu0 %v10379_v15, %s14298_s9  ;;  %v11742_v25 = vcombine.high %v9742_v32, %v16950_v10 }
 0x6c1   : > { %v17237_v45 = vrot.slane %v9933_v61, %v16900_v6  ;;  %v17240_v4 = vrot.slane %v10005_v9, %v16900_v6  ;;  %v17242_v3 = vcombine.low %v9343_v50, %v9379_v0  ;;  %v9447_v51 = vcombine.high %v8822_v49, %v8822_v49 }
 0x6c2   : > { %v9654_v43 = vcombine.low %v17197_v40, %v9429_v53  ;;  %v9412_v52 = vcombine.high %v9410_v5, %v9410_v5  ;;  %v9454_v22 = vrot.slane %v8822_v49, %v16890_v44  ;;  %v11743_v47 = vcombine.high %v9760_v55, %v17042_v60 }
 0x6c3   : > { %v10419_v1 = vrot.slane %v11742_v25, %v16890_v44  ;;  %v13517_v38 = vadd.f32 %v16886_v58, %v17125_v63  ;;  %v9395_v50 = vcombine.high %v17197_v40, %v17197_v40  ;;  %v9461_v10 = vrot.slane %v9447_v51, %v16890_v44 }
 0x6c4   : > { %v17255_v42 = vrot.slane %v9654_v43, %v16900_v6  ;;  %v9462_v32 = vcombine.high %v9454_v22, %v9454_v22  ;;  %v10014_v11 = vcombine.low %v9412_v52, %v9454_v22  ;;  %v10426_v17 = vrot.slane %v11743_v47, %v16890_v44 }
 0x6c5   : > { %v8821_v57 = vmax.f32 %v13517_v38, 0.0  ;;  %v10459_v60 = vcombine.low %v16909_v41, %v16953_v37  ;;  %v10460_v55 = vcombine.low %v16989_v39, %v17045_v16  ;;  %v10158_v40 = vcombine.low %v9428_v59, %v9461_v10 }
 0x6c6   : > { %v17264_v58 = vrot.slane %v10014_v11, %v16900_v6  ;;  %v10086_v63 = vcombine.low %v9420_v7, %v9462_v32  ;;  %v11746_v14 = vcombine.high %v16909_v41, %v16953_v37  ;;  %v10427_v15 = vcombine.low %v10419_v1, %v10426_v17 }
 0x6c7   : > { %v9430_v8 = vcombine.high %v8821_v57, %v8821_v57  ;;  %v9437_v0 = vrot.slane %v8821_v57, %v16890_v44  ;;  %v10467_v61 = vrot.slane %v10459_v60, %v16890_v44  ;;  %v17274_v53 = vrot.slane %v10158_v40, %v16900_v6 }
 0x6c8   : > { %v17271_v9 = vrot.slane %v10086_v63, %v16900_v6  ;;  %v10474_v49 = vrot.slane %v10460_v55, %v16890_v44  ;;  %v11747_v7 = vcombine.high %v16989_v39, %v17045_v16  ;;  %10445 = vrot.lane.b32.xlu0 %v10427_v15, %s14299_s10  ;;  %v10515_v25 = vrot.slane %v11746_v14, %v16890_v44 }
 0x6c9   : > { %v9444_v41 = vrot.slane %v9430_v8, %v16890_v44  ;;  %v9445_v37 = vcombine.high %v9437_v0, %v9437_v0  ;;  %v9726_v59 = vcombine.low %v9395_v50, %v9437_v0  ;;  %v9895_v51 = vrot.slane %v16955_v21, %v16900_v6 }
 0x6ca   : > { %v10475_v43 = vcombine.low %v10467_v61, %v10474_v49  ;;  %v10522_v52 = vrot.slane %v11747_v7, %v16890_v44  ;;  %v9913_v22 = vrot.slane %v17037_v19, %v16900_v6  ;;  %v11737_v63 = vcombine.high %v17187_v30, %v17255_v42 }
 0x6cb   : > { %v9446_v47 = vcombine.high %v9444_v41, %v9444_v41  ;;  %v9733_v39 = vrot.slane %v9726_v59, %v16900_v6  ;;  %v9798_v16 = vcombine.low %v9403_v18, %v9445_v37  ;;  %v9870_v1 = vcombine.low %v9411_v33, %v9444_v41 }
 0x6cc   : > { %v10523_v38 = vcombine.low %v10515_v25, %v10522_v52  ;;  %v10555_v10 = vcombine.low %v16912_v13, %v9895_v51  ;;  %v10556_v50 = vcombine.low %v16993_v34, %v9913_v22  ;;  %v11750_v32 = vcombine.high %v16912_v13, %v9895_v51  ;;  %10493 = vrot.lane.b32.xlu0 %v10475_v43, %s14300_s11  ;;  %v18131_v52 = vld [vmem:[#allocation9_spill] sm:$0xff] }
 0x6cd   : > { %v17292_v11 = vrot.slane %v9798_v16, %v16900_v6  ;;  %v17295_v21 = vrot.slane %v9870_v1, %v16900_v6  ;;  %v17297_v17 = vcombine.low %v9410_v5, %v9446_v47  ;;  %v11751_v19 = vcombine.high %v16993_v34, %v9913_v22  ;;  %v18132_v22 = vld [vmem:[#allocation13_spill] sm:$0xff] }
 0x6ce   : > { %v10563_v18 = vrot.slane %v10555_v10, %v16890_v44  ;;  %v10570_v33 = vrot.slane %v10556_v50, %v16890_v44  ;;  %v10611_v57 = vrot.slane %v11750_v32, %v16890_v44  ;;  %v10284_v13 = vcombine.low %v17086_v54, %v17123_v48 }
 0x6cf   : > { %v10618_v60 = vrot.slane %v11751_v19, %v16890_v44  ;;  %v10285_v55 = vcombine.low %v17190_v31, %v9733_v39  ;;  %v11736_v5 = vcombine.high %v17083_v24, %v17159_v46  ;;  %v11740_v14 = vcombine.high %v17086_v54, %v17123_v48 }
 0x6d0   : > { %v10571_v34 = vcombine.low %v10563_v18, %v10570_v33  ;;  %v10292_v40 = vrot.slane %v10284_v13, %v16890_v44  ;;  %v11741_v15 = vcombine.high %v17190_v31, %v9733_v39  ;;  %10541 = vrot.lane.b32.xlu0 %v10523_v38, %s14301_s12  ;;  %v10251_v49 = vrot.slane %v11737_v63, %v16890_v44  ;;  %v18133_v33 = vld [vmem:[#allocation8_spill] sm:$0xff]  ;;  %v18136_v63 = vld [vmem:[#allocation11_spill] sm:$0xff] }
 0x6d1   : > { %v10619_v8 = vcombine.low %v10611_v57, %v10618_v60  ;;  %v10299_v0 = vrot.slane %v10285_v55, %v16890_v44  ;;  %v10244_v61 = vrot.slane %v11736_v5, %v16890_v44  ;;  %v10340_v7 = vrot.slane %v11740_v14, %v16890_v44  ;;  %v18134_v57 = vld [vmem:[#allocation7_spill] sm:$0xff]  ;;  %v18135_v5 = vld [vmem:[#allocation14_spill] sm:$0xff] }
 0x6d2   : > { %v10347_v41 = vrot.slane %v11741_v15, %v16890_v44  ;;  %v10030_v37 = vrot.slane %v16917_v23, %v16900_v6  ;;  %v10048_v54 = vrot.slane %v16998_v27, %v16900_v6  ;;  %v10668_v59 = vcombine.low %v17075_v20, %v17175_v26 }
 0x6d3   : > { %v10300_v48 = vcombine.low %v10292_v40, %v10299_v0  ;;  %v10252_v31 = vcombine.low %v10244_v61, %v10251_v49  ;;  %v10669_v25 = vcombine.low %v17240_v4, %v17264_v58  ;;  %v11756_v50 = vcombine.high %v17075_v20, %v17175_v26 }
 0x6d4   : > { %v10348_v43 = vcombine.low %v10340_v7, %v10347_v41  ;;  %v10747_v51 = vcombine.low %v10030_v37, %v18131_v52  ;;  %v10748_v47 = vcombine.low %v10048_v54, %v18132_v22  ;;  %v11758_v39 = vcombine.high %v10030_v37, %v18131_v52  ;;  %10589 = vrot.lane.b32.xlu0 %v10571_v34, %s14302_s14 }
 0x6d5   : > { %10303 = vrot.lane.b32.xlu1 %v10300_v48, %s14294_s30  ;;  %v10676_v23 = vrot.slane %v10668_v59, %v16890_v44  ;;  %v10683_v27 = vrot.slane %v10669_v25, %v16890_v44  ;;  %v11759_v16 = vcombine.high %v10048_v54, %v18132_v22  ;;  %v11757_v18 = vcombine.high %v17240_v4, %v17264_v58  ;;  %v18138_v22 = vld [vmem:[#allocation16_spill] sm:$0xff]  ;;  %s11057_s30 = sshll.u32 %s215_s25, 4 }
 0x6d6   : > { %v10755_v1 = vrot.slane %v10747_v51, %v16890_v44  ;;  %v10762_v38 = vrot.slane %v10748_v47, %v16890_v44  ;;  %v17341_v10 = vrot.slane %v11758_v39, %v16890_v44  ;;  %v10843_v13 = vcombine.low %v18134_v57, %v18133_v33  ;;  %v18137_v51 = vld [vmem:[#allocation19_spill] sm:$0xff] }
 0x6d7   : > { %v10684_v32 = vcombine.low %v10676_v23, %v10683_v27  ;;  %v10810_v19 = vrot.slane %v11759_v16, %v16890_v44  ;;  %v10724_v55 = vrot.slane %v11756_v50, %v16890_v44  ;;  %v10844_v34 = vcombine.low %v18136_v63, %v18135_v5 }
 0x6d8   : > { %v10763_v60 = vcombine.low %v10755_v1, %v10762_v38  ;;  %v10066_v40 = vrot.slane %v17077_v28, %v16900_v6  ;;  %10637 = vrot.lane.b32.xlu0 %v10619_v8, %s14303_s13  ;;  %v10731_v26 = vrot.slane %v11757_v18, %v16890_v44  ;;  %v17360_v4 = vrot.slane %v10843_v13, %v16890_v44 }
 0x6d9   : > { %10351 = vrot.lane.b32.xlu1 %v10348_v43, %s14295_s6  ;;  %v10811_v20 = vcombine.low %v17341_v10, %v10810_v19  ;;  %v17363_v58 = vrot.slane %v10844_v34, %v16890_v44  ;;  %v10084_v14 = vrot.slane %v17242_v3, %v16900_v6  ;;  %v11762_v15 = vcombine.high %v18134_v57, %v18133_v33  ;;  %v18139_v19 = vld [vmem:[#allocation20_spill] sm:$0xff]  ;;  %v18140_v57 = vld [vmem:[#allocation18_spill] sm:$0xff]  ;;  %s217_s6 = scalar_lea.vmem [#allocation3], %s11057_s30 }
 0x6da   : > { %v10764_v28 = vcombine.low %v10066_v40, %v17180_v56  ;;  %v10732_v8 = vcombine.low %v10724_v55, %v10731_v26  ;;  %v11763_v0 = vcombine.high %v18136_v63, %v18135_v5  ;;  %v11760_v61 = vcombine.high %v10066_v40, %v17180_v56 }
 0x6db   : > { %v9778_v49 = vrot.slane %v17088_v62, %v16900_v6  ;;  %v10859_v7 = vcombine.low %v17360_v4, %v17363_v58  ;;  %v10765_v41 = vcombine.low %v10084_v14, %v17271_v9  ;;  %v17380_v37 = vrot.slane %v11762_v15, %v16890_v44 }
 0x6dc   : > { %v10772_v3 = vrot.slane %v10764_v28, %v16890_v44  ;;  %10255 = vrot.lane.b32.xlu0 %v10252_v31, %s14293_s26  ;;  %v17385_v54 = vrot.slane %v11763_v0, %v16890_v44  ;;  %v11761_v56 = vcombine.high %v10084_v14, %v17271_v9  ;;  %v10820_v62 = vrot.slane %v11760_v61, %v16890_v44 }
 0x6dd   : > { %10687 = vrot.lane.b32.xlu1 %v10684_v32, %s14296_s7  ;;  %v10779_v48 = vrot.slane %v10765_v41, %v16890_v44  ;;  %v9796_v59 = vrot.slane %v17193_v35, %v16900_v6  ;;  %v10380_v25 = vcombine.low %v9778_v49, %v17132_v36  ;;  %v11744_v43 = vcombine.high %v9778_v49, %v17132_v36  ;;  %v18142_v41 = vld [vmem:[#allocation6_spill] sm:$0xff]  ;;  %s10991_s7 = sshll.u32 %s217_s6, 4  ;;  %s17501_s7 = int_to_ptr.vmem [resolvable:$true] %s10991_s7 }
 0x6de   : > { %v10907_v31 = vcombine.low %v17380_v37, %v17385_v54  ;;  %v10827_v52 = vrot.slane %v11761_v56, %v16890_v44  ;;  %v10476_v47 = vcombine.low %v18138_v22, %v18137_v51  ;;  %v10477_v9 = vcombine.low %v17233_v12, %v17295_v21 }
 0x6df   : > { %v10780_v39 = vcombine.low %v10772_v3, %v10779_v48  ;;  %v10381_v23 = vcombine.low %v9796_v59, %v17292_v11  ;;  %v10388_v35 = vrot.slane %v10380_v25, %v16890_v44  ;;  %v11745_v27 = vcombine.high %v9796_v59, %v17292_v11  ;;  %v18143_v3 = vld [vmem:[#allocation10_spill] sm:$0xff]  ;;  %v18145_v48 = vld [vmem:[#allocation12_spill] sm:$0xff]  ;;  %v18146_v59 = vld [vmem:[#allocation15_spill] sm:$0xff] }
 0x6e0   : > { %10781 = vrot.lane.b32.xlu0 %v10763_v60, %s14304_s15  ;;  %v10828_v36 = vcombine.low %v10820_v62, %v10827_v52  ;;  %v10436_v16 = vrot.slane %v11744_v43, %v16890_v44  ;;  %v10484_v1 = vrot.slane %v10476_v47, %v16890_v44  ;;  %v10491_v50 = vrot.slane %v10477_v9, %v16890_v44 }
 0x6e1   : > { %10735 = vrot.lane.b32.xlu1 %v10732_v8, %s14297_s8  ;;  %v10395_v38 = vrot.slane %v10381_v23, %v16890_v44  ;;  %v10443_v10 = vrot.slane %v11745_v27, %v16890_v44  ;;  %v11748_v32 = vcombine.high %v18138_v22, %v18137_v51  ;;  %v11749_v11 = vcombine.high %v17233_v12, %v17295_v21  ;;  %v18141_v12 = vld [vmem:[#allocation17_spill] sm:$0xff]  ;;  %s11771_s8 = sshll.u32 %s14361_s22, 8  ;;  %s14226_s22 = scalar_lea.vmem %s17501_s7, 256 }
 0x6e2   : > { %v9931_v18 = vrot.slane %v18139_v19, %v16900_v6  ;;  %v9949_v33 = vrot.slane %v17297_v17, %v16900_v6  ;;  %v10860_v13 = vcombine.low %v18140_v57, %v17183_v29  ;;  %v10492_v5 = vcombine.low %v10484_v1, %v10491_v50  ;;  %p14227_p11 = scmp.ne.s32.totalorder %s17501_s7, %s14226_s22 }
 0x6e3   : > { %v10396_v60 = vcombine.low %v10388_v35, %v10395_v38  ;;  %v10444_v55 = vcombine.low %v10436_v16, %v10443_v10  ;;  %v10532_v63 = vrot.slane %v11748_v32, %v16890_v44  ;;  %v10539_v34 = vrot.slane %v11749_v11, %v16890_v44 }
 0x6e4   : > { %10829 = vrot.lane.b32.xlu0 %v10811_v20, %s14305_s16  ;;  %v10572_v21 = vcombine.low %v18141_v12, %v9931_v18  ;;  %v10573_v40 = vcombine.low %v17237_v45, %v9949_v33  ;;  %v11752_v26 = vcombine.high %v18141_v12, %v9931_v18  ;;  %v11753_v6 = vcombine.high %v17237_v45, %v9949_v33  ;;  %p14228_p12 = pnand %p14227_p11, %p14378_p5 }
 0x6e5   : > { %10783 = vrot.lane.b32.xlu1 %v10780_v39, %s14304_s15  ;;  %v10861_v17 = vcombine.low %v17218_v2, %v17274_v53  ;;  %v10868_v4 = vrot.slane %v10860_v13, %v16890_v44  ;;  %v10540_v58 = vcombine.low %v10532_v63, %v10539_v34  ;;  %v11764_v28 = vcombine.high %v18140_v57, %v17183_v29 }
 0x6e6   : > { %v10580_v14 = vrot.slane %v10572_v21, %v16890_v44  ;;  %v10587_v20 = vrot.slane %v10573_v40, %v16890_v44  ;;  %v10628_v15 = vrot.slane %v11752_v26, %v16890_v44  ;;  %v10635_v8 = vrot.slane %v11753_v6, %v16890_v44  ;;  %p14229_p13 = pneg %p14228_p12 }
 0x6e7   : > { %v10875_v0 = vrot.slane %v10861_v17, %v16890_v44  ;;  %v11765_v45 = vcombine.high %v17218_v2, %v17274_v53  ;;  %v10916_v49 = vrot.slane %v11764_v28, %v16890_v44  ;;  %v18144_v37 = vcombine.low %v18142_v41, %v18143_v3 }
 0x6e8   : > { %10877 = vrot.lane.b32.xlu0 %v10859_v7, %s14306_s17  ;;  %v10588_v61 = vcombine.low %v10580_v14, %v10587_v20  ;;  %v10636_v54 = vcombine.low %v10628_v15, %v10635_v8  ;;  %v18147_v25 = vcombine.low %v18145_v48, %v18146_v59  ;;  %v10192_v53 = vcombine.low %v17083_v24, %v17159_v46 }
 0x6e9   : > { %10831 = vrot.lane.b32.xlu1 %v10828_v36, %s14305_s16  ;;  %v10183_v29 = vrot.slane %v18144_v37, %v16890_v44  ;;  %v10876_v56 = vcombine.low %v10868_v4, %v10875_v0  ;;  %v10923_v62 = vrot.slane %v11765_v45, %v16890_v44  ;;  %v10193_v52 = vcombine.low %v17187_v30, %v17255_v42 }
 0x6ea   : > { %v10190_v2 = vrot.slane %v18147_v25, %v16890_v44  ;;  %v17454_v51 = vrot.slane %v10192_v53, %v16890_v44 }
 0x6eb   : > { %v10924_v7 = vcombine.low %v10916_v49, %v10923_v62  ;;  %v17457_v22 = vrot.slane %v10193_v52, %v16890_v44 }
 0x6ec   : > { %v10191_v43 = vcombine.low %v10183_v29, %v10190_v2  ;;  %10925 = vrot.lane.b32.xlu0 %v10907_v31, %s14307_s23 }
 0x6ed   : > { %10399 = vrot.lane.b32.xlu1 %v10396_v60, %s14298_s9  ;;  %v10208_v47 = vcombine.low %v17454_v51, %v17457_v22 }
 0x6f1   : > { %10447 = vrot.lane.b32.xlu1 %v10444_v55, %s14299_s10 }
 0x6f5   : > { %10495 = vrot.lane.b32.xlu1 %v10492_v5, %s14300_s11  ;;  %s17507_s11 = scalar_lea.hbm %s17559_s5, %s11771_s8 }
 0x6f9   : > { %10543 = vrot.lane.b32.xlu1 %v10540_v58, %s14301_s12  ;;  %s17512_s12 = scalar_lea.sflag [#allocation4], %s215_s25 }
 0x6fd   : > { %10591 = vrot.lane.b32.xlu1 %v10588_v61, %s14302_s14  ;;  %s14308_s14 = smov [#allocation3]  }
 0x701   : > { %10639 = vrot.lane.b32.xlu1 %v10636_v54, %s14303_s13  ;;  %s14230_s13 = sshll.u32 %s14308_s14, 4  ;;  %s14231_s13 = int_to_ptr.vmem [resolvable:$false] %s14230_s13 }
 0x702   : > { %s14232_s15 = scalar_lea.vmem %s14231_s13, 512  ;;  %p14233_p0 = scmp.lt.s32.totalorder %s17501_s7, %s14231_s13 }
 0x703   : > { %p14234_p1 = scmp.lt.s32.totalorder %s14232_s15, %s14226_s22 }
 0x705   : > { %10879 = vrot.lane.b32.xlu1 %v10876_v56, %s14306_s17  ;;  %p14235_p2 = por %p14234_p1, %p14233_p0 }
 0x707   : > { %p14236_p3 = pnand %p14235_p2, %p14229_p13 }
 0x709   : > { %10927 = vrot.lane.b32.xlu1 %v10924_v7, %s14307_s23 }
 0x719   : > { %v10254_v24 = vpop.permute.xlu0 %10253 }
 0x71a   : > { %v10931_v1 = vsel %vm18148_vm3, %v10191_v43, %v10254_v24 }
 0x71b   : > { %v10302_v39 = vpop.permute.xlu1 %10301 }
 0x71c   : > { %v10934_v38 = vsel %vm10933_vm12, %v10931_v1, %v10302_v39 }
 0x721   : > { %v10350_v46 = vpop.permute.xlu0 %10349 }
 0x722   : > { %v10937_v32 = vsel %vm10936_vm14, %v10934_v38, %v10350_v46 }
 0x725   : > { %v10686_v30 = vpop.permute.xlu0 %10685 }
 0x72e   : > { %v10734_v44 = vpop.permute.xlu0 %10733 }
 0x732   : > { %v10398_v42 = vpop.permute.xlu0 %10397 }
 0x733   : > { %v10940_v11 = vsel %vm10939_vm10, %v10937_v32, %v10398_v42 }
 0x73a   : > { %v10446_v31 = vpop.permute.xlu0 %10445 }
 0x73b   : > { %v10943_v19 = vsel %vm10942_vm9, %v10940_v11, %v10446_v31 }
 0x73e   : > { %v10494_v9 = vpop.permute.xlu0 %10493 }
 0x73f   : > { %v10946_v18 = vsel %vm10945_vm6, %v10943_v19, %v10494_v9 }
 0x742   : > { %v10542_v23 = vpop.permute.xlu0 %10541 }
 0x743   : > { %v10949_v13 = vsel %vm10948_vm1, %v10946_v18, %v10542_v23 }
 0x746   : > { %v10590_v35 = vpop.permute.xlu0 %10589 }
 0x747   : > { %v10304_v27 = vpop.permute.xlu1 %10303  ;;  %v10952_v60 = vsel %vm10951_vm8, %v10949_v13, %v10590_v35 }
 0x74a   : > { %v10638_v36 = vpop.permute.xlu0 %10637 }
 0x74b   : > { %v10352_v16 = vpop.permute.xlu1 %10351  ;;  %v10955_v55 = vsel %vm10954_vm11, %v10952_v60, %v10638_v36 }
 0x74c   : > { %v10958_v34 = vsel %vm10957_vm7, %v10955_v55, %v10686_v30 }
 0x74d   : > { %v10961_v40 = vsel %vm10960_vm13, %v10958_v34, %v10734_v44 }
 0x74e   : > { %v10256_v10 = vpop.permute.xlu0 %10255 }
 0x74f   : > { %v10688_v50 = vpop.permute.xlu1 %10687  ;;  %v10932_v15 = vsel %vm17845_vm0, %v10208_v47, %v10256_v10 }
 0x750   : > { %v10935_v8 = vsel %vm10933_vm12, %v10932_v15, %v10304_v27 }
 0x751   : > { %v10938_v45 = vsel %vm10936_vm14, %v10935_v8, %v10352_v16 }
 0x752   : > { %v10782_v33 = vpop.permute.xlu0 %10781 }
 0x753   : > { %v10736_v57 = vpop.permute.xlu1 %10735  ;;  %v10964_v26 = vsel %vm10963_vm5, %v10961_v40, %v10782_v33 }
 0x756   : > { %v10830_v5 = vpop.permute.xlu0 %10829 }
 0x757   : > { %v10784_v63 = vpop.permute.xlu1 %10783  ;;  %v10967_v6 = vsel %vm10966_vm4, %v10964_v26, %v10830_v5 }
 0x75a   : > { %v10878_v12 = vpop.permute.xlu0 %10877 }
 0x75b   : > { %v10832_v21 = vpop.permute.xlu1 %10831  ;;  %v10970_v17 = vsel %vm10969_vm2, %v10967_v6, %v10878_v12 }
 0x75e   : > { %v10926_v4 = vpop.permute.xlu0 %10925 }
 0x75f   : > { %v10400_v58 = vpop.permute.xlu1 %10399  ;;  %v10973_v14 = vsel %vm10972_vm15, %v10970_v17, %v10926_v4 }
 0x760   : > { %10975 = vst [vmem:[%s217_s6] sm:$0xff] %v10973_v14  ;;  %v10941_v61 = vsel %vm10939_vm10, %v10938_v45, %v10400_v58 }
 0x763   : > { %v10448_v20 = vpop.permute.xlu1 %10447 }
 0x764   : > { %v10944_v41 = vsel %vm10942_vm9, %v10941_v61, %v10448_v20 }
 0x767   : > { %v10496_v28 = vpop.permute.xlu1 %10495 }
 0x768   : > { %v10947_v3 = vsel %vm10945_vm6, %v10944_v41, %v10496_v28 }
 0x76b   : > { %v10544_v0 = vpop.permute.xlu1 %10543 }
 0x76c   : > { %v10950_v37 = vsel %vm10948_vm1, %v10947_v3, %v10544_v0 }
 0x76f   : > { %v10592_v49 = vpop.permute.xlu1 %10591 }
 0x770   : > { %v10953_v29 = vsel %vm10951_vm8, %v10950_v37, %v10592_v49 }
 0x773   : > { %v10640_v54 = vpop.permute.xlu1 %10639 }
 0x774   : > { %v10956_v56 = vsel %vm10954_vm11, %v10953_v29, %v10640_v54 }
 0x775   : > { %v10959_v62 = vsel %vm10957_vm7, %v10956_v56, %v10688_v50 }
 0x776   : > { %v10962_v48 = vsel %vm10960_vm13, %v10959_v62, %v10736_v57 }
 0x777   : > { %v10965_v59 = vsel %vm10963_vm5, %v10962_v48, %v10784_v63  ;;  %v10880_v25 = vpop.permute.xlu1 %10879 }
 0x778   : > { %v10968_v2 = vsel %vm10966_vm4, %v10965_v59, %v10832_v21 }
 0x779   : > { %v10971_v53 = vsel %vm10969_vm2, %v10968_v2, %v10880_v25 }
 0x77b   : > { %v10928_v7 = vpop.permute.xlu1 %10927 }
 0x77c   : > { %v10974_v43 = vsel %vm10972_vm15, %v10971_v53, %v10928_v7 }
 0x77d   : > { %10976 = vst [vmem:[%s217_s6 + $0x8] sm:$0xff] %v10974_v43 }
 0x77e   : > { %14239 = shalt.err (!%p14236_p3)
}
 0x77f   : > { %s14240_s16 = scalar_lea.hbm %s17507_s11, 256  ;;  %s14244_s25 = scalar_lea.hbm %s17559_s5, 512 }
 0x780   : > { %p14241_p4 = scmp.ne.s32.totalorder %s17507_s11, %s14240_s16  ;;  %p14245_p9 = scmp.lt.u32.totalorder %s17507_s11, %s17559_s5 }
 0x781   : > { %p14246_p10 = scmp.lt.u32.totalorder %s14244_s25, %s14240_s16  ;;  %p14248_p12 = scmp.lt.u32.totalorder %s14240_s16, %s17507_s11 }
 0x782   : > { %p14242_p7 = pnand %p14241_p4, %p14378_p5 }
 0x783   : > { %p14247_p11 = por %p14246_p10, %p14245_p9 }
 0x784   : > { %p14243_p8 = pneg %p14242_p7 }
 0x785   : > { %p14249_p13 = por %p14248_p12, %p14247_p11 }
 0x787   : > { %p14250_p0 = pnand %p14249_p13, %p14243_p8 }
 0x789   : > { %14253 = shalt.err (!%p14250_p0)
}
 0x78a   : > { %s14309_s8 = smov 128  }
 0x78b   : > { %14167 = dma.vmem_to_hbm [thread:$0]  (%p14378_p5), %s17501_s7, 256, %s17507_s11, %s17512_s12, %s14309_s8, %s14309_s8, %s14293_s26  }
 0x78c PF: > { %p14173_p1 = scmp.ge.s32.totalorder %s14288_s21, 2  ;;  %s11006_s9 = sand.u32 1, %s14276_s18  }
 0x78d   : > { %s11007_s10 = scalar_lea.sflag [#allocation4], %s11006_s9 }
 0x78e   : > { %p14170_p2 = pnand %p14173_p1, %p14382_p6 }
 0x790   : > { %14271 = dma.done.wait (!%p14170_p2), %s11007_s10, 256  }
 0x791   : > { %14273 = vsyncadd (!%p14170_p2), %s11007_s10, 4294967040  ;;  %p15_p3 = scmp.ge.s32.totalorder %s14365_s24, 4   ;;  %s18149_s18 = smov %s14280_s19 }
 0x792   : > { %s18150_s19 = smov %s14284_s20  ;;  %s18151_s20 = smov %s14376_s27 }
 0x793   : > { %s18152_s21 = smov %s14365_s24  ;;  %17 = sbr.rel (!%p15_p3) target bundleno = 3 (0x3), region = 91 }
 0x79a   :  { %11012 = vsyncpa [#allocation4], 1 }
 0x79b   :  { %11014 = vsyncpa [#allocation4 + $0x1], 1 }

</bundles_post_ra>
